<compile_context>
chip_gen: v6e
topology: v6e:2x2x1
jax: 0.10.0
libtpu: 0.0.40
codegen_flags: <defaults>
</compile_context>

<pallas_src>
import functools
import math

import jax
import jax.numpy as jnp
from jax.experimental import pallas as pl
from jax.experimental.pallas import tpu as pltpu

# ---------------- scaled-down ViT config ----------------
IMG = 32          # spatial size (224 in the real model)
PATCH = 16        # patch size (same as vit_base_patch16)
CIN = 3           # RGB
EMBED = 64        # embedding dim (768 in vit_base)
HEADS = 4         # attention heads (12 in vit_base)
HD = EMBED // HEADS
DEPTH = 2         # transformer blocks (12 in vit_base)
MLP_HIDDEN = 4 * EMBED
N_PATCH = (IMG // PATCH) ** 2
SEQ = N_PATCH + 1          # +1 CLS token
LN_EPS = 1e-6

_SQRT2 = 1.4142135623730951


# ---------------- in-kernel helpers (f32 math) ----------------
def _layernorm(x, g, b):
    mu = jnp.mean(x, axis=-1, keepdims=True)
    var = jnp.mean((x - mu) ** 2, axis=-1, keepdims=True)
    return (x - mu) * jax.lax.rsqrt(var + LN_EPS) * g + b


def _gelu_exact(x):
    # exact (erf) GELU, matching torch.nn.GELU default
    return 0.5 * x * (1.0 + jax.lax.erf(x / _SQRT2))


def _bf16(x):
    return x.astype(jnp.bfloat16)


# ---------------- fused forward kernel -------------------------------------
# grid = (B // Bt, DEPTH); batch "parallel", depth "arbitrary".
# The [Bt, S, D] activation lives in f32 VMEM scratch across depth steps.
def fused_vit_kernel(patches_ref,                    # [Bt, N_PATCH, C*P*P] bf16
                     pw_ref, pb_ref,                 # [C*P*P, D] bf16, [1, D] f32
                     cls_ref, pos_ref,               # [1, D], [S, D] f32
                     ln1g_ref, ln1b_ref,             # [1, 1, D] f32   (depth block)
                     wq_ref, bq_ref,                 # [1, H, D, hd] bf16, [1, H, 1, hd] f32
                     wk_ref, bk_ref,
                     wv_ref, bv_ref,
                     projw_ref, projb_ref,           # [1, H, hd, D] bf16, [1, 1, D] f32
                     ln2g_ref, ln2b_ref,             # [1, 1, D] f32
                     fc1w_ref, fc1b_ref,             # [1, D, Hmlp] bf16, [1, 1, Hmlp] f32
                     fc2w_ref, fc2b_ref,             # [1, Hmlp, D] bf16, [1, 1, D] f32
                     ng_ref, nb_ref,                 # [1, D] f32
                     o_ref,                          # [1, Bt, D] f32
                     x_scr,                          # VMEM [Bt, S, D] f32
                     *, bt):
    d = pl.program_id(1)
    scale = 1.0 / math.sqrt(HD)

    # ---- d == 0: patch-embed matmul + CLS + pos-embed straight into scratch ----
    @pl.when(d == 0)
    def _init():
        pw = pw_ref[...]                                             # [cpp, D] bf16
        for i in range(bt):
            tok = jnp.dot(patches_ref[i], pw,
                          preferred_element_type=jnp.float32) + pb_ref[...]
            x_scr[i, 1:, :] = tok + pos_ref[1:, :]                   # patch tokens
            x_scr[i, 0:1, :] = cls_ref[...] + pos_ref[0:1, :]        # CLS token

    # ---- one transformer block (weights of layer `d` are this step's blocks) ----
    ln1g = ln1g_ref[0]
    ln1b = ln1b_ref[0]
    ln2g = ln2g_ref[0]
    ln2b = ln2b_ref[0]
    wq = wq_ref[0]                  # [H, D, hd] bf16
    wk = wk_ref[0]
    wv = wv_ref[0]
    bq = bq_ref[0]                  # [H, 1, hd] f32
    bk = bk_ref[0]
    bv = bv_ref[0]
    projw = projw_ref[0]            # [H, hd, D] bf16
    projb = projb_ref[0]            # [1, D] f32
    fc1w = fc1w_ref[0]              # [D, Hmlp] bf16
    fc1b = fc1b_ref[0]
    fc2w = fc2w_ref[0]              # [Hmlp, D] bf16
    fc2b = fc2b_ref[0]

    batch01 = (((2,), (1,)), ((0,), (0,)))   # contract last-lhs with dim1-rhs, batch head
    batch22 = (((2,), (2,)), ((0,), (0,)))   # contract last dims, batch head

    for i in range(bt):
        xi = x_scr[i]                                                # [S, D] f32

        # --- multi-head self-attention (head-batched dot_generals, no concat) ---
        h = _bf16(_layernorm(xi, ln1g, ln1b))
        hb = jnp.broadcast_to(h, (HEADS, SEQ, EMBED))                # [H, S, D] bf16
        q = jax.lax.dot_general(hb, wq, batch01,
                                preferred_element_type=jnp.float32) + bq   # [H,S,hd]
        k = jax.lax.dot_general(hb, wk, batch01,
                                preferred_element_type=jnp.float32) + bk
        v = jax.lax.dot_general(hb, wv, batch01,
                                preferred_element_type=jnp.float32) + bv
        s = jax.lax.dot_general(_bf16(q), _bf16(k), batch22,
                                preferred_element_type=jnp.float32) * scale  # [H,S,S]
        s = s - jnp.max(s, axis=-1, keepdims=True)
        p = jnp.exp(s)
        p = p * pl.reciprocal(jnp.sum(p, axis=-1, keepdims=True), approx=False)
        o = jax.lax.dot_general(_bf16(p), _bf16(v), batch01,
                                preferred_element_type=jnp.float32)          # [H,S,hd]
        y = jax.lax.dot_general(_bf16(o), projw, batch01,
                                preferred_element_type=jnp.float32)          # [H,S,D]
        xi = xi + (jnp.sum(y, axis=0) + projb)                               # residual

        # --- MLP ---
        h2 = _layernorm(xi, ln2g, ln2b)
        h2 = jnp.dot(_bf16(h2), fc1w, preferred_element_type=jnp.float32) + fc1b
        h2 = _gelu_exact(h2)
        h2 = jnp.dot(_bf16(h2), fc2w, preferred_element_type=jnp.float32) + fc2b
        x_scr[i] = xi + h2                                                   # residual

    # ---- d == DEPTH-1: final LayerNorm, head = Identity -> store CLS rows ----
    @pl.when(d == DEPTH - 1)
    def _final():
        cls_rows = jnp.concatenate([x_scr[i, 0:1, :] for i in range(bt)], axis=0)
        o_ref[0] = _layernorm(cls_rows, ng_ref[...], nb_ref[...]).astype(o_ref.dtype)


# ---------------- parameter init (deterministic, synthetic) ----------------
def init_params(key):
    def nrm(k, shape, std=0.02):
        return (std * jax.random.normal(k, shape)).astype(jnp.float32)

    keys = jax.random.split(key, 3 + 6 * DEPTH)
    p = {
        "patch_w": nrm(keys[0], (EMBED, CIN, PATCH, PATCH)),   # Conv2d weight layout
        "patch_b": jnp.zeros((1, EMBED), jnp.float32),
        "cls_token": nrm(keys[1], (1, EMBED)),
        "pos_embed": nrm(keys[2], (SEQ, EMBED)),
        "norm_g": jnp.ones((1, EMBED), jnp.float32),
        "norm_b": jnp.zeros((1, EMBED), jnp.float32),
        # per-block params, stacked along a leading DEPTH axis
        "ln1_g": jnp.ones((DEPTH, 1, EMBED), jnp.float32),
        "ln1_b": jnp.zeros((DEPTH, 1, EMBED), jnp.float32),
        "ln2_g": jnp.ones((DEPTH, 1, EMBED), jnp.float32),
        "ln2_b": jnp.zeros((DEPTH, 1, EMBED), jnp.float32),
        "bq": jnp.zeros((DEPTH, HEADS, 1, HD), jnp.float32),
        "bk": jnp.zeros((DEPTH, HEADS, 1, HD), jnp.float32),
        "bv": jnp.zeros((DEPTH, HEADS, 1, HD), jnp.float32),
        "proj_b": jnp.zeros((DEPTH, 1, EMBED), jnp.float32),
        "fc1_b": jnp.zeros((DEPTH, 1, MLP_HIDDEN), jnp.float32),
        "fc2_b": jnp.zeros((DEPTH, 1, EMBED), jnp.float32),
    }
    wq, wk, wv, projw, fc1w, fc2w = [], [], [], [], [], []
    for d in range(DEPTH):
        k6 = keys[3 + 6 * d: 3 + 6 * (d + 1)]
        wq.append(nrm(k6[0], (HEADS, EMBED, HD)))      # per-head q weight
        wk.append(nrm(k6[1], (HEADS, EMBED, HD)))
        wv.append(nrm(k6[2], (HEADS, EMBED, HD)))
        projw.append(nrm(k6[3], (HEADS, HD, EMBED)))   # row-blocked output proj
        fc1w.append(nrm(k6[4], (EMBED, MLP_HIDDEN)))
        fc2w.append(nrm(k6[5], (MLP_HIDDEN, EMBED)))
    # MXU operands stored as bf16 (halves weight DMA); biases / LN stay f32.
    p["wq"] = jnp.stack(wq).astype(jnp.bfloat16)
    p["wk"] = jnp.stack(wk).astype(jnp.bfloat16)
    p["wv"] = jnp.stack(wv).astype(jnp.bfloat16)
    p["proj_w"] = jnp.stack(projw).astype(jnp.bfloat16)
    p["fc1_w"] = jnp.stack(fc1w).astype(jnp.bfloat16)
    p["fc2_w"] = jnp.stack(fc2w).astype(jnp.bfloat16)
    return p


# ---------------- forward pass (== MyFeatureExtractor.forward) ----------------
def feature_extractor(x, params, *, bt=2):
    """x: [B, C, H, W] (NCHW, PyTorch layout).  Returns CLS features [B, EMBED]."""
    B, C, H, W = x.shape
    assert B % bt == 0, (B, bt)
    gh, gw = H // PATCH, W // PATCH
    n_patch = gh * gw
    cpp = C * PATCH * PATCH

    # patch extraction in (C, kh, kw) order == Conv2d(kernel=stride=PATCH)
    # TODO(synk): could fuse patchification in-kernel (strided loads) to avoid
    # this host-side HBM round-trip of the input; low priority per profile.
    patches = (
        x.reshape(B, C, gh, PATCH, gw, PATCH)
        .transpose(0, 2, 4, 1, 3, 5)
        .reshape(B, n_patch, cpp)
    ).astype(jnp.bfloat16)
    w_flat = params["patch_w"].reshape(EMBED, cpp).T.astype(jnp.bfloat16)   # [cpp, D]

    args = (
        patches,                                     # per-batch block
        w_flat, params["patch_b"],                   # constants
        params["cls_token"], params["pos_embed"],
        params["ln1_g"], params["ln1_b"],            # per-depth blocks
        params["wq"], params["bq"],
        params["wk"], params["bk"],
        params["wv"], params["bv"],
        params["proj_w"], params["proj_b"],
        params["ln2_g"], params["ln2_b"],
        params["fc1_w"], params["fc1_b"],
        params["fc2_w"], params["fc2_b"],
        params["norm_g"], params["norm_b"],          # constants
    )

    def const_spec(a):
        nd = a.ndim
        return pl.BlockSpec(a.shape, lambda b, d, _nd=nd: (0,) * _nd)

    def depth_spec(a):
        nd = a.ndim
        return pl.BlockSpec((1,) + a.shape[1:],
                            lambda b, d, _nd=nd: (d,) + (0,) * (_nd - 1))

    in_specs = [pl.BlockSpec((bt, n_patch, cpp), lambda b, d: (b, 0, 0))]
    in_specs += [const_spec(a) for a in args[1:5]]
    in_specs += [depth_spec(a) for a in args[5:21]]
    in_specs += [const_spec(a) for a in args[21:]]

    feats = pl.pallas_call(
        functools.partial(fused_vit_kernel, bt=bt),
        out_shape=jax.ShapeDtypeStruct((B // bt, bt, EMBED), jnp.float32),
        grid=(B // bt, DEPTH),
        in_specs=in_specs,
        out_specs=pl.BlockSpec((1, bt, EMBED), lambda b, d: (b, 0, 0)),
        scratch_shapes=[pltpu.VMEM((bt, SEQ, EMBED), jnp.float32)],
        compiler_params=pltpu.CompilerParams(
            dimension_semantics=("parallel", "arbitrary"),   # batch across TCs on v7x
            vmem_limit_bytes=32 * 1024 * 1024),
    )(*args)
    return feats.reshape(B, EMBED)                           # head = Identity


if __name__ == "__main__":
    key = jax.random.PRNGKey(0)
    pkey, xkey = jax.random.split(key)
    params = init_params(pkey)

    B = 4
    x = jax.random.normal(xkey, (B, CIN, IMG, IMG), dtype=jnp.float32)

    feats = jax.jit(functools.partial(feature_extractor, params=params))(x)
    feats = jax.block_until_ready(feats)

    assert feats.shape == (B, EMBED), feats.shape
    assert jnp.all(jnp.isfinite(feats))
    print("KERNEL_OK")
</pallas_src>

<mosaic_0001>
module attributes {stable_mosaic.version = 11 : i64} {
  func.func @fused_vit_kernel(%arg0: i32, %arg1: i32, %arg2: memref<2x4x768xbf16, #tpu.memory_space<vmem>>, %arg3: memref<768x64xbf16, #tpu.memory_space<vmem>>, %arg4: memref<1x64xf32, #tpu.memory_space<vmem>>, %arg5: memref<1x64xf32, #tpu.memory_space<vmem>>, %arg6: memref<5x64xf32, #tpu.memory_space<vmem>>, %arg7: memref<1x1x64xf32, #tpu.memory_space<vmem>>, %arg8: memref<1x1x64xf32, #tpu.memory_space<vmem>>, %arg9: memref<1x4x64x16xbf16, #tpu.memory_space<vmem>>, %arg10: memref<1x4x1x16xf32, #tpu.memory_space<vmem>>, %arg11: memref<1x4x64x16xbf16, #tpu.memory_space<vmem>>, %arg12: memref<1x4x1x16xf32, #tpu.memory_space<vmem>>, %arg13: memref<1x4x64x16xbf16, #tpu.memory_space<vmem>>, %arg14: memref<1x4x1x16xf32, #tpu.memory_space<vmem>>, %arg15: memref<1x4x16x64xbf16, #tpu.memory_space<vmem>>, %arg16: memref<1x1x64xf32, #tpu.memory_space<vmem>>, %arg17: memref<1x1x64xf32, #tpu.memory_space<vmem>>, %arg18: memref<1x1x64xf32, #tpu.memory_space<vmem>>, %arg19: memref<1x64x256xbf16, #tpu.memory_space<vmem>>, %arg20: memref<1x1x256xf32, #tpu.memory_space<vmem>>, %arg21: memref<1x256x64xbf16, #tpu.memory_space<vmem>>, %arg22: memref<1x1x64xf32, #tpu.memory_space<vmem>>, %arg23: memref<1x64xf32, #tpu.memory_space<vmem>>, %arg24: memref<1x64xf32, #tpu.memory_space<vmem>>, %arg25: memref<1x2x64xf32, #tpu.memory_space<vmem>>, %arg26: memref<2x5x64xf32, #tpu.memory_space<vmem>>) attributes {dimension_semantics = [#tpu.dimension_semantics<parallel>, #tpu.dimension_semantics<arbitrary>], iteration_bounds = array<i64: 2, 2>, scalar_prefetch = 0 : i64, scratch_operands = 1 : i64, tpu.core_type = #tpu.core_type<tc>, window_params = [{transform_indices = @transform_0, window_bounds = array<i64: 2, 4, 768>}, {pipeline_mode = #tpu.pipeline_mode<synchronous>, transform_indices = @transform_1, window_bounds = array<i64: 768, 64>}, {pipeline_mode = #tpu.pipeline_mode<synchronous>, transform_indices = @transform_2, window_bounds = array<i64: 1, 64>}, {pipeline_mode = #tpu.pipeline_mode<synchronous>, transform_indices = @transform_3, window_bounds = array<i64: 1, 64>}, {pipeline_mode = #tpu.pipeline_mode<synchronous>, transform_indices = @transform_4, window_bounds = array<i64: 5, 64>}, {transform_indices = @transform_5, window_bounds = array<i64: 1, 1, 64>}, {transform_indices = @transform_6, window_bounds = array<i64: 1, 1, 64>}, {transform_indices = @transform_7, window_bounds = array<i64: 1, 4, 64, 16>}, {transform_indices = @transform_8, window_bounds = array<i64: 1, 4, 1, 16>}, {transform_indices = @transform_9, window_bounds = array<i64: 1, 4, 64, 16>}, {transform_indices = @transform_10, window_bounds = array<i64: 1, 4, 1, 16>}, {transform_indices = @transform_11, window_bounds = array<i64: 1, 4, 64, 16>}, {transform_indices = @transform_12, window_bounds = array<i64: 1, 4, 1, 16>}, {transform_indices = @transform_13, window_bounds = array<i64: 1, 4, 16, 64>}, {transform_indices = @transform_14, window_bounds = array<i64: 1, 1, 64>}, {transform_indices = @transform_15, window_bounds = array<i64: 1, 1, 64>}, {transform_indices = @transform_16, window_bounds = array<i64: 1, 1, 64>}, {transform_indices = @transform_17, window_bounds = array<i64: 1, 64, 256>}, {transform_indices = @transform_18, window_bounds = array<i64: 1, 1, 256>}, {transform_indices = @transform_19, window_bounds = array<i64: 1, 256, 64>}, {transform_indices = @transform_20, window_bounds = array<i64: 1, 1, 64>}, {pipeline_mode = #tpu.pipeline_mode<synchronous>, transform_indices = @transform_21, window_bounds = array<i64: 1, 64>}, {pipeline_mode = #tpu.pipeline_mode<synchronous>, transform_indices = @transform_22, window_bounds = array<i64: 1, 64>}, {transform_indices = @transform_23, window_bounds = array<i64: 1, 2, 64>}]} {
    %c0_i32 = arith.constant 0 : i32
    %0 = arith.cmpi eq, %arg1, %c0_i32 : i32
    %1 = arith.extui %0 : i1 to i32
    %c0_i32_0 = arith.constant 0 : i32
    %2 = arith.cmpi ne, %1, %c0_i32_0 : i32
    scf.if %2 {
      %c0_116 = arith.constant 0 : index
      %c0_117 = arith.constant 0 : index
      %242 = vector.load %arg3[%c0_116, %c0_117] : memref<768x64xbf16, #tpu.memory_space<vmem>>, vector<768x64xbf16>
      %c0_118 = arith.constant 0 : index
      %c0_119 = arith.constant 0 : index
      %c0_120 = arith.constant 0 : index
      %243 = vector.load %arg2[%c0_118, %c0_119, %c0_120] : memref<2x4x768xbf16, #tpu.memory_space<vmem>>, vector<1x4x768xbf16>
      %244 = vector.shape_cast %243 : vector<1x4x768xbf16> to vector<4x768xbf16>
      %cst_121 = arith.constant dense<0.000000e+00> : vector<4x64xf32>
      %245 = tpu.matmul %244, %242, %cst_121 {dimension_numbers = #tpu.dot_dimension_numbers<[1], [0], [0], [1], [0, 0, 1, 1], [], []>} : vector<4x768xbf16>, vector<768x64xbf16>, vector<4x64xf32> -> vector<4x64xf32>
      %c0_122 = arith.constant 0 : index
      %c0_123 = arith.constant 0 : index
      %246 = vector.load %arg4[%c0_122, %c0_123] : memref<1x64xf32, #tpu.memory_space<vmem>>, vector<1x64xf32>
      %247 = vector.broadcast %246 : vector<1x64xf32> to vector<4x64xf32>
      %248 = arith.addf %245, %247 : vector<4x64xf32>
      %c1_124 = arith.constant 1 : index
      %c0_125 = arith.constant 0 : index
      %249 = vector.load %arg6[%c1_124, %c0_125] : memref<5x64xf32, #tpu.memory_space<vmem>>, vector<4x64xf32>
      %250 = arith.addf %248, %249 : vector<4x64xf32>
      %c0_126 = arith.constant 0 : index
      %c1_127 = arith.constant 1 : index
      %c0_128 = arith.constant 0 : index
      %251 = vector.load %arg26[%c0_126, %c1_127, %c0_128] : memref<2x5x64xf32, #tpu.memory_space<vmem>>, vector<1x4x64xf32>
      %252 = vector.shape_cast %251 : vector<1x4x64xf32> to vector<4x64xf32>
      %253 = vector.shape_cast %250 : vector<4x64xf32> to vector<1x4x64xf32>
      tpu.vector_store %arg26[%c0_126, %c1_127, %c0_128], %253 {strides = array<i32>} : memref<2x5x64xf32, #tpu.memory_space<vmem>>, vector<1x4x64xf32>,
      %c0_129 = arith.constant 0 : index
      %c0_130 = arith.constant 0 : index
      %254 = vector.load %arg5[%c0_129, %c0_130] : memref<1x64xf32, #tpu.memory_space<vmem>>, vector<1x64xf32>
      %c0_131 = arith.constant 0 : index
      %c0_132 = arith.constant 0 : index
      %255 = vector.load %arg6[%c0_131, %c0_132] : memref<5x64xf32, #tpu.memory_space<vmem>>, vector<1x64xf32>
      %256 = arith.addf %254, %255 : vector<1x64xf32>
      %c0_133 = arith.constant 0 : index
      %c0_134 = arith.constant 0 : index
      %c0_135 = arith.constant 0 : index
      %257 = vector.load %arg26[%c0_133, %c0_134, %c0_135] : memref<2x5x64xf32, #tpu.memory_space<vmem>>, vector<1x1x64xf32>
      %258 = vector.shape_cast %257 : vector<1x1x64xf32> to vector<1x64xf32>
      %259 = vector.shape_cast %256 : vector<1x64xf32> to vector<1x1x64xf32>
      tpu.vector_store %arg26[%c0_133, %c0_134, %c0_135], %259 {strides = array<i32>} : memref<2x5x64xf32, #tpu.memory_space<vmem>>, vector<1x1x64xf32>,
      %c1_136 = arith.constant 1 : index
      %c0_137 = arith.constant 0 : index
      %c0_138 = arith.constant 0 : index
      %260 = vector.load %arg2[%c1_136, %c0_137, %c0_138] : memref<2x4x768xbf16, #tpu.memory_space<vmem>>, vector<1x4x768xbf16>
      %261 = vector.shape_cast %260 : vector<1x4x768xbf16> to vector<4x768xbf16>
      %cst_139 = arith.constant dense<0.000000e+00> : vector<4x64xf32>
      %262 = tpu.matmul %261, %242, %cst_139 {dimension_numbers = #tpu.dot_dimension_numbers<[1], [0], [0], [1], [0, 0, 1, 1], [], []>} : vector<4x768xbf16>, vector<768x64xbf16>, vector<4x64xf32> -> vector<4x64xf32>
      %c0_140 = arith.constant 0 : index
      %c0_141 = arith.constant 0 : index
      %263 = vector.load %arg4[%c0_140, %c0_141] : memref<1x64xf32, #tpu.memory_space<vmem>>, vector<1x64xf32>
      %264 = vector.broadcast %263 : vector<1x64xf32> to vector<4x64xf32>
      %265 = arith.addf %262, %264 : vector<4x64xf32>
      %c1_142 = arith.constant 1 : index
      %c0_143 = arith.constant 0 : index
      %266 = vector.load %arg6[%c1_142, %c0_143] : memref<5x64xf32, #tpu.memory_space<vmem>>, vector<4x64xf32>
      %267 = arith.addf %265, %266 : vector<4x64xf32>
      %c1_144 = arith.constant 1 : index
      %c1_145 = arith.constant 1 : index
      %c0_146 = arith.constant 0 : index
      %268 = vector.load %arg26[%c1_144, %c1_145, %c0_146] : memref<2x5x64xf32, #tpu.memory_space<vmem>>, vector<1x4x64xf32>
      %269 = vector.shape_cast %268 : vector<1x4x64xf32> to vector<4x64xf32>
      %270 = vector.shape_cast %267 : vector<4x64xf32> to vector<1x4x64xf32>
      tpu.vector_store %arg26[%c1_144, %c1_145, %c0_146], %270 {strides = array<i32>} : memref<2x5x64xf32, #tpu.memory_space<vmem>>, vector<1x4x64xf32>,
      %c0_147 = arith.constant 0 : index
      %c0_148 = arith.constant 0 : index
      %271 = vector.load %arg5[%c0_147, %c0_148] : memref<1x64xf32, #tpu.memory_space<vmem>>, vector<1x64xf32>
      %c0_149 = arith.constant 0 : index
      %c0_150 = arith.constant 0 : index
      %272 = vector.load %arg6[%c0_149, %c0_150] : memref<5x64xf32, #tpu.memory_space<vmem>>, vector<1x64xf32>
      %273 = arith.addf %271, %272 : vector<1x64xf32>
      %c1_151 = arith.constant 1 : index
      %c0_152 = arith.constant 0 : index
      %c0_153 = arith.constant 0 : index
      %274 = vector.load %arg26[%c1_151, %c0_152, %c0_153] : memref<2x5x64xf32, #tpu.memory_space<vmem>>, vector<1x1x64xf32>
      %275 = vector.shape_cast %274 : vector<1x1x64xf32> to vector<1x64xf32>
      %276 = vector.shape_cast %273 : vector<1x64xf32> to vector<1x1x64xf32>
      tpu.vector_store %arg26[%c1_151, %c0_152, %c0_153], %276 {strides = array<i32>} : memref<2x5x64xf32, #tpu.memory_space<vmem>>, vector<1x1x64xf32>,
    } else {
    }
    %c0 = arith.constant 0 : index
    %c0_1 = arith.constant 0 : index
    %c0_2 = arith.constant 0 : index
    %3 = vector.load %arg7[%c0, %c0_1, %c0_2] : memref<1x1x64xf32, #tpu.memory_space<vmem>>, vector<1x1x64xf32>
    %4 = vector.shape_cast %3 : vector<1x1x64xf32> to vector<1x64xf32>
    %c0_3 = arith.constant 0 : index
    %c0_4 = arith.constant 0 : index
    %c0_5 = arith.constant 0 : index
    %5 = vector.load %arg8[%c0_3, %c0_4, %c0_5] : memref<1x1x64xf32, #tpu.memory_space<vmem>>, vector<1x1x64xf32>
    %6 = vector.shape_cast %5 : vector<1x1x64xf32> to vector<1x64xf32>
    %c0_6 = arith.constant 0 : index
    %c0_7 = arith.constant 0 : index
    %c0_8 = arith.constant 0 : index
    %7 = vector.load %arg17[%c0_6, %c0_7, %c0_8] : memref<1x1x64xf32, #tpu.memory_space<vmem>>, vector<1x1x64xf32>
    %8 = vector.shape_cast %7 : vector<1x1x64xf32> to vector<1x64xf32>
    %c0_9 = arith.constant 0 : index
    %c0_10 = arith.constant 0 : index
    %c0_11 = arith.constant 0 : index
    %9 = vector.load %arg18[%c0_9, %c0_10, %c0_11] : memref<1x1x64xf32, #tpu.memory_space<vmem>>, vector<1x1x64xf32>
    %10 = vector.shape_cast %9 : vector<1x1x64xf32> to vector<1x64xf32>
    %c0_12 = arith.constant 0 : index
    %c0_13 = arith.constant 0 : index
    %c0_14 = arith.constant 0 : index
    %c0_15 = arith.constant 0 : index
    %11 = vector.load %arg9[%c0_12, %c0_13, %c0_14, %c0_15] : memref<1x4x64x16xbf16, #tpu.memory_space<vmem>>, vector<1x4x64x16xbf16>
    %12 = vector.shape_cast %11 : vector<1x4x64x16xbf16> to vector<4x64x16xbf16>
    %c0_16 = arith.constant 0 : index
    %c0_17 = arith.constant 0 : index
    %c0_18 = arith.constant 0 : index
    %c0_19 = arith.constant 0 : index
    %13 = vector.load %arg11[%c0_16, %c0_17, %c0_18, %c0_19] : memref<1x4x64x16xbf16, #tpu.memory_space<vmem>>, vector<1x4x64x16xbf16>
    %14 = vector.shape_cast %13 : vector<1x4x64x16xbf16> to vector<4x64x16xbf16>
    %c0_20 = arith.constant 0 : index
    %c0_21 = arith.constant 0 : index
    %c0_22 = arith.constant 0 : index
    %c0_23 = arith.constant 0 : index
    %15 = vector.load %arg13[%c0_20, %c0_21, %c0_22, %c0_23] : memref<1x4x64x16xbf16, #tpu.memory_space<vmem>>, vector<1x4x64x16xbf16>
    %16 = vector.shape_cast %15 : vector<1x4x64x16xbf16> to vector<4x64x16xbf16>
    %c0_24 = arith.constant 0 : index
    %c0_25 = arith.constant 0 : index
    %c0_26 = arith.constant 0 : index
    %c0_27 = arith.constant 0 : index
    %17 = vector.load %arg10[%c0_24, %c0_25, %c0_26, %c0_27] : memref<1x4x1x16xf32, #tpu.memory_space<vmem>>, vector<1x4x1x16xf32>
    %18 = vector.shape_cast %17 : vector<1x4x1x16xf32> to vector<4x1x16xf32>
    %c0_28 = arith.constant 0 : index
    %c0_29 = arith.constant 0 : index
    %c0_30 = arith.constant 0 : index
    %c0_31 = arith.constant 0 : index
    %19 = vector.load %arg12[%c0_28, %c0_29, %c0_30, %c0_31] : memref<1x4x1x16xf32, #tpu.memory_space<vmem>>, vector<1x4x1x16xf32>
    %20 = vector.shape_cast %19 : vector<1x4x1x16xf32> to vector<4x1x16xf32>
    %c0_32 = arith.constant 0 : index
    %c0_33 = arith.constant 0 : index
    %c0_34 = arith.constant 0 : index
    %c0_35 = arith.constant 0 : index
    %21 = vector.load %arg14[%c0_32, %c0_33, %c0_34, %c0_35] : memref<1x4x1x16xf32, #tpu.memory_space<vmem>>, vector<1x4x1x16xf32>
    %22 = vector.shape_cast %21 : vector<1x4x1x16xf32> to vector<4x1x16xf32>
    %c0_36 = arith.constant 0 : index
    %c0_37 = arith.constant 0 : index
    %c0_38 = arith.constant 0 : index
    %c0_39 = arith.constant 0 : index
    %23 = vector.load %arg15[%c0_36, %c0_37, %c0_38, %c0_39] : memref<1x4x16x64xbf16, #tpu.memory_space<vmem>>, vector<1x4x16x64xbf16>
    %24 = vector.shape_cast %23 : vector<1x4x16x64xbf16> to vector<4x16x64xbf16>
    %c0_40 = arith.constant 0 : index
    %c0_41 = arith.constant 0 : index
    %c0_42 = arith.constant 0 : index
    %25 = vector.load %arg16[%c0_40, %c0_41, %c0_42] : memref<1x1x64xf32, #tpu.memory_space<vmem>>, vector<1x1x64xf32>
    %26 = vector.shape_cast %25 : vector<1x1x64xf32> to vector<1x64xf32>
    %c0_43 = arith.constant 0 : index
    %c0_44 = arith.constant 0 : index
    %c0_45 = arith.constant 0 : index
    %27 = vector.load %arg19[%c0_43, %c0_44, %c0_45] : memref<1x64x256xbf16, #tpu.memory_space<vmem>>, vector<1x64x256xbf16>
    %28 = vector.shape_cast %27 : vector<1x64x256xbf16> to vector<64x256xbf16>
    %c0_46 = arith.constant 0 : index
    %c0_47 = arith.constant 0 : index
    %c0_48 = arith.constant 0 : index
    %29 = vector.load %arg20[%c0_46, %c0_47, %c0_48] : memref<1x1x256xf32, #tpu.memory_space<vmem>>, vector<1x1x256xf32>
    %30 = vector.shape_cast %29 : vector<1x1x256xf32> to vector<1x256xf32>
    %c0_49 = arith.constant 0 : index
    %c0_50 = arith.constant 0 : index
    %c0_51 = arith.constant 0 : index
    %31 = vector.load %arg21[%c0_49, %c0_50, %c0_51] : memref<1x256x64xbf16, #tpu.memory_space<vmem>>, vector<1x256x64xbf16>
    %32 = vector.shape_cast %31 : vector<1x256x64xbf16> to vector<256x64xbf16>
    %c0_52 = arith.constant 0 : index
    %c0_53 = arith.constant 0 : index
    %c0_54 = arith.constant 0 : index
    %33 = vector.load %arg22[%c0_52, %c0_53, %c0_54] : memref<1x1x64xf32, #tpu.memory_space<vmem>>, vector<1x1x64xf32>
    %34 = vector.shape_cast %33 : vector<1x1x64xf32> to vector<1x64xf32>
    %c0_55 = arith.constant 0 : index
    %c0_56 = arith.constant 0 : index
    %c0_57 = arith.constant 0 : index
    %35 = vector.load %arg26[%c0_55, %c0_56, %c0_57] : memref<2x5x64xf32, #tpu.memory_space<vmem>>, vector<1x5x64xf32>
    %36 = vector.shape_cast %35 : vector<1x5x64xf32> to vector<5x64xf32>
    %cst = arith.constant dense<0.000000e+00> : vector<5xf32>
    %37 = vector.multi_reduction <add>, %36, %cst [1] : vector<5x64xf32> to vector<5xf32>
    %38 = vector.shape_cast %37 : vector<5xf32> to vector<5x1xf32>
    %cst_58 = arith.constant 6.400000e+01 : f32
    %39 = vector.broadcast %cst_58 : f32 to vector<5x1xf32>
    %40 = arith.divf %38, %39 : vector<5x1xf32>
    %41 = vector.broadcast %40 : vector<5x1xf32> to vector<5x64xf32>
    %42 = arith.subf %36, %41 : vector<5x64xf32>
    %43 = arith.mulf %42, %42 : vector<5x64xf32>
    %cst_59 = arith.constant dense<0.000000e+00> : vector<5xf32>
    %44 = vector.multi_reduction <add>, %43, %cst_59 [1] : vector<5x64xf32> to vector<5xf32>
    %45 = vector.shape_cast %44 : vector<5xf32> to vector<5x1xf32>
    %cst_60 = arith.constant 6.400000e+01 : f32
    %46 = vector.broadcast %cst_60 : f32 to vector<5x1xf32>
    %47 = arith.divf %45, %46 : vector<5x1xf32>
    %48 = vector.broadcast %40 : vector<5x1xf32> to vector<5x64xf32>
    %49 = arith.subf %36, %48 : vector<5x64xf32>
    %cst_61 = arith.constant 9.99999997E-7 : f32
    %50 = vector.broadcast %cst_61 : f32 to vector<5x1xf32>
    %51 = arith.addf %47, %50 : vector<5x1xf32>
    %52 = math.rsqrt %51 : vector<5x1xf32>
    %53 = vector.broadcast %52 : vector<5x1xf32> to vector<5x64xf32>
    %54 = arith.mulf %49, %53 : vector<5x64xf32>
    %55 = vector.broadcast %4 : vector<1x64xf32> to vector<5x64xf32>
    %56 = arith.mulf %54, %55 : vector<5x64xf32>
    %57 = vector.broadcast %6 : vector<1x64xf32> to vector<5x64xf32>
    %58 = arith.addf %56, %57 : vector<5x64xf32>
    %59 = arith.truncf %58 : vector<5x64xf32> to vector<5x64xbf16>
    %60 = vector.shape_cast %59 : vector<5x64xbf16> to vector<1x5x64xbf16>
    %61 = vector.broadcast %60 : vector<1x5x64xbf16> to vector<4x5x64xbf16>
    %cst_62 = arith.constant dense<0.000000e+00> : vector<4x5x16xf32>
    %62 = tpu.matmul %61, %12, %cst_62 {dimension_numbers = #tpu.dot_dimension_numbers<[2], [1], [1], [2], [0, 0, 0, 1, 1, 2], [0], [0]>} : vector<4x5x64xbf16>, vector<4x64x16xbf16>, vector<4x5x16xf32> -> vector<4x5x16xf32>
    %63 = vector.broadcast %18 : vector<4x1x16xf32> to vector<4x5x16xf32>
    %64 = arith.addf %62, %63 : vector<4x5x16xf32>
    %cst_63 = arith.constant dense<0.000000e+00> : vector<4x5x16xf32>
    %65 = tpu.matmul %61, %14, %cst_63 {dimension_numbers = #tpu.dot_dimension_numbers<[2], [1], [1], [2], [0, 0, 0, 1, 1, 2], [0], [0]>} : vector<4x5x64xbf16>, vector<4x64x16xbf16>, vector<4x5x16xf32> -> vector<4x5x16xf32>
    %66 = vector.broadcast %20 : vector<4x1x16xf32> to vector<4x5x16xf32>
    %67 = arith.addf %65, %66 : vector<4x5x16xf32>
    %cst_64 = arith.constant dense<0.000000e+00> : vector<4x5x16xf32>
    %68 = tpu.matmul %61, %16, %cst_64 {dimension_numbers = #tpu.dot_dimension_numbers<[2], [1], [1], [2], [0, 0, 0, 1, 1, 2], [0], [0]>} : vector<4x5x64xbf16>, vector<4x64x16xbf16>, vector<4x5x16xf32> -> vector<4x5x16xf32>
    %69 = vector.broadcast %22 : vector<4x1x16xf32> to vector<4x5x16xf32>
    %70 = arith.addf %68, %69 : vector<4x5x16xf32>
    %71 = arith.truncf %64 : vector<4x5x16xf32> to vector<4x5x16xbf16>
    %72 = arith.truncf %67 : vector<4x5x16xf32> to vector<4x5x16xbf16>
    %cst_65 = arith.constant dense<0.000000e+00> : vector<4x5x5xf32>
    %73 = tpu.matmul %71, %72, %cst_65 {dimension_numbers = #tpu.dot_dimension_numbers<[2], [2], [1], [1], [0, 0, 0, 1, 1, 1], [0], [0]>} : vector<4x5x16xbf16>, vector<4x5x16xbf16>, vector<4x5x5xf32> -> vector<4x5x5xf32>
    %cst_66 = arith.constant 2.500000e-01 : f32
    %74 = vector.broadcast %cst_66 : f32 to vector<4x5x5xf32>
    %75 = arith.mulf %73, %74 : vector<4x5x5xf32>
    %cst_67 = arith.constant dense<0xFF800000> : vector<4x5xf32>
    %76 = vector.multi_reduction <maximumf>, %75, %cst_67 [2] : vector<4x5x5xf32> to vector<4x5xf32>
    %77 = vector.shape_cast %76 : vector<4x5xf32> to vector<4x5x1xf32>
    %78 = vector.broadcast %77 : vector<4x5x1xf32> to vector<4x5x5xf32>
    %79 = arith.subf %75, %78 : vector<4x5x5xf32>
    %80 = math.exp %79 : vector<4x5x5xf32>
    %cst_68 = arith.constant dense<0.000000e+00> : vector<4x5xf32>
    %81 = vector.multi_reduction <add>, %80, %cst_68 [2] : vector<4x5x5xf32> to vector<4x5xf32>
    %82 = vector.shape_cast %81 : vector<4x5xf32> to vector<4x5x1xf32>
    %83 = tpu.reciprocal %82 : vector<4x5x1xf32> -> vector<4x5x1xf32>
    %84 = vector.broadcast %83 : vector<4x5x1xf32> to vector<4x5x5xf32>
    %85 = arith.mulf %80, %84 : vector<4x5x5xf32>
    %86 = arith.truncf %85 : vector<4x5x5xf32> to vector<4x5x5xbf16>
    %87 = arith.truncf %70 : vector<4x5x16xf32> to vector<4x5x16xbf16>
    %cst_69 = arith.constant dense<0.000000e+00> : vector<4x5x16xf32>
    %88 = tpu.matmul %86, %87, %cst_69 {dimension_numbers = #tpu.dot_dimension_numbers<[2], [1], [1], [2], [0, 0, 0, 1, 1, 2], [0], [0]>} : vector<4x5x5xbf16>, vector<4x5x16xbf16>, vector<4x5x16xf32> -> vector<4x5x16xf32>
    %89 = arith.truncf %88 : vector<4x5x16xf32> to vector<4x5x16xbf16>
    %cst_70 = arith.constant dense<0.000000e+00> : vector<4x5x64xf32>
    %90 = tpu.matmul %89, %24, %cst_70 {dimension_numbers = #tpu.dot_dimension_numbers<[2], [1], [1], [2], [0, 0, 0, 1, 1, 2], [0], [0]>} : vector<4x5x16xbf16>, vector<4x16x64xbf16>, vector<4x5x64xf32> -> vector<4x5x64xf32>
    %cst_71 = arith.constant dense<0.000000e+00> : vector<5x64xf32>
    %91 = vector.multi_reduction <add>, %90, %cst_71 [0] : vector<4x5x64xf32> to vector<5x64xf32>
    %92 = vector.broadcast %26 : vector<1x64xf32> to vector<5x64xf32>
    %93 = arith.addf %91, %92 : vector<5x64xf32>
    %94 = arith.addf %36, %93 : vector<5x64xf32>
    %cst_72 = arith.constant dense<0.000000e+00> : vector<5xf32>
    %95 = vector.multi_reduction <add>, %94, %cst_72 [1] : vector<5x64xf32> to vector<5xf32>
    %96 = vector.shape_cast %95 : vector<5xf32> to vector<5x1xf32>
    %cst_73 = arith.constant 6.400000e+01 : f32
    %97 = vector.broadcast %cst_73 : f32 to vector<5x1xf32>
    %98 = arith.divf %96, %97 : vector<5x1xf32>
    %99 = vector.broadcast %98 : vector<5x1xf32> to vector<5x64xf32>
    %100 = arith.subf %94, %99 : vector<5x64xf32>
    %101 = arith.mulf %100, %100 : vector<5x64xf32>
    %cst_74 = arith.constant dense<0.000000e+00> : vector<5xf32>
    %102 = vector.multi_reduction <add>, %101, %cst_74 [1] : vector<5x64xf32> to vector<5xf32>
    %103 = vector.shape_cast %102 : vector<5xf32> to vector<5x1xf32>
    %cst_75 = arith.constant 6.400000e+01 : f32
    %104 = vector.broadcast %cst_75 : f32 to vector<5x1xf32>
    %105 = arith.divf %103, %104 : vector<5x1xf32>
    %106 = vector.broadcast %98 : vector<5x1xf32> to vector<5x64xf32>
    %107 = arith.subf %94, %106 : vector<5x64xf32>
    %cst_76 = arith.constant 9.99999997E-7 : f32
    %108 = vector.broadcast %cst_76 : f32 to vector<5x1xf32>
    %109 = arith.addf %105, %108 : vector<5x1xf32>
    %110 = math.rsqrt %109 : vector<5x1xf32>
    %111 = vector.broadcast %110 : vector<5x1xf32> to vector<5x64xf32>
    %112 = arith.mulf %107, %111 : vector<5x64xf32>
    %113 = vector.broadcast %8 : vector<1x64xf32> to vector<5x64xf32>
    %114 = arith.mulf %112, %113 : vector<5x64xf32>
    %115 = vector.broadcast %10 : vector<1x64xf32> to vector<5x64xf32>
    %116 = arith.addf %114, %115 : vector<5x64xf32>
    %117 = arith.truncf %116 : vector<5x64xf32> to vector<5x64xbf16>
    %cst_77 = arith.constant dense<0.000000e+00> : vector<5x256xf32>
    %118 = tpu.matmul %117, %28, %cst_77 {dimension_numbers = #tpu.dot_dimension_numbers<[1], [0], [0], [1], [0, 0, 1, 1], [], []>} : vector<5x64xbf16>, vector<64x256xbf16>, vector<5x256xf32> -> vector<5x256xf32>
    %119 = vector.broadcast %30 : vector<1x256xf32> to vector<5x256xf32>
    %120 = arith.addf %118, %119 : vector<5x256xf32>
    %cst_78 = arith.constant 5.000000e-01 : f32
    %121 = vector.broadcast %cst_78 : f32 to vector<5x256xf32>
    %122 = arith.mulf %121, %120 : vector<5x256xf32>
    %cst_79 = arith.constant 1.41421354 : f32
    %123 = vector.broadcast %cst_79 : f32 to vector<5x256xf32>
    %124 = arith.divf %120, %123 : vector<5x256xf32>
    %125 = math.erf %124 : vector<5x256xf32>
    %cst_80 = arith.constant 1.000000e+00 : f32
    %126 = vector.broadcast %cst_80 : f32 to vector<5x256xf32>
    %127 = arith.addf %126, %125 : vector<5x256xf32>
    %128 = arith.mulf %122, %127 : vector<5x256xf32>
    %129 = arith.truncf %128 : vector<5x256xf32> to vector<5x256xbf16>
    %cst_81 = arith.constant dense<0.000000e+00> : vector<5x64xf32>
    %130 = tpu.matmul %129, %32, %cst_81 {dimension_numbers = #tpu.dot_dimension_numbers<[1], [0], [0], [1], [0, 0, 1, 1], [], []>} : vector<5x256xbf16>, vector<256x64xbf16>, vector<5x64xf32> -> vector<5x64xf32>
    %131 = vector.broadcast %34 : vector<1x64xf32> to vector<5x64xf32>
    %132 = arith.addf %130, %131 : vector<5x64xf32>
    %133 = arith.addf %94, %132 : vector<5x64xf32>
    %c0_82 = arith.constant 0 : index
    %c0_83 = arith.constant 0 : index
    %c0_84 = arith.constant 0 : index
    %134 = vector.load %arg26[%c0_82, %c0_83, %c0_84] : memref<2x5x64xf32, #tpu.memory_space<vmem>>, vector<1x5x64xf32>
    %135 = vector.shape_cast %134 : vector<1x5x64xf32> to vector<5x64xf32>
    %136 = vector.shape_cast %133 : vector<5x64xf32> to vector<1x5x64xf32>
    tpu.vector_store %arg26[%c0_82, %c0_83, %c0_84], %136 {strides = array<i32>} : memref<2x5x64xf32, #tpu.memory_space<vmem>>, vector<1x5x64xf32>,
    %c1 = arith.constant 1 : index
    %c0_85 = arith.constant 0 : index
    %c0_86 = arith.constant 0 : index
    %137 = vector.load %arg26[%c1, %c0_85, %c0_86] : memref<2x5x64xf32, #tpu.memory_space<vmem>>, vector<1x5x64xf32>
    %138 = vector.shape_cast %137 : vector<1x5x64xf32> to vector<5x64xf32>
    %cst_87 = arith.constant dense<0.000000e+00> : vector<5xf32>
    %139 = vector.multi_reduction <add>, %138, %cst_87 [1] : vector<5x64xf32> to vector<5xf32>
    %140 = vector.shape_cast %139 : vector<5xf32> to vector<5x1xf32>
    %cst_88 = arith.constant 6.400000e+01 : f32
    %141 = vector.broadcast %cst_88 : f32 to vector<5x1xf32>
    %142 = arith.divf %140, %141 : vector<5x1xf32>
    %143 = vector.broadcast %142 : vector<5x1xf32> to vector<5x64xf32>
    %144 = arith.subf %138, %143 : vector<5x64xf32>
    %145 = arith.mulf %144, %144 : vector<5x64xf32>
    %cst_89 = arith.constant dense<0.000000e+00> : vector<5xf32>
    %146 = vector.multi_reduction <add>, %145, %cst_89 [1] : vector<5x64xf32> to vector<5xf32>
    %147 = vector.shape_cast %146 : vector<5xf32> to vector<5x1xf32>
    %cst_90 = arith.constant 6.400000e+01 : f32
    %148 = vector.broadcast %cst_90 : f32 to vector<5x1xf32>
    %149 = arith.divf %147, %148 : vector<5x1xf32>
    %150 = vector.broadcast %142 : vector<5x1xf32> to vector<5x64xf32>
    %151 = arith.subf %138, %150 : vector<5x64xf32>
    %cst_91 = arith.constant 9.99999997E-7 : f32
    %152 = vector.broadcast %cst_91 : f32 to vector<5x1xf32>
    %153 = arith.addf %149, %152 : vector<5x1xf32>
    %154 = math.rsqrt %153 : vector<5x1xf32>
    %155 = vector.broadcast %154 : vector<5x1xf32> to vector<5x64xf32>
    %156 = arith.mulf %151, %155 : vector<5x64xf32>
    %157 = vector.broadcast %4 : vector<1x64xf32> to vector<5x64xf32>
    %158 = arith.mulf %156, %157 : vector<5x64xf32>
    %159 = vector.broadcast %6 : vector<1x64xf32> to vector<5x64xf32>
    %160 = arith.addf %158, %159 : vector<5x64xf32>
    %161 = arith.truncf %160 : vector<5x64xf32> to vector<5x64xbf16>
    %162 = vector.shape_cast %161 : vector<5x64xbf16> to vector<1x5x64xbf16>
    %163 = vector.broadcast %162 : vector<1x5x64xbf16> to vector<4x5x64xbf16>
    %cst_92 = arith.constant dense<0.000000e+00> : vector<4x5x16xf32>
    %164 = tpu.matmul %163, %12, %cst_92 {dimension_numbers = #tpu.dot_dimension_numbers<[2], [1], [1], [2], [0, 0, 0, 1, 1, 2], [0], [0]>} : vector<4x5x64xbf16>, vector<4x64x16xbf16>, vector<4x5x16xf32> -> vector<4x5x16xf32>
    %165 = vector.broadcast %18 : vector<4x1x16xf32> to vector<4x5x16xf32>
    %166 = arith.addf %164, %165 : vector<4x5x16xf32>
    %cst_93 = arith.constant dense<0.000000e+00> : vector<4x5x16xf32>
    %167 = tpu.matmul %163, %14, %cst_93 {dimension_numbers = #tpu.dot_dimension_numbers<[2], [1], [1], [2], [0, 0, 0, 1, 1, 2], [0], [0]>} : vector<4x5x64xbf16>, vector<4x64x16xbf16>, vector<4x5x16xf32> -> vector<4x5x16xf32>
    %168 = vector.broadcast %20 : vector<4x1x16xf32> to vector<4x5x16xf32>
    %169 = arith.addf %167, %168 : vector<4x5x16xf32>
    %cst_94 = arith.constant dense<0.000000e+00> : vector<4x5x16xf32>
    %170 = tpu.matmul %163, %16, %cst_94 {dimension_numbers = #tpu.dot_dimension_numbers<[2], [1], [1], [2], [0, 0, 0, 1, 1, 2], [0], [0]>} : vector<4x5x64xbf16>, vector<4x64x16xbf16>, vector<4x5x16xf32> -> vector<4x5x16xf32>
    %171 = vector.broadcast %22 : vector<4x1x16xf32> to vector<4x5x16xf32>
    %172 = arith.addf %170, %171 : vector<4x5x16xf32>
    %173 = arith.truncf %166 : vector<4x5x16xf32> to vector<4x5x16xbf16>
    %174 = arith.truncf %169 : vector<4x5x16xf32> to vector<4x5x16xbf16>
    %cst_95 = arith.constant dense<0.000000e+00> : vector<4x5x5xf32>
    %175 = tpu.matmul %173, %174, %cst_95 {dimension_numbers = #tpu.dot_dimension_numbers<[2], [2], [1], [1], [0, 0, 0, 1, 1, 1], [0], [0]>} : vector<4x5x16xbf16>, vector<4x5x16xbf16>, vector<4x5x5xf32> -> vector<4x5x5xf32>
    %cst_96 = arith.constant 2.500000e-01 : f32
    %176 = vector.broadcast %cst_96 : f32 to vector<4x5x5xf32>
    %177 = arith.mulf %175, %176 : vector<4x5x5xf32>
    %cst_97 = arith.constant dense<0xFF800000> : vector<4x5xf32>
    %178 = vector.multi_reduction <maximumf>, %177, %cst_97 [2] : vector<4x5x5xf32> to vector<4x5xf32>
    %179 = vector.shape_cast %178 : vector<4x5xf32> to vector<4x5x1xf32>
    %180 = vector.broadcast %179 : vector<4x5x1xf32> to vector<4x5x5xf32>
    %181 = arith.subf %177, %180 : vector<4x5x5xf32>
    %182 = math.exp %181 : vector<4x5x5xf32>
    %cst_98 = arith.constant dense<0.000000e+00> : vector<4x5xf32>
    %183 = vector.multi_reduction <add>, %182, %cst_98 [2] : vector<4x5x5xf32> to vector<4x5xf32>
    %184 = vector.shape_cast %183 : vector<4x5xf32> to vector<4x5x1xf32>
    %185 = tpu.reciprocal %184 : vector<4x5x1xf32> -> vector<4x5x1xf32>
    %186 = vector.broadcast %185 : vector<4x5x1xf32> to vector<4x5x5xf32>
    %187 = arith.mulf %182, %186 : vector<4x5x5xf32>
    %188 = arith.truncf %187 : vector<4x5x5xf32> to vector<4x5x5xbf16>
    %189 = arith.truncf %172 : vector<4x5x16xf32> to vector<4x5x16xbf16>
    %cst_99 = arith.constant dense<0.000000e+00> : vector<4x5x16xf32>
    %190 = tpu.matmul %188, %189, %cst_99 {dimension_numbers = #tpu.dot_dimension_numbers<[2], [1], [1], [2], [0, 0, 0, 1, 1, 2], [0], [0]>} : vector<4x5x5xbf16>, vector<4x5x16xbf16>, vector<4x5x16xf32> -> vector<4x5x16xf32>
    %191 = arith.truncf %190 : vector<4x5x16xf32> to vector<4x5x16xbf16>
    %cst_100 = arith.constant dense<0.000000e+00> : vector<4x5x64xf32>
    %192 = tpu.matmul %191, %24, %cst_100 {dimension_numbers = #tpu.dot_dimension_numbers<[2], [1], [1], [2], [0, 0, 0, 1, 1, 2], [0], [0]>} : vector<4x5x16xbf16>, vector<4x16x64xbf16>, vector<4x5x64xf32> -> vector<4x5x64xf32>
    %cst_101 = arith.constant dense<0.000000e+00> : vector<5x64xf32>
    %193 = vector.multi_reduction <add>, %192, %cst_101 [0] : vector<4x5x64xf32> to vector<5x64xf32>
    %194 = vector.broadcast %26 : vector<1x64xf32> to vector<5x64xf32>
    %195 = arith.addf %193, %194 : vector<5x64xf32>
    %196 = arith.addf %138, %195 : vector<5x64xf32>
    %cst_102 = arith.constant dense<0.000000e+00> : vector<5xf32>
    %197 = vector.multi_reduction <add>, %196, %cst_102 [1] : vector<5x64xf32> to vector<5xf32>
    %198 = vector.shape_cast %197 : vector<5xf32> to vector<5x1xf32>
    %cst_103 = arith.constant 6.400000e+01 : f32
    %199 = vector.broadcast %cst_103 : f32 to vector<5x1xf32>
    %200 = arith.divf %198, %199 : vector<5x1xf32>
    %201 = vector.broadcast %200 : vector<5x1xf32> to vector<5x64xf32>
    %202 = arith.subf %196, %201 : vector<5x64xf32>
    %203 = arith.mulf %202, %202 : vector<5x64xf32>
    %cst_104 = arith.constant dense<0.000000e+00> : vector<5xf32>
    %204 = vector.multi_reduction <add>, %203, %cst_104 [1] : vector<5x64xf32> to vector<5xf32>
    %205 = vector.shape_cast %204 : vector<5xf32> to vector<5x1xf32>
    %cst_105 = arith.constant 6.400000e+01 : f32
    %206 = vector.broadcast %cst_105 : f32 to vector<5x1xf32>
    %207 = arith.divf %205, %206 : vector<5x1xf32>
    %208 = vector.broadcast %200 : vector<5x1xf32> to vector<5x64xf32>
    %209 = arith.subf %196, %208 : vector<5x64xf32>
    %cst_106 = arith.constant 9.99999997E-7 : f32
    %210 = vector.broadcast %cst_106 : f32 to vector<5x1xf32>
    %211 = arith.addf %207, %210 : vector<5x1xf32>
    %212 = math.rsqrt %211 : vector<5x1xf32>
    %213 = vector.broadcast %212 : vector<5x1xf32> to vector<5x64xf32>
    %214 = arith.mulf %209, %213 : vector<5x64xf32>
    %215 = vector.broadcast %8 : vector<1x64xf32> to vector<5x64xf32>
    %216 = arith.mulf %214, %215 : vector<5x64xf32>
    %217 = vector.broadcast %10 : vector<1x64xf32> to vector<5x64xf32>
    %218 = arith.addf %216, %217 : vector<5x64xf32>
    %219 = arith.truncf %218 : vector<5x64xf32> to vector<5x64xbf16>
    %cst_107 = arith.constant dense<0.000000e+00> : vector<5x256xf32>
    %220 = tpu.matmul %219, %28, %cst_107 {dimension_numbers = #tpu.dot_dimension_numbers<[1], [0], [0], [1], [0, 0, 1, 1], [], []>} : vector<5x64xbf16>, vector<64x256xbf16>, vector<5x256xf32> -> vector<5x256xf32>
    %221 = vector.broadcast %30 : vector<1x256xf32> to vector<5x256xf32>
    %222 = arith.addf %220, %221 : vector<5x256xf32>
    %cst_108 = arith.constant 5.000000e-01 : f32
    %223 = vector.broadcast %cst_108 : f32 to vector<5x256xf32>
    %224 = arith.mulf %223, %222 : vector<5x256xf32>
    %cst_109 = arith.constant 1.41421354 : f32
    %225 = vector.broadcast %cst_109 : f32 to vector<5x256xf32>
    %226 = arith.divf %222, %225 : vector<5x256xf32>
    %227 = math.erf %226 : vector<5x256xf32>
    %cst_110 = arith.constant 1.000000e+00 : f32
    %228 = vector.broadcast %cst_110 : f32 to vector<5x256xf32>
    %229 = arith.addf %228, %227 : vector<5x256xf32>
    %230 = arith.mulf %224, %229 : vector<5x256xf32>
    %231 = arith.truncf %230 : vector<5x256xf32> to vector<5x256xbf16>
    %cst_111 = arith.constant dense<0.000000e+00> : vector<5x64xf32>
    %232 = tpu.matmul %231, %32, %cst_111 {dimension_numbers = #tpu.dot_dimension_numbers<[1], [0], [0], [1], [0, 0, 1, 1], [], []>} : vector<5x256xbf16>, vector<256x64xbf16>, vector<5x64xf32> -> vector<5x64xf32>
    %233 = vector.broadcast %34 : vector<1x64xf32> to vector<5x64xf32>
    %234 = arith.addf %232, %233 : vector<5x64xf32>
    %235 = arith.addf %196, %234 : vector<5x64xf32>
    %c1_112 = arith.constant 1 : index
    %c0_113 = arith.constant 0 : index
    %c0_114 = arith.constant 0 : index
    %236 = vector.load %arg26[%c1_112, %c0_113, %c0_114] : memref<2x5x64xf32, #tpu.memory_space<vmem>>, vector<1x5x64xf32>
    %237 = vector.shape_cast %236 : vector<1x5x64xf32> to vector<5x64xf32>
    %238 = vector.shape_cast %235 : vector<5x64xf32> to vector<1x5x64xf32>
    tpu.vector_store %arg26[%c1_112, %c0_113, %c0_114], %238 {strides = array<i32>} : memref<2x5x64xf32, #tpu.memory_space<vmem>>, vector<1x5x64xf32>,
    %c1_i32 = arith.constant 1 : i32
    %239 = arith.cmpi eq, %arg1, %c1_i32 : i32
    %240 = arith.extui %239 : i1 to i32
    %c0_i32_115 = arith.constant 0 : i32
    %241 = arith.cmpi ne, %240, %c0_i32_115 : i32
    scf.if %241 {
      %c0_116 = arith.constant 0 : index
      %c0_117 = arith.constant 0 : index
      %c0_118 = arith.constant 0 : index
      %242 = vector.load %arg26[%c0_116, %c0_117, %c0_118] : memref<2x5x64xf32, #tpu.memory_space<vmem>>, vector<1x1x64xf32>
      %243 = vector.shape_cast %242 : vector<1x1x64xf32> to vector<1x64xf32>
      %c1_119 = arith.constant 1 : index
      %c0_120 = arith.constant 0 : index
      %c0_121 = arith.constant 0 : index
      %244 = vector.load %arg26[%c1_119, %c0_120, %c0_121] : memref<2x5x64xf32, #tpu.memory_space<vmem>>, vector<1x1x64xf32>
      %245 = vector.shape_cast %244 : vector<1x1x64xf32> to vector<1x64xf32>
      %246 = tpu.concatenate %243, %245 in 0 : vector<1x64xf32>, vector<1x64xf32> -> vector<2x64xf32>
      %c0_122 = arith.constant 0 : index
      %c0_123 = arith.constant 0 : index
      %247 = vector.load %arg23[%c0_122, %c0_123] : memref<1x64xf32, #tpu.memory_space<vmem>>, vector<1x64xf32>
      %c0_124 = arith.constant 0 : index
      %c0_125 = arith.constant 0 : index
      %248 = vector.load %arg24[%c0_124, %c0_125] : memref<1x64xf32, #tpu.memory_space<vmem>>, vector<1x64xf32>
      %cst_126 = arith.constant dense<0.000000e+00> : vector<2xf32>
      %249 = vector.multi_reduction <add>, %246, %cst_126 [1] : vector<2x64xf32> to vector<2xf32>
      %250 = vector.shape_cast %249 : vector<2xf32> to vector<2x1xf32>
      %cst_127 = arith.constant 6.400000e+01 : f32
      %251 = vector.broadcast %cst_127 : f32 to vector<2x1xf32>
      %252 = arith.divf %250, %251 : vector<2x1xf32>
      %253 = vector.broadcast %252 : vector<2x1xf32> to vector<2x64xf32>
      %254 = arith.subf %246, %253 : vector<2x64xf32>
      %255 = arith.mulf %254, %254 : vector<2x64xf32>
      %cst_128 = arith.constant dense<0.000000e+00> : vector<2xf32>
      %256 = vector.multi_reduction <add>, %255, %cst_128 [1] : vector<2x64xf32> to vector<2xf32>
      %257 = vector.shape_cast %256 : vector<2xf32> to vector<2x1xf32>
      %cst_129 = arith.constant 6.400000e+01 : f32
      %258 = vector.broadcast %cst_129 : f32 to vector<2x1xf32>
      %259 = arith.divf %257, %258 : vector<2x1xf32>
      %260 = vector.broadcast %252 : vector<2x1xf32> to vector<2x64xf32>
      %261 = arith.subf %246, %260 : vector<2x64xf32>
      %cst_130 = arith.constant 9.99999997E-7 : f32
      %262 = vector.broadcast %cst_130 : f32 to vector<2x1xf32>
      %263 = arith.addf %259, %262 : vector<2x1xf32>
      %264 = math.rsqrt %263 : vector<2x1xf32>
      %265 = vector.broadcast %264 : vector<2x1xf32> to vector<2x64xf32>
      %266 = arith.mulf %261, %265 : vector<2x64xf32>
      %267 = vector.broadcast %247 : vector<1x64xf32> to vector<2x64xf32>
      %268 = arith.mulf %266, %267 : vector<2x64xf32>
      %269 = vector.broadcast %248 : vector<1x64xf32> to vector<2x64xf32>
      %270 = arith.addf %268, %269 : vector<2x64xf32>
      %c0_131 = arith.constant 0 : index
      %c0_132 = arith.constant 0 : index
      %c0_133 = arith.constant 0 : index
      %271 = vector.load %arg25[%c0_131, %c0_132, %c0_133] : memref<1x2x64xf32, #tpu.memory_space<vmem>>, vector<1x2x64xf32>
      %272 = vector.shape_cast %271 : vector<1x2x64xf32> to vector<2x64xf32>
      %273 = vector.shape_cast %270 : vector<2x64xf32> to vector<1x2x64xf32>
      tpu.vector_store %arg25[%c0_131, %c0_132, %c0_133], %273 {strides = array<i32>} : memref<1x2x64xf32, #tpu.memory_space<vmem>>, vector<1x2x64xf32>,
    } else {
    }
    return
  }
  func.func @transform_0(%arg0: i32, %arg1: i32) -> (i32, i32, i32) {
    %c0_i32 = arith.constant 0 : i32
    %c0_i32_0 = arith.constant 0 : i32
    %c0_i32_1 = arith.constant 0 : i32
    return %arg0, %c0_i32, %c0_i32_0 : i32, i32, i32
  }
  func.func @transform_1(%arg0: i32, %arg1: i32) -> (i32, i32) {
    %c0_i32 = arith.constant 0 : i32
    %c0_i32_0 = arith.constant 0 : i32
    %c0_i32_1 = arith.constant 0 : i32
    return %c0_i32, %c0_i32_0 : i32, i32
  }
  func.func @transform_2(%arg0: i32, %arg1: i32) -> (i32, i32) {
    %c0_i32 = arith.constant 0 : i32
    %c0_i32_0 = arith.constant 0 : i32
    %c0_i32_1 = arith.constant 0 : i32
    return %c0_i32, %c0_i32_0 : i32, i32
  }
  func.func @transform_3(%arg0: i32, %arg1: i32) -> (i32, i32) {
    %c0_i32 = arith.constant 0 : i32
    %c0_i32_0 = arith.constant 0 : i32
    %c0_i32_1 = arith.constant 0 : i32
    return %c0_i32, %c0_i32_0 : i32, i32
  }
  func.func @transform_4(%arg0: i32, %arg1: i32) -> (i32, i32) {
    %c0_i32 = arith.constant 0 : i32
    %c0_i32_0 = arith.constant 0 : i32
    %c0_i32_1 = arith.constant 0 : i32
    return %c0_i32, %c0_i32_0 : i32, i32
  }
  func.func @transform_5(%arg0: i32, %arg1: i32) -> (i32, i32, i32) {
    %c0_i32 = arith.constant 0 : i32
    %c0_i32_0 = arith.constant 0 : i32
    %c0_i32_1 = arith.constant 0 : i32
    return %arg1, %c0_i32, %c0_i32_0 : i32, i32, i32
  }
  func.func @transform_6(%arg0: i32, %arg1: i32) -> (i32, i32, i32) {
    %c0_i32 = arith.constant 0 : i32
    %c0_i32_0 = arith.constant 0 : i32
    %c0_i32_1 = arith.constant 0 : i32
    return %arg1, %c0_i32, %c0_i32_0 : i32, i32, i32
  }
  func.func @transform_7(%arg0: i32, %arg1: i32) -> (i32, i32, i32, i32) {
    %c0_i32 = arith.constant 0 : i32
    %c0_i32_0 = arith.constant 0 : i32
    %c0_i32_1 = arith.constant 0 : i32
    %c0_i32_2 = arith.constant 0 : i32
    return %arg1, %c0_i32, %c0_i32_0, %c0_i32_1 : i32, i32, i32, i32
  }
  func.func @transform_8(%arg0: i32, %arg1: i32) -> (i32, i32, i32, i32) {
    %c0_i32 = arith.constant 0 : i32
    %c0_i32_0 = arith.constant 0 : i32
    %c0_i32_1 = arith.constant 0 : i32
    %c0_i32_2 = arith.constant 0 : i32
    return %arg1, %c0_i32, %c0_i32_0, %c0_i32_1 : i32, i32, i32, i32
  }
  func.func @transform_9(%arg0: i32, %arg1: i32) -> (i32, i32, i32, i32) {
    %c0_i32 = arith.constant 0 : i32
    %c0_i32_0 = arith.constant 0 : i32
    %c0_i32_1 = arith.constant 0 : i32
    %c0_i32_2 = arith.constant 0 : i32
    return %arg1, %c0_i32, %c0_i32_0, %c0_i32_1 : i32, i32, i32, i32
  }
  func.func @transform_10(%arg0: i32, %arg1: i32) -> (i32, i32, i32, i32) {
    %c0_i32 = arith.constant 0 : i32
    %c0_i32_0 = arith.constant 0 : i32
    %c0_i32_1 = arith.constant 0 : i32
    %c0_i32_2 = arith.constant 0 : i32
    return %arg1, %c0_i32, %c0_i32_0, %c0_i32_1 : i32, i32, i32, i32
  }
  func.func @transform_11(%arg0: i32, %arg1: i32) -> (i32, i32, i32, i32) {
    %c0_i32 = arith.constant 0 : i32
    %c0_i32_0 = arith.constant 0 : i32
    %c0_i32_1 = arith.constant 0 : i32
    %c0_i32_2 = arith.constant 0 : i32
    return %arg1, %c0_i32, %c0_i32_0, %c0_i32_1 : i32, i32, i32, i32
  }
  func.func @transform_12(%arg0: i32, %arg1: i32) -> (i32, i32, i32, i32) {
    %c0_i32 = arith.constant 0 : i32
    %c0_i32_0 = arith.constant 0 : i32
    %c0_i32_1 = arith.constant 0 : i32
    %c0_i32_2 = arith.constant 0 : i32
    return %arg1, %c0_i32, %c0_i32_0, %c0_i32_1 : i32, i32, i32, i32
  }
  func.func @transform_13(%arg0: i32, %arg1: i32) -> (i32, i32, i32, i32) {
    %c0_i32 = arith.constant 0 : i32
    %c0_i32_0 = arith.constant 0 : i32
    %c0_i32_1 = arith.constant 0 : i32
    %c0_i32_2 = arith.constant 0 : i32
    return %arg1, %c0_i32, %c0_i32_0, %c0_i32_1 : i32, i32, i32, i32
  }
  func.func @transform_14(%arg0: i32, %arg1: i32) -> (i32, i32, i32) {
    %c0_i32 = arith.constant 0 : i32
    %c0_i32_0 = arith.constant 0 : i32
    %c0_i32_1 = arith.constant 0 : i32
    return %arg1, %c0_i32, %c0_i32_0 : i32, i32, i32
  }
  func.func @transform_15(%arg0: i32, %arg1: i32) -> (i32, i32, i32) {
    %c0_i32 = arith.constant 0 : i32
    %c0_i32_0 = arith.constant 0 : i32
    %c0_i32_1 = arith.constant 0 : i32
    return %arg1, %c0_i32, %c0_i32_0 : i32, i32, i32
  }
  func.func @transform_16(%arg0: i32, %arg1: i32) -> (i32, i32, i32) {
    %c0_i32 = arith.constant 0 : i32
    %c0_i32_0 = arith.constant 0 : i32
    %c0_i32_1 = arith.constant 0 : i32
    return %arg1, %c0_i32, %c0_i32_0 : i32, i32, i32
  }
  func.func @transform_17(%arg0: i32, %arg1: i32) -> (i32, i32, i32) {
    %c0_i32 = arith.constant 0 : i32
    %c0_i32_0 = arith.constant 0 : i32
    %c0_i32_1 = arith.constant 0 : i32
    return %arg1, %c0_i32, %c0_i32_0 : i32, i32, i32
  }
  func.func @transform_18(%arg0: i32, %arg1: i32) -> (i32, i32, i32) {
    %c0_i32 = arith.constant 0 : i32
    %c0_i32_0 = arith.constant 0 : i32
    %c0_i32_1 = arith.constant 0 : i32
    return %arg1, %c0_i32, %c0_i32_0 : i32, i32, i32
  }
  func.func @transform_19(%arg0: i32, %arg1: i32) -> (i32, i32, i32) {
    %c0_i32 = arith.constant 0 : i32
    %c0_i32_0 = arith.constant 0 : i32
    %c0_i32_1 = arith.constant 0 : i32
    return %arg1, %c0_i32, %c0_i32_0 : i32, i32, i32
  }
  func.func @transform_20(%arg0: i32, %arg1: i32) -> (i32, i32, i32) {
    %c0_i32 = arith.constant 0 : i32
    %c0_i32_0 = arith.constant 0 : i32
    %c0_i32_1 = arith.constant 0 : i32
    return %arg1, %c0_i32, %c0_i32_0 : i32, i32, i32
  }
  func.func @transform_21(%arg0: i32, %arg1: i32) -> (i32, i32) {
    %c0_i32 = arith.constant 0 : i32
    %c0_i32_0 = arith.constant 0 : i32
    %c0_i32_1 = arith.constant 0 : i32
    return %c0_i32, %c0_i32_0 : i32, i32
  }
  func.func @transform_22(%arg0: i32, %arg1: i32) -> (i32, i32) {
    %c0_i32 = arith.constant 0 : i32
    %c0_i32_0 = arith.constant 0 : i32
    %c0_i32_1 = arith.constant 0 : i32
    return %c0_i32, %c0_i32_0 : i32, i32
  }
  func.func @transform_23(%arg0: i32, %arg1: i32) -> (i32, i32, i32) {
    %c0_i32 = arith.constant 0 : i32
    %c0_i32_0 = arith.constant 0 : i32
    %c0_i32_1 = arith.constant 0 : i32
    return %arg0, %c0_i32, %c0_i32_0 : i32, i32, i32
  }
}

</mosaic_0001>

<bundles_post_ra>
// kernel: feature_extractor.1
= control target key start
LH: loop header
LB: loop body
LE: loop exit
PB: predicated region body
PF: predicated region fallthrough
CT: control target
= control target key end

     0   :  { %s8080_s0 = inlined_call_operand.vmem [shape: bf16[4,4,768], index: 0, kind: input, shape index: {}]   ;;  %s8081_s1 = inlined_call_operand.vmem [shape: bf16[768,64], index: 1, kind: input, shape index: {}]   ;;  %s8082_s2 = inlined_call_operand.vmem [shape: f32[1,64], index: 2, kind: input, shape index: {}, may-alias: {2,22}]   ;;  %s8083_s3 = inlined_call_operand.vmem [shape: f32[1,64], index: 3, kind: input, shape index: {}]   ;;  %s8084_s4 = inlined_call_operand.vmem [shape: f32[5,64], index: 4, kind: input, shape index: {}]   ;;  %s8085_s5 = inlined_call_operand.vmem [shape: f32[2,1,64], index: 5, kind: input, shape index: {}, may-alias: {5,15}]   ;;  %s8086_s6 = inlined_call_operand.vmem [shape: f32[2,1,64], index: 6, kind: input, shape index: {}, may-alias: {6,14,16,20}]   ;;  %s8087_s7 = inlined_call_operand.vmem [shape: bf16[2,4,64,16], index: 7, kind: input, shape index: {}]   ;;  %s8088_s8 = inlined_call_operand.vmem [shape: f32[2,4,1,16], index: 8, kind: input, shape index: {}, may-alias: {8,10,12}]   ;;  %s8089_s9 = inlined_call_operand.vmem [shape: bf16[2,4,64,16], index: 9, kind: input, shape index: {}]   ;;  %s8090_s10 = inlined_call_operand.vmem [shape: f32[2,4,1,16], index: 10, kind: input, shape index: {}, may-alias: {8,10,12}]   ;;  %s8091_s11 = inlined_call_operand.vmem [shape: bf16[2,4,64,16], index: 11, kind: input, shape index: {}]   ;;  %s8092_s12 = inlined_call_operand.vmem [shape: f32[2,4,1,16], index: 12, kind: input, shape index: {}, may-alias: {8,10,12}]   ;;  %s8093_s13 = inlined_call_operand.vmem [shape: bf16[2,4,16,64], index: 13, kind: input, shape index: {}]   ;;  %s8094_s14 = inlined_call_operand.vmem [shape: f32[2,1,64], index: 14, kind: input, shape index: {}, may-alias: {6,14,16,20}]   ;;  %s8095_s15 = inlined_call_operand.vmem [shape: f32[2,1,64], index: 15, kind: input, shape index: {}, may-alias: {5,15}]   ;;  %s8096_s16 = inlined_call_operand.vmem [shape: f32[2,1,64], index: 16, kind: input, shape index: {}, may-alias: {6,14,16,20}]   ;;  %s8097_s17 = inlined_call_operand.vmem [shape: bf16[2,64,256], index: 17, kind: input, shape index: {}]   ;;  %s8098_s18 = inlined_call_operand.vmem [shape: f32[2,1,256], index: 18, kind: input, shape index: {}]   ;;  %s8099_s19 = inlined_call_operand.vmem [shape: bf16[2,256,64], index: 19, kind: input, shape index: {}]   ;;  %s8100_s20 = inlined_call_operand.vmem [shape: f32[2,1,64], index: 20, kind: input, shape index: {}, may-alias: {6,14,16,20}]   ;;  %s8101_s21 = inlined_call_operand.vmem [shape: f32[1,64], index: 21, kind: input, shape index: {}]   ;;  %s8102_s22 = inlined_call_operand.vmem [shape: f32[1,64], index: 22, kind: input, shape index: {}, may-alias: {2,22}]   ;;  %s8103_s23 = inlined_call_operand.hbm [shape: f32[2,2,64], index: 23, kind: output, shape index: {}]  }
   0x1   :  { %8124 = sst [smem:[#allocation21_spill]] %s8080_s0 }
   0x2   :  { %8125 = sst [smem:[#allocation22_spill]] %s8081_s1 }
   0x3   :  { %8126 = sst [smem:[#allocation23_spill]] %s8082_s2 }
   0x4   :  { %8127 = sst [smem:[#allocation24_spill]] %s8083_s3 }
   0x5   :  { %8128 = sst [smem:[#allocation25_spill]] %s8084_s4 }
   0x6   :  { %8129 = sst [smem:[#allocation26_spill]] %s8085_s5 }
   0x7   :  { %8130 = sst [smem:[#allocation27_spill]] %s8086_s6 }
   0x8   :  { %8131 = sst [smem:[#allocation28_spill]] %s8087_s7 }
   0x9   :  { %8132 = sst [smem:[#allocation29_spill]] %s8088_s8 }
   0xa   :  { %8133 = sst [smem:[#allocation30_spill]] %s8089_s9 }
   0xb   :  { %8134 = sst [smem:[#allocation31_spill]] %s8090_s10 }
   0xc   :  { %8135 = sst [smem:[#allocation32_spill]] %s8091_s11 }
   0xd   :  { %8136 = sst [smem:[#allocation33_spill]] %s8092_s12 }
   0xe   :  { %8137 = sst [smem:[#allocation34_spill]] %s8093_s13 }
   0xf   :  { %8138 = sst [smem:[#allocation35_spill]] %s8094_s14 }
  0x10   :  { %8139 = sst [smem:[#allocation36_spill]] %s8096_s16 }
  0x11   :  { %8140 = sst [smem:[#allocation37_spill]] %s8099_s19 }
  0x12   :  { %8141 = sst [smem:[#allocation38_spill]] %s8100_s20 }
  0x13   :  { %8142 = sst [smem:[#allocation39_spill]] %s8101_s21 }
  0x14   :  { %8143 = sst [smem:[#allocation40_spill]] %s8102_s22 }
  0x15   :  { %8144 = sst [smem:[#allocation41_spill]] %s8103_s23 }
  0x16   :  { %28 = vsyncpa [#allocation4], 0 }
  0x17   :  { %30 = vsyncpa [#allocation4 + $0x1], 0  ;;  %s6759_s4 = smov 0   ;;  %s6761_s30 = smov 0  }
  0x18   :  { %s6763_s24 = smov 0   ;;  %s6765_s25 = smov 0  }
  0x19   :  { %s6767_s5 = smov 0   ;;  %s6769_s1 = smov 0  }
  0x1a   :  { %s6771_s26 = smov 0   ;;  %s6773_s2 = smov 0  }
  0x1b LB: > { %8145 = sst [smem:[#allocation6_spill]] %s6603_s4  ;;  %s5233_s6 = sadd.s32 4294967295, %s6631_s2   ;;  %s6631_s2 = sphi %s6773_s2, %s36_s2   ;;  %s6627_s26 = sphi %s6771_s26, %s8210_s26   ;;  %s6623_s1 = sphi %s6769_s1, %s8209_s1   ;;  %s6619_s5 = sphi %s6767_s5, %s8208_s5   ;;  %s6615_s25 = sphi %s6765_s25, %s8207_s25   ;;  %s6611_s24 = sphi %s6763_s24, %s8206_s24   ;;  %s6607_s30 = sphi %s6761_s30, %s8205_s30   ;;  %s6603_s4 = sphi %s6759_s4, %s8204_s4  }
  0x1c   : > { %8146 = sst [smem:[#allocation7_spill]] %s6607_s30  ;;  %s5234_s27 = sadd.s32 4294967294, %s6631_s2  }
  0x1d   : > { %8147 = sst [smem:[#allocation8_spill]] %s6611_s24  ;;  %s45_s7 = sadd.s32 1, %s6623_s1 }
  0x1e   : > { %8148 = sst [smem:[#allocation9_spill]] %s6615_s25  ;;  %p46_p0 = scmp.ge.s32.totalorder %s45_s7, 2 }
  0x1f   : > { %8149 = sst [smem:[#allocation10_spill]] %s6619_s5  ;;  %s48_s28 = sadd.s32 1, %s6627_s26 }
  0x20   : > { %8150 = sst [smem:[#allocation11_spill]] %s6623_s1  ;;  %p633_p1 = scmp.ne.s32.totalorder %s6611_s24, %s6607_s30 }
  0x21   : > { %8151 = sst [smem:[#allocation12_spill]] %s6627_s26  ;;  %p634_p2 = scmp.eq.s32.totalorder %s5233_s6, 3 }
  0x22   : > { %8152 = sst [smem:[#allocation13_spill]] %s6631_s2  ;;  %s8212_s7 = smov (%p46_p0, %s45_s7), 0 }
  0x23   : > { %8153 = sst [smem:[#allocation14_spill]] %s8212_s7  ;;  %s8214_s28 = smov (!%p46_p0, %s48_s28), %s6627_s26 }
  0x24   : > { %p6808_p3 = por %p634_p2, %p633_p1  ;;  %p639_p4 = scmp.ne.s32.totalorder %s6607_s30, %s6603_s4 }
  0x25   : > { %p50_p5 = scmp.ge.s32.totalorder %s8214_s28, 2  ;;  %p640_p6 = scmp.eq.s32.totalorder %s5234_s27, 3 }
  0x26   : > { %s8154_s29 = scalar_select %p6808_p3, 1, 0 }
  0x27   : > { %p5237_p7 = scmp.ge.s32.totalorder %s6631_s2, 1  ;;  %p798_p8 = scmp.lt.s32.totalorder %s6631_s2, 5 }
  0x28   : > { %8155 = sst [smem:[#allocation15_spill]] %s8154_s29  ;;  %s8216_s28 = smov (%p50_p5, %s8214_s28), 0 }
  0x29   : > { %8156 = sst [smem:[#allocation16_spill]] %s8216_s28  ;;  %p6818_p9 = por %p640_p6, %p639_p4 }
  0x2a   : > { %p799_p10 = pnand %p5237_p7, %p798_p8  ;;  %s620_s0 = ssub.s32 %s6627_s26, %s8216_s28 }
  0x2b   : > { %s8157_s3 = scalar_select %p6818_p9, 1, 0 }
  0x2c   : > { %s623_s6 = sadd.s32 1, %s6611_s24  ;;  %p621_p11 = scmp.eq.s32.totalorder %s620_s0, 0 }
  0x2d   : > { %8158 = sst [smem:[#allocation17_spill]] %s8157_s3  ;;  %802 = sbr.rel (%p799_p10) target bundleno = 4618 (0x120a), region = 112 }
  0x2e   : > { %s6826_s7 = scalar_select %p621_p11, %s6611_s24, %s623_s6  }
  0x30   : > { %8159 = sst [smem:[#allocation18_spill]] %s6826_s7 }
  0x32   : > { %s8112_s27 = sand.u32 1, %s6607_s30   ;;  %s5239_s1 = sshll.u32 %s6619_s5, 1 }
  0x33   : > { %s6832_s4 = sshll.u32 %s8112_s27, 1  ;;  %p928_p12 = scmp.lt.s32.totalorder %s5239_s1, 3 }
  0x34   : > { %p934_p13 = scmp.lt.s32.totalorder %s6615_s25, 1  ;;  %s8162_s5 = sld [smem:[#allocation21_spill]] }
  0x35   : > { %s8218_s1 = smov (!%p928_p12, %s5239_s1), 3  ;;  %s8164_s8 = sld [smem:[#allocation29_spill]] }
  0x36   : > { %s6836_s3 = scalar_select %p934_p13, %s6615_s25, 1 }
  0x37   : > { %s6245_s0 = smul.u32 12, %s8218_s1  ;;  %s8163_s1 = sld [smem:[#allocation28_spill]] }
  0x38   : > { %s5463_s21 = sshll.u32 %s6836_s3, 7  ;;  %s5243_s28 = sshll.u32 %s6836_s3, 2 }
  0x39   : > { %s8166_s9 = sld [smem:[#allocation30_spill]]  ;;  %s5466_s7 = sshll.u32 %s6836_s3, 5 }
  0x3a   : > { %s6849_s22 = scalar_lea.vmem %s8162_s5, %s6245_s0  ;;  %s8167_s10 = sld [smem:[#allocation31_spill]] }
  0x3b   : > { %s6861_s24 = scalar_lea.vmem %s8164_s8, %s5243_s28  ;;  %s8168_s11 = sld [smem:[#allocation32_spill]] }
  0x3c   : > { %8165 = sst [smem:[#allocation19_spill]] %s6861_s24  ;;  %s5467_s6 = sshll.u32 %s6836_s3, 6 }
  0x3d   : > { %s6855_s19 = scalar_lea.vmem %s8163_s1, %s5463_s21  ;;  %s8169_s12 = sld [smem:[#allocation33_spill]] }
  0x3e   : > { %s8171_s13 = sld [smem:[#allocation34_spill]]  ;;  %s5254_s26 = sshll.u32 %s6836_s3, 1 }
  0x3f   : > { %s6866_s30 = scalar_lea.vmem %s8166_s9, %s5463_s21  ;;  %s8172_s14 = sld [smem:[#allocation35_spill]] }
  0x40   : > { %s6871_s0 = scalar_lea.vmem %s8167_s10, %s5243_s28  ;;  %s6913_s9 = scalar_lea.vmem %s8098_s18, %s5254_s26 }
  0x41   : > { %s6876_s1 = scalar_lea.vmem %s8168_s11, %s5463_s21  ;;  %s8174_s10 = sld [smem:[#allocation37_spill]] }
  0x42   : > { %s8175_s24 = sld [smem:[#allocation38_spill]] }
  0x43   : > { %s6881_s23 = scalar_lea.vmem %s8169_s12, %s5243_s28  ;;  %s8176_s16 = sld [smem:[#allocation9_spill]] }
  0x44   : > { %8170 = sst [smem:[#allocation20_spill]] %s6881_s23  ;;  %s6887_s8 = scalar_lea.vmem %s8171_s13, %s5466_s7 }
  0x45   : > { %s6893_s29 = scalar_lea.vmem %s8172_s14, %s6836_s3  ;;  %s6908_s7 = scalar_lea.vmem %s8097_s17, %s5467_s6 }
  0x46   : > { %s926_s14 = scalar_lea.vmem [#allocation3], %s6832_s4 }
  0x47   : > { %s6918_s20 = scalar_lea.vmem %s8174_s10, %s5463_s21 }
  0x48   : > { %s997_s28 = scalar_lea.vmem %s8175_s24, %s6836_s3 }
  0x49   : > { %p5257_p0 = scmp.ne.s32.totalorder %s8176_s16, 0 }
  0x4a   : > { %s8177_s6 = sld [smem:[#allocation22_spill]] (!%p5257_p0) }
  0x4b   : > { %1002 = sbr.rel (%p5257_p0) target bundleno = 382 (0x17e), region = 116  ;;  %s8178_s2 = sld [smem:[#allocation24_spill]] (!%p5257_p0) }
  0x4c   : > { %s8180_s25 = sld [smem:[#allocation25_spill]] (!%p5257_p0) }
  0x4d   : > { %s8182_s11 = sld [smem:[#allocation23_spill]] (!%p5257_p0) }
  0x50   : > { %v6929_v0 = vld [vmem:[%s8177_s6 + $0x78] sm:$0xff]   ;;  %v6952_v4 = vld [vmem:[%s8177_s6 + $0x70] sm:$0xff]   ;;  %v6976_v8 = vld [vmem:[%s8177_s6 + $0x68] sm:$0xff]   ;;  %v1114_v28 = vlaneseq  ;;  %vm1556_vm0 = vcmask 516096   ;;  %v6633_v36 = vmov 1983009808  }
  0x51   : > { %v6934_v1 = vld [vmem:[%s8177_s6 + $0xf8] sm:$0xff]   ;;  %5469 = vmatprep.subr.bf16.mxu0 %v6929_v0  ;;  %v6958_v5 = vld [vmem:[%s8177_s6 + $0xf0] sm:$0xff]   ;;  %v6982_v9 = vld [vmem:[%s8177_s6 + $0xe8] sm:$0xff]   ;;  %v1112_v37 = vunpack.c.l.s4 %v6633_v36  ;;  %s8179_s13 = smov %s8178_s2  ;;  %vm1551_vm1 = vcmask 519168  }
  0x52   : > { %v6940_v2 = vld [vmem:[%s8177_s6 + $0x38] sm:$0xff]   ;;  %5491 = vmatprep.subr.bf16.mxu1 %v6934_v1  ;;  %v6964_v6 = vld [vmem:[%s8177_s6 + $0x30] sm:$0xff]   ;;  %v6988_v10 = vld [vmem:[%s8177_s6 + $0x28] sm:$0xff]   ;;  %v1115_v33 = vshrl.u32 %v1114_v28, 7  ;;  %s8181_s27 = smov %s8180_s25 }
  0x53   : > { %v6946_v3 = vld [vmem:[%s8177_s6 + $0xb8] sm:$0xff]   ;;  %5470 = vmatpush3.bf16.msra.mxu0 %v6940_v2  ;;  %v6970_v7 = vld [vmem:[%s8177_s6 + $0xb0] sm:$0xff]   ;;  %v6994_v11 = vld [vmem:[%s8177_s6 + $0xa8] sm:$0xff]   ;;  %v1113_v41 = vunpack.c.0.s8 %v1112_v37 }
  0x54   : > { %5492 = vmatpush3.bf16.msra.mxu1 %v6946_v3  ;;  %5471 = vmatprep.subr.bf16.mxu0 %v6952_v4  ;;  %v7000_v12 = vld [vmem:[%s8177_s6 + $0x60] sm:$0xff]   ;;  %v7024_v16 = vld [vmem:[%s8177_s6 + $0x58] sm:$0xff]   ;;  %v7048_v20 = vld [vmem:[%s8177_s6 + $0x50] sm:$0xff]  }
  0x55   : > { %5493 = vmatprep.subr.bf16.mxu1 %v6958_v5  ;;  %v7006_v13 = vld [vmem:[%s8177_s6 + $0xe0] sm:$0xff]   ;;  %v7030_v17 = vld [vmem:[%s8177_s6 + $0xd8] sm:$0xff]   ;;  %v7054_v21 = vld [vmem:[%s8177_s6 + $0xd0] sm:$0xff]   ;;  %v1116_v43 = vsub.s32 %v1113_v41, %v1115_v33 }
  0x56   : > { %v7012_v14 = vld [vmem:[%s8177_s6 + $0x20] sm:$0xff]   ;;  %v7036_v18 = vld [vmem:[%s8177_s6 + $0x18] sm:$0xff]   ;;  %v7060_v22 = vld [vmem:[%s8177_s6 + $0x10] sm:$0xff]  }
  0x57   : > { %5472 = vmatpush3.bf16.msra.mxu0 %v6964_v6  ;;  %v7018_v15 = vld [vmem:[%s8177_s6 + $0xa0] sm:$0xff]   ;;  %v7042_v19 = vld [vmem:[%s8177_s6 + $0x98] sm:$0xff]   ;;  %v7066_v23 = vld [vmem:[%s8177_s6 + $0x90] sm:$0xff]  }
  0x58   : > { %5494 = vmatpush3.bf16.msra.mxu1 %v6970_v7  ;;  %5473 = vmatprep.subr.bf16.mxu0 %v6976_v8  ;;  %v7072_v24 = vld [vmem:[%s8177_s6 + $0x48] sm:$0xff]   ;;  %v7096_v29 = vld [vmem:[%s8177_s6 + $0x40] sm:$0xff]   ;;  %v7121_v35 = vld [vmem:[%s8177_s6 + $0x178] sm:$0xff]  }
  0x59   : > { %5495 = vmatprep.subr.bf16.mxu1 %v6982_v9  ;;  %v7078_v25 = vld [vmem:[%s8177_s6 + $0xc8] sm:$0xff]   ;;  %v7102_v30 = vld [vmem:[%s8177_s6 + $0xc0] sm:$0xff]   ;;  %v7136_v48 = vld [vmem:[%s8177_s6 + $0x138] sm:$0xff]  }
  0x5a   : > { %v7084_v26 = vld [vmem:[%s8177_s6 + $0x8] sm:$0xff]   ;;  %v7108_v31 = vld [vmem:[%s8177_s6] sm:$0xff]   ;;  %v7141_v49 = vld [vmem:[%s8177_s6 + $0x170] sm:$0xff]  }
  0x5b   : > { %5474 = vmatpush3.bf16.msra.mxu0 %v6988_v10  ;;  %v7090_v27 = vld [vmem:[%s8177_s6 + $0x88] sm:$0xff]   ;;  %v7114_v32 = vld [vmem:[%s8177_s6 + $0x80] sm:$0xff]   ;;  %v7148_v50 = vld [vmem:[%s8177_s6 + $0x130] sm:$0xff]  }
  0x5c   : > { %5496 = vmatpush3.bf16.msra.mxu1 %v6994_v11  ;;  %5475 = vmatprep.subr.bf16.mxu0 %v7000_v12  ;;  %v1099_v34 = vld [vmem:[%s6849_s22] sm:$0xff]  ;;  %v6359_v51 = vld [vmem:[%s8177_s6 + $0x168] sm:$0xff]   ;;  %v6363_v60 = vld [vmem:[%s8177_s6 + $0x158] sm:$0xff]  }
  0x5d   : > { %5497 = vmatprep.subr.bf16.mxu1 %v7006_v13  ;;  %v1553_v38 = vld [vmem:[%s8178_s2] sm:$0x1]  ;;  %v1110_v42 = vcombine.high %v1099_v34, %v1099_v34  ;;  %v1117_v44 = vrot.slane %v1099_v34, %v1116_v43  ;;  %v6360_v52 = vld [vmem:[%s8177_s6 + $0x128] sm:$0xff]   ;;  %v6364_v61 = vld [vmem:[%s8177_s6 + $0x118] sm:$0xff]  }
  0x5e   : > { %v1554_v39 = vld [vmem:[%s8180_s25] sm:$0x1]  ;;  %v5259_v53 = vld.sshfl [vmem:[%s6849_s22 + $0x8] sm:$0x33 pattern:$0x76325410] }
  0x5f   : > { %5476 = vmatpush3.bf16.msra.mxu0 %v7012_v14  ;;  %v1555_v40 = vadd.f32 %v1554_v39, %v1553_v38  ;;  %v1124_v45 = vrot.slane %v1110_v42, %v1116_v43  ;;  %v1125_v46 = vcombine.high %v1117_v44, %v1117_v44  ;;  %v5308_v54 = vld [vmem:[%s6849_s22 + $0xc] sm:$0xff]  ;;  %v6361_v55 = vld [vmem:[%s8177_s6 + $0x160] sm:$0xff]   ;;  %v1134_v56 = vcombine.high %v5259_v53, %v5259_v53 }
  0x60   : > { %5498 = vmatpush3.bf16.msra.mxu1 %v7018_v15  ;;  %5477 = vmatprep.subr.bf16.mxu0 %v7024_v16  ;;  %v1577_v57 = vrot.slane %v5308_v54, %v1116_v43  ;;  %v6362_v59 = vld [vmem:[%s8177_s6 + $0x120] sm:$0xff]   ;;  %v6365_v62 = vld [vmem:[%s8177_s6 + $0x150] sm:$0xff]  }
  0x61   : > { %5499 = vmatprep.subr.bf16.mxu1 %v7030_v17  ;;  %1557 = vst.msk [vmem:[#allocation2] sm:$0x1] %vm1556_vm0, %v1555_v40  ;;  %v1126_v47 = vcombine.high %v1124_v45, %v1124_v45  ;;  %1461 = vmatprep.mubr.bf16.mxu0 %v1125_v46  ;;  %v6366_v63 = vld [vmem:[%s8177_s6 + $0x110] sm:$0xff]  }
  0x62   : > { %v1585_v58 = vcombine.high %v1577_v57, %v1577_v57 }
  0x63   : > { %5478 = vmatpush3.bf16.msra.mxu0 %v7036_v18  ;;  %1501 = vmatprep.mubr.bf16.mxu1 %v1126_v47 }
  0x64   : > { %5500 = vmatpush3.bf16.msra.mxu1 %v7042_v19  ;;  %5479 = vmatprep.subr.bf16.mxu0 %v7048_v20 }
  0x65   : > { %5501 = vmatprep.subr.bf16.mxu1 %v7054_v21 }
  0x67   : > { %5480 = vmatpush3.bf16.msra.mxu0 %v7060_v22 }
  0x68   : > { %5502 = vmatpush3.bf16.msra.mxu1 %v7066_v23  ;;  %5481 = vmatprep.subr.bf16.mxu0 %v7072_v24 }
  0x69   : > { %5503 = vmatprep.subr.bf16.mxu1 %v7078_v25 }
  0x6b   : > { %5482 = vmatpush3.bf16.msra.mxu0 %v7084_v26 }
  0x6c   : > { %5504 = vmatpush3.bf16.msra.mxu1 %v7090_v27  ;;  %5483 = vmatprep.subr.bf16.mxu0 %v7096_v29 }
  0x6d   : > { %5505 = vmatprep.subr.bf16.mxu1 %v7102_v30 }
  0x6f   : > { %5484 = vmatpush3.bf16.msra.mxu0 %v7108_v31 }
  0x70   : > { %5506 = vmatpush3.bf16.msra.mxu1 %v7114_v32  ;;  %5513 = vmatprep.subr.bf16.mxu0 %v7121_v35 }
  0x71   : > { %5535 = vmatprep.subr.bf16.mxu1 %v6929_v0  ;;  %v6367_v0 = vld [vmem:[%s8177_s6 + $0x148] sm:$0xff]  }
  0x72   : > { %1462 = vmatmul.mubr.bf16.vlgmr.msra.gmra.mxu0 %v1117_v44 }
  0x73   : > { %1502 = vmatmul.mubr.bf16.vlgmr.msra.gmra.mxu1 %v1124_v45  ;;  %5514 = vmatpush3.bf16.msra.mxu0 %v7136_v48 }
  0x74   : > { %5536 = vmatpush3.bf16.msra.mxu1 %v6940_v2  ;;  %5515 = vmatprep.subr.bf16.mxu0 %v7141_v49  ;;  %v6368_v2 = vld [vmem:[%s8177_s6 + $0x108] sm:$0xff]  }
  0x75   : > { %5537 = vmatprep.subr.bf16.mxu1 %v6952_v4  ;;  %1541 = vmatprep.mubr.bf16.mxu0 %v1134_v56  ;;  %v6369_v4 = vld [vmem:[%s8177_s6 + $0x140] sm:$0xff]  }
  0x76   : > { %1633 = vmatprep.mubr.bf16.mxu1 %v1585_v58 }
  0x77   : > { %5516 = vmatpush3.bf16.msra.mxu0 %v7148_v50 }
  0x78   : > { %5538 = vmatpush3.bf16.msra.mxu1 %v6964_v6  ;;  %5517 = vmatprep.subr.bf16.mxu0 %v6359_v51  ;;  %v1570_v6 = vcombine.high %v5308_v54, %v5308_v54 }
  0x79   : > { %5539 = vmatprep.subr.bf16.mxu1 %v6976_v8  ;;  %v6370_v8 = vld [vmem:[%s8177_s6 + $0x100] sm:$0xff]  }
  0x7b   : > { %5518 = vmatpush3.bf16.msra.mxu0 %v6360_v52 }
  0x7c   : > { %5540 = vmatpush3.bf16.msra.mxu1 %v6988_v10  ;;  %5519 = vmatprep.subr.bf16.mxu0 %v6361_v55  ;;  %v1584_v10 = vrot.slane %v1570_v6, %v1116_v43 }
  0x7d   : > { %5541 = vmatprep.subr.bf16.mxu1 %v7000_v12  ;;  %v5311_v12 = vld.sshfl [vmem:[%s6849_s22 + $0x14] sm:$0x33 pattern:$0x76325410] }
  0x7f   : > { %5520 = vmatpush3.bf16.msra.mxu0 %v6362_v59 }
  0x80   : > { %5542 = vmatpush3.bf16.msra.mxu1 %v7012_v14  ;;  %5521 = vmatprep.subr.bf16.mxu0 %v6363_v60  ;;  %v1586_v14 = vcombine.high %v1584_v10, %v1584_v10 }
  0x81   : > { %5543 = vmatprep.subr.bf16.mxu1 %v7024_v16  ;;  %v1594_v16 = vcombine.high %v5311_v12, %v5311_v12 }
  0x83   : > { %5522 = vmatpush3.bf16.msra.mxu0 %v6364_v61 }
  0x84   : > { %5544 = vmatpush3.bf16.msra.mxu1 %v7036_v18  ;;  %5523 = vmatprep.subr.bf16.mxu0 %v6365_v62 }
  0x85   : > { %5545 = vmatprep.subr.bf16.mxu1 %v7048_v20 }
  0x87   : > { %5524 = vmatpush3.bf16.msra.mxu0 %v6366_v63 }
  0x88   : > { %5546 = vmatpush3.bf16.msra.mxu1 %v7060_v22  ;;  %5525 = vmatprep.subr.bf16.mxu0 %v6367_v0 }
  0x89   : > { %5547 = vmatprep.subr.bf16.mxu1 %v7072_v24 }
  0x8b   : > { %5526 = vmatpush3.bf16.msra.mxu0 %v6368_v2 }
  0x8c   : > { %5548 = vmatpush3.bf16.msra.mxu1 %v7084_v26  ;;  %5527 = vmatprep.subr.bf16.mxu0 %v6369_v4 }
  0x8d   : > { %5549 = vmatprep.subr.bf16.mxu1 %v7096_v29 }
  0x8f   : > { %5528 = vmatpush3.bf16.msra.mxu0 %v6370_v8 }
  0x90   : > { %5550 = vmatpush3.bf16.msra.mxu1 %v7108_v31  ;;  %5557 = vmatprep.subr.bf16.mxu0 %v6934_v1  ;;  %v1725_v1 = vld [vmem:[%s8179_s13] sm:$0x1] }
  0x91   : > { %5579 = vmatprep.subr.bf16.mxu1 %v7121_v35 }
  0x92   : > { %1542 = vmatmul.mubr.bf16.vlgmr.msra.gmra.mxu0 %v5259_v53 }
  0x93   : > { %1634 = vmatmul.mubr.bf16.vlgmr.msra.gmra.mxu1 %v1577_v57  ;;  %5558 = vmatpush3.bf16.msra.mxu0 %v6946_v3  ;;  %v1726_v3 = vld [vmem:[%s8181_s27] sm:$0x1] }
  0x94   : > { %5580 = vmatpush3.bf16.msra.mxu1 %v7136_v48  ;;  %5559 = vmatprep.subr.bf16.mxu0 %v6958_v5  ;;  %v1727_v5 = vadd.f32 %v1726_v3, %v1725_v1  ;;  %v1721_v48 = vld [vmem:[%s8181_s27 + $0x1] sm:$0xf] }
  0x95   : > { %5581 = vmatprep.subr.bf16.mxu1 %v7141_v49  ;;  %1673 = vmatprep.mubr.bf16.mxu0 %v1586_v14 }
  0x96   : > { %1713 = vmatprep.mubr.bf16.mxu1 %v1594_v16  ;;  %1728 = vst.msk [vmem:[#allocation2 + $0x8] sm:$0x1] %vm1556_vm0, %v1727_v5 }
  0x97   : > { %5560 = vmatpush3.bf16.msra.mxu0 %v6970_v7 }
  0x98   : > { %5582 = vmatpush3.bf16.msra.mxu1 %v7148_v50  ;;  %5561 = vmatprep.subr.bf16.mxu0 %v6982_v9 }
  0x99   : > { %5583 = vmatprep.subr.bf16.mxu1 %v6359_v51 }
  0x9b   : > { %5562 = vmatpush3.bf16.msra.mxu0 %v6994_v11 }
  0x9c   : > { %5584 = vmatpush3.bf16.msra.mxu1 %v6360_v52  ;;  %5563 = vmatprep.subr.bf16.mxu0 %v7006_v13 }
  0x9d   : > { %5585 = vmatprep.subr.bf16.mxu1 %v6361_v55 }
  0x9f   : > { %5564 = vmatpush3.bf16.msra.mxu0 %v7018_v15 }
  0xa0   : > { %5586 = vmatpush3.bf16.msra.mxu1 %v6362_v59  ;;  %5565 = vmatprep.subr.bf16.mxu0 %v7030_v17 }
  0xa1   : > { %5587 = vmatprep.subr.bf16.mxu1 %v6363_v60 }
  0xa3   : > { %5566 = vmatpush3.bf16.msra.mxu0 %v7042_v19 }
  0xa4   : > { %5588 = vmatpush3.bf16.msra.mxu1 %v6364_v61  ;;  %5567 = vmatprep.subr.bf16.mxu0 %v7054_v21  ;;  %v5258_v21 = vld [vmem:[%s8182_s11] ss:$0 sm:$0xff] }
  0xa5   : > { %5589 = vmatprep.subr.bf16.mxu1 %v6365_v62 }
  0xa7   : > { %5568 = vmatpush3.bf16.msra.mxu0 %v7066_v23 }
  0xa8   : > { %5590 = vmatpush3.bf16.msra.mxu1 %v6366_v63  ;;  %5569 = vmatprep.subr.bf16.mxu0 %v7078_v25 }
  0xa9   : > { %5591 = vmatprep.subr.bf16.mxu1 %v6367_v0 }
  0xab   : > { %5570 = vmatpush3.bf16.msra.mxu0 %v7090_v27 }
  0xac   : > { %5592 = vmatpush3.bf16.msra.mxu1 %v6368_v2  ;;  %5571 = vmatprep.subr.bf16.mxu0 %v7102_v30  ;;  %v1549_v30 = vld [vmem:[%s8181_s27 + $0x1] sm:$0xf] }
  0xad   : > { %5593 = vmatprep.subr.bf16.mxu1 %v6369_v4 }
  0xaf   : > { %5572 = vmatpush3.bf16.msra.mxu0 %v7114_v32 }
  0xb0   : > { %5594 = vmatpush3.bf16.msra.mxu1 %v6370_v8 }
  0xb2   : > { %1674 = vmatmul.mubr.bf16.vlgmr.msra.gmra.mxu0 %v1584_v10 }
  0xb3   : > { %1714 = vmatmul.mubr.bf16.vlgmr.msra.gmra.mxu1 %v5311_v12 }
 0x132   : > { %v5485_v7 = vpop.f32.mrf.mxu0 }
 0x133   : > { %v5507_v9 = vpop.f32.mrf.mxu1 }
 0x134   : > { %v5486_v11 = vpop.f32.mrf.mxu0 }
 0x135   : > { %v5508_v13 = vpop.f32.mrf.mxu1  ;;  %v5487_v20 = vadd.f32 %v5486_v11, %v5485_v7 }
 0x136   : > { %v5488_v15 = vpop.f32.mrf.mxu0  ;;  %v5509_v23 = vadd.f32 %v5508_v13, %v5507_v9 }
 0x137   : > { %v5510_v17 = vpop.f32.mrf.mxu1  ;;  %v1464_v22 = vadd.f32 %v5487_v20, %v5258_v21 }
 0x138   : > { %v5489_v18 = vpop.f32.mrf.mxu0 }
 0x139   : > { %v5511_v19 = vpop.f32.mrf.mxu1  ;;  %v1504_v28 = vadd.f32 %v5509_v23, %v1464_v22 }
 0x152   : > { %v5529_v24 = vpop.f32.mrf.mxu0 }
 0x153   : > { %v5551_v25 = vpop.f32.mrf.mxu1 }
 0x154   : > { %v5530_v26 = vpop.f32.mrf.mxu0 }
 0x155   : > { %v5552_v27 = vpop.f32.mrf.mxu1  ;;  %v5531_v29 = vadd.f32 %v5530_v26, %v5529_v24 }
 0x156   : > { %v5532_v31 = vpop.f32.mrf.mxu0  ;;  %v5553_v37 = vadd.f32 %v5552_v27, %v5551_v25 }
 0x157   : > { %v5554_v32 = vpop.f32.mrf.mxu1  ;;  %v1544_v33 = vadd.f32 %v5531_v29, %v1504_v28 }
 0x158   : > { %v5533_v34 = vpop.f32.mrf.mxu0  ;;  %v1636_v42 = vadd.f32 %v5553_v37, %v5258_v21 }
 0x159   : > { %v5555_v35 = vpop.f32.mrf.mxu1  ;;  %v1550_v36 = vadd.f32 %v1549_v30, %v1544_v33 }
 0x15b   : > { %1552 = vst.msk [vmem:[#allocation2 + $0x1] sm:$0xf] %vm1551_vm1, %v1550_v36 }
 0x172   : > { %v5573_v38 = vpop.f32.mrf.mxu0 }
 0x173   : > { %v5595_v39 = vpop.f32.mrf.mxu1 }
 0x174   : > { %v5574_v40 = vpop.f32.mrf.mxu0 }
 0x175   : > { %v5596_v41 = vpop.f32.mrf.mxu1  ;;  %v5575_v43 = vadd.f32 %v5574_v40, %v5573_v38 }
 0x176   : > { %v5576_v44 = vpop.f32.mrf.mxu0  ;;  %v5597_v47 = vadd.f32 %v5596_v41, %v5595_v39 }
 0x177   : > { %v5598_v45 = vpop.f32.mrf.mxu1  ;;  %v1676_v46 = vadd.f32 %v5575_v43, %v1636_v42 }
 0x178   : > { %v5577_v49 = vpop.f32.mrf.mxu0 }
 0x179   : > { %v5599_v50 = vpop.f32.mrf.mxu1  ;;  %v1716_v51 = vadd.f32 %v5597_v47, %v1676_v46 }
 0x17b   : > { %v1722_v52 = vadd.f32 %v1721_v48, %v1716_v51 }
 0x17d   : > { %1724 = vst.msk [vmem:[#allocation2 + $0x9] sm:$0xf] %vm1551_vm1, %v1722_v52 }
 0x17e PF: > { %v1892_v53 = vld [vmem:[#allocation2] sm:$0x1f]  ;;  %vm1893_vm2 = vcmask 520192   ;;  %v6372_v60 = vld [vmem:[%s6855_s19 + $0x18] sm:$0xff]   ;;  %v6634_v62 = vmov 0.0   ;;  %v7252_v63 = vld [vmem:[%s6855_s19 + $0x10] sm:$0xff]   ;;  %s8189_s23 = scalar_lea.vmem %s8095_s15, %s6836_s3 }
 0x17f   : > { %v1894_v54 = vsel %vm1893_vm2, %v1892_v53, 0.0  ;;  %v6373_v61 = vld [vmem:[%s6855_s19 + $0x38] sm:$0xff]   ;;  %5813 = vmatprep.subr.bf16.mxu0 %v6634_v62  ;;  %5825 = vmatprep.subr.bf16.mxu1 %v6634_v62  ;;  %v6375_v0 = vld [vmem:[%s6855_s19 + $0x30] sm:$0xff]   ;;  %v7259_v2 = vld [vmem:[%s6855_s19 + $0x8] sm:$0xff]   ;;  %vm6635_vm3 = vmmov 0   ;;  %s8183_s21 = sld [smem:[#allocation26_spill]] }
 0x180   : > { %1895 = vadd.xlane.f32.xlu0 %v1894_v54  ;;  %5814 = vmatpush3.bf16.msra.mxu0 %v6372_v60  ;;  %v6377_v4 = vld [vmem:[%s6855_s19 + $0x28] sm:$0xff]   ;;  %v7266_v6 = vld [vmem:[%s6855_s19] sm:$0xff]   ;;  %s8185_s10 = sld [smem:[#allocation27_spill]]  ;;  %vm1971_vm4 = vcmask 523264   ;;  %v6380_v11 = vld [vmem:[%s6855_s19 + $0x58] sm:$0xff]   ;;  %vm2775_vm5 = vcmask 130048  }
 0x181   : > { %5826 = vmatpush3.bf16.msra.mxu1 %v6373_v61  ;;  %5815 = vmatprep.subr.bf16.mxu0 %v6634_v62  ;;  %v6379_v8 = vld [vmem:[%s6855_s19 + $0x20] sm:$0xff]   ;;  %v7294_v13 = vld [vmem:[%s6855_s19 + $0x78] sm:$0xff]   ;;  %v6382_v17 = vld [vmem:[%s6855_s19 + $0x50] sm:$0xff]   ;;  %s8187_s24 = sld [smem:[#allocation19_spill]]  ;;  %vm3021_vm6 = vcmask 1041408   ;;  %vm3022_vm7 = vcmask 1042432  }
 0x182   : > { %5827 = vmatprep.subr.bf16.mxu1 %v6634_v62  ;;  %5821 = vmatprep.mubr.msk.bf16.mxu0 %vm6635_vm3, %v6634_v62  ;;  %v7305_v18 = vld [vmem:[%s6855_s19 + $0x70] sm:$0xff]   ;;  %v6384_v19 = vld [vmem:[%s6855_s19 + $0x48] sm:$0xff]   ;;  %v6386_v21 = vld [vmem:[%s6855_s19 + $0x40] sm:$0xff]   ;;  %s8188_s12 = sld [smem:[#allocation20_spill]]  ;;  %vm2964_vm8 = vcmask 36864   ;;  %vm3017_vm9 = vcmask 39936  }
 0x183   : > { %5833 = vmatprep.mubr.msk.bf16.mxu1 %vm6635_vm3, %v6634_v62  ;;  %v7316_v20 = vld [vmem:[%s6855_s19 + $0x68] sm:$0xff]   ;;  %v7323_v22 = vld [vmem:[%s6855_s19 + $0x60] sm:$0xff]   ;;  %v6388_v23 = vld [vmem:[%s6866_s30 + $0x18] sm:$0xff]   ;;  %s8190_s22 = sld [smem:[#allocation36_spill]] }
 0x184   : > { %5816 = vmatpush3.bf16.msra.mxu0 %v7252_v63  ;;  %v7330_v24 = vld [vmem:[%s6866_s30 + $0x38] sm:$0xff]   ;;  %v6390_v25 = vld [vmem:[%s6866_s30 + $0x10] sm:$0xff]   ;;  %v6392_v27 = vld [vmem:[%s6866_s30 + $0x8] sm:$0xff]  }
 0x185   : > { %5828 = vmatpush3.bf16.msra.mxu1 %v6375_v0  ;;  %5817 = vmatprep.subr.bf16.mxu0 %v6634_v62  ;;  %s8184_s16 = scalar_lea.vmem %s8183_s21, %s6836_s3  ;;  %v7341_v26 = vld [vmem:[%s6866_s30 + $0x30] sm:$0xff]   ;;  %v7352_v28 = vld [vmem:[%s6866_s30 + $0x28] sm:$0xff]   ;;  %v6394_v29 = vld [vmem:[%s6866_s30] sm:$0xff]  }
 0x186   : > { %5829 = vmatprep.subr.bf16.mxu1 %v6634_v62  ;;  %v7281_v1 = vld [vmem:[%s8184_s16] ss:$0 sm:$0xff]  ;;  %s8186_s11 = scalar_lea.vmem %s8185_s10, %s6836_s3  ;;  %v6396_v31 = vld [vmem:[%s6866_s30 + $0x58] sm:$0xff]   ;;  %v6398_v33 = vld [vmem:[%s6866_s30 + $0x50] sm:$0xff]  }
 0x187   : > { %v7288_v5 = vld [vmem:[%s8186_s11] ss:$0 sm:$0xff]  ;;  %v7366_v32 = vld [vmem:[%s6866_s30 + $0x78] sm:$0xff]   ;;  %v7377_v34 = vld [vmem:[%s6866_s30 + $0x70] sm:$0xff]  }
 0x188   : > { %5818 = vmatpush3.bf16.msra.mxu0 %v7259_v2  ;;  %v7359_v30 = vld [vmem:[%s6866_s30 + $0x20] sm:$0xff]   ;;  %v6400_v35 = vld [vmem:[%s6866_s30 + $0x48] sm:$0xff]   ;;  %v6404_v39 = vld [vmem:[%s6876_s1 + $0x18] sm:$0xff]  }
 0x189   : > { %5830 = vmatpush3.bf16.msra.mxu1 %v6377_v4  ;;  %5819 = vmatprep.subr.bf16.mxu0 %v6634_v62  ;;  %v7388_v36 = vld [vmem:[%s6866_s30 + $0x68] sm:$0xff]   ;;  %v6402_v37 = vld [vmem:[%s6866_s30 + $0x40] sm:$0xff]   ;;  %v7402_v40 = vld [vmem:[%s6876_s1 + $0x38] sm:$0xff]   ;;  %s8191_s21 = scalar_lea.vmem %s8190_s22, %s6836_s3  ;;  %s8193_s3 = sld [smem:[#allocation9_spill]] }
 0x18a   : > { %5831 = vmatprep.subr.bf16.mxu1 %v6634_v62  ;;  %v7395_v38 = vld [vmem:[%s6866_s30 + $0x60] sm:$0xff]   ;;  %v6406_v41 = vld [vmem:[%s6876_s1 + $0x10] sm:$0xff]   ;;  %v6408_v43 = vld [vmem:[%s6876_s1 + $0x8] sm:$0xff]  }
 0x18b   : > { %v7413_v42 = vld [vmem:[%s6876_s1 + $0x30] sm:$0xff]   ;;  %v7424_v44 = vld [vmem:[%s6876_s1 + $0x28] sm:$0xff]   ;;  %v6410_v45 = vld [vmem:[%s6876_s1] sm:$0xff]  }
 0x18c   : > { %5820 = vmatpush3.bf16.msra.mxu0 %v7266_v6  ;;  %v7431_v46 = vld [vmem:[%s6876_s1 + $0x20] sm:$0xff]   ;;  %v6412_v47 = vld [vmem:[%s6876_s1 + $0x58] sm:$0xff]   ;;  %v6414_v49 = vld [vmem:[%s6876_s1 + $0x50] sm:$0xff]  }
 0x18d   : > { %5832 = vmatpush3.bf16.msra.mxu1 %v6379_v8  ;;  %5837 = vmatprep.subr.bf16.mxu0 %v6634_v62  ;;  %v7438_v48 = vld [vmem:[%s6876_s1 + $0x78] sm:$0xff]   ;;  %v7449_v50 = vld [vmem:[%s6876_s1 + $0x70] sm:$0xff]   ;;  %v6416_v51 = vld [vmem:[%s6876_s1 + $0x48] sm:$0xff]  }
 0x18e   : > { %5849 = vmatprep.subr.bf16.mxu1 %v6634_v62  ;;  %v7460_v52 = vld [vmem:[%s6876_s1 + $0x68] sm:$0xff]   ;;  %v7467_v54 = vld [vmem:[%s6876_s1 + $0x60] sm:$0xff]  }
 0x18f   : > { %p5456_p1 = scmp.ne.s32.totalorder %s8193_s3, 1 }
 0x190   : > { %s8195_s16 = sld [smem:[#allocation40_spill]] (!%p5456_p1) }
 0x209   : > { %v1896_v55 = vpop.xlane.xlu0 %1895 }
 0x20a   : > { %v1898_v56 = vmul.f32 0.015625, %v1896_v55 }
 0x20c   : > { %v1899_v57 = vsub.f32 %v1892_v53, %v1898_v56  ;;  %v6418_v53 = vld [vmem:[%s6876_s1 + $0x40] sm:$0xff]  }
 0x20e   : > { %v1900_v58 = vmul.f32 %v1899_v57, %v1899_v57 }
 0x210   : > { %v1901_v59 = vsel %vm1893_vm2, %v1900_v58, 0.0 }
 0x211   : > { %1902 = vadd.xlane.f32.xlu0 %v1901_v59 }
 0x29a   : > { %v1903_v10 = vpop.xlane.xlu0 %1902 }
 0x29b   : > { %v1904_v12 = vmul.f32 0.015625, %v1903_v10 }
 0x29d   : > { %v1905_v14 = vadd.f32 1e-06, %v1904_v12 }
 0x29f   : > { %6452 = vrsqrt.f32 %v1905_v14 }
 0x2ac   : > { %v6453_v16 = vpop.eup %6452 }
 0x2ad   : > { %v1907_v3 = vmul.f32 %v6453_v16, %v1899_v57 }
 0x2af   : > { %v1914_v7 = vmul.f32 %v7281_v1, %v1907_v3 }
 0x2b1   : > { %v1921_v9 = vadd.f32 %v7288_v5, %v1914_v7 }
 0x2b3   : > { %v7296_v15 = vpack.c.bf16 %v1921_v9, %v1921_v9  ;;  %v5338_v9 = vld [vmem:[%s6871_s0] ss:$0 sm:$0xff] }
 0x2b5   : > { %5822 = vmatmul.mubr.msk.bf16.vlgmr.msra.gmra.mxu0 %vm1971_vm4, %v7296_v15  ;;  %5834 = vmatmul.mubr.msk.bf16.vlgmr.msra.gmra.mxu1 %vm1971_vm4, %v7296_v15 }
 0x2b6   : > { %5838 = vmatpush3.bf16.msra.mxu0 %v6380_v11  ;;  %5850 = vmatpush3.bf16.msra.mxu1 %v7294_v13 }
 0x2b7   : > { %5839 = vmatprep.subr.bf16.mxu0 %v6634_v62  ;;  %5851 = vmatprep.subr.bf16.mxu1 %v6634_v62 }
 0x2b8   : > { %5845 = vmatprep.mubr.msk.bf16.mxu0 %vm6635_vm3, %v6634_v62  ;;  %5857 = vmatprep.mubr.msk.bf16.mxu1 %vm6635_vm3, %v6634_v62 }
 0x2ba   : > { %5840 = vmatpush3.bf16.msra.mxu0 %v6382_v17  ;;  %5852 = vmatpush3.bf16.msra.mxu1 %v7305_v18 }
 0x2bb   : > { %5841 = vmatprep.subr.bf16.mxu0 %v6634_v62  ;;  %5853 = vmatprep.subr.bf16.mxu1 %v6634_v62 }
 0x2be   : > { %5842 = vmatpush3.bf16.msra.mxu0 %v6384_v19  ;;  %5854 = vmatpush3.bf16.msra.mxu1 %v7316_v20  ;;  %v5339_v19 = vld [vmem:[%s6871_s0 + $0x1] ss:$0 sm:$0xff] }
 0x2bf   : > { %5843 = vmatprep.subr.bf16.mxu0 %v6634_v62  ;;  %5855 = vmatprep.subr.bf16.mxu1 %v6634_v62 }
 0x2c2   : > { %5844 = vmatpush3.bf16.msra.mxu0 %v6386_v21  ;;  %5856 = vmatpush3.bf16.msra.mxu1 %v7323_v22 }
 0x2c3   : > { %5861 = vmatprep.subr.bf16.mxu0 %v6634_v62  ;;  %5873 = vmatprep.subr.bf16.mxu1 %v6634_v62 }
 0x2c5   : > { %5846 = vmatmul.mubr.msk.bf16.vlgmr.msra.gmra.mxu0 %vm1971_vm4, %v7296_v15  ;;  %5858 = vmatmul.mubr.msk.bf16.vlgmr.msra.gmra.mxu1 %vm1971_vm4, %v7296_v15 }
 0x2c6   : > { %5862 = vmatpush3.bf16.msra.mxu0 %v6388_v23  ;;  %5874 = vmatpush3.bf16.msra.mxu1 %v7330_v24 }
 0x2c7   : > { %5863 = vmatprep.subr.bf16.mxu0 %v6634_v62  ;;  %5875 = vmatprep.subr.bf16.mxu1 %v6634_v62 }
 0x2c8   : > { %5869 = vmatprep.mubr.msk.bf16.mxu0 %vm6635_vm3, %v6634_v62  ;;  %5881 = vmatprep.mubr.msk.bf16.mxu1 %vm6635_vm3, %v6634_v62 }
 0x2ca   : > { %5864 = vmatpush3.bf16.msra.mxu0 %v6390_v25  ;;  %5876 = vmatpush3.bf16.msra.mxu1 %v7341_v26 }
 0x2cb   : > { %5865 = vmatprep.subr.bf16.mxu0 %v6634_v62  ;;  %5877 = vmatprep.subr.bf16.mxu1 %v6634_v62 }
 0x2ce   : > { %5866 = vmatpush3.bf16.msra.mxu0 %v6392_v27  ;;  %5878 = vmatpush3.bf16.msra.mxu1 %v7352_v28  ;;  %v5314_v27 = vld [vmem:[%s8187_s24] ss:$0 sm:$0xff] }
 0x2cf   : > { %5867 = vmatprep.subr.bf16.mxu0 %v6634_v62  ;;  %5879 = vmatprep.subr.bf16.mxu1 %v6634_v62 }
 0x2d2   : > { %5868 = vmatpush3.bf16.msra.mxu0 %v6394_v29  ;;  %5880 = vmatpush3.bf16.msra.mxu1 %v7359_v30 }
 0x2d3   : > { %5885 = vmatprep.subr.bf16.mxu0 %v6634_v62  ;;  %5897 = vmatprep.subr.bf16.mxu1 %v6634_v62 }
 0x2d5   : > { %5870 = vmatmul.mubr.msk.bf16.vlgmr.msra.gmra.mxu0 %vm1971_vm4, %v7296_v15  ;;  %5882 = vmatmul.mubr.msk.bf16.vlgmr.msra.gmra.mxu1 %vm1971_vm4, %v7296_v15 }
 0x2d6   : > { %5886 = vmatpush3.bf16.msra.mxu0 %v6396_v31  ;;  %5898 = vmatpush3.bf16.msra.mxu1 %v7366_v32 }
 0x2d7   : > { %5887 = vmatprep.subr.bf16.mxu0 %v6634_v62  ;;  %5899 = vmatprep.subr.bf16.mxu1 %v6634_v62 }
 0x2d8   : > { %5893 = vmatprep.mubr.msk.bf16.mxu0 %vm6635_vm3, %v6634_v62  ;;  %5905 = vmatprep.mubr.msk.bf16.mxu1 %vm6635_vm3, %v6634_v62 }
 0x2da   : > { %5888 = vmatpush3.bf16.msra.mxu0 %v6398_v33  ;;  %5900 = vmatpush3.bf16.msra.mxu1 %v7377_v34 }
 0x2db   : > { %5889 = vmatprep.subr.bf16.mxu0 %v6634_v62  ;;  %5901 = vmatprep.subr.bf16.mxu1 %v6634_v62 }
 0x2de   : > { %5890 = vmatpush3.bf16.msra.mxu0 %v6400_v35  ;;  %5902 = vmatpush3.bf16.msra.mxu1 %v7388_v36 }
 0x2df   : > { %5891 = vmatprep.subr.bf16.mxu0 %v6634_v62  ;;  %5903 = vmatprep.subr.bf16.mxu1 %v6634_v62 }
 0x2e2   : > { %5892 = vmatpush3.bf16.msra.mxu0 %v6402_v37  ;;  %5904 = vmatpush3.bf16.msra.mxu1 %v7395_v38 }
 0x2e3   : > { %5909 = vmatprep.subr.bf16.mxu0 %v6634_v62  ;;  %5921 = vmatprep.subr.bf16.mxu1 %v6634_v62 }
 0x2e5   : > { %5894 = vmatmul.mubr.msk.bf16.vlgmr.msra.gmra.mxu0 %vm1971_vm4, %v7296_v15  ;;  %5906 = vmatmul.mubr.msk.bf16.vlgmr.msra.gmra.mxu1 %vm1971_vm4, %v7296_v15 }
 0x2e6   : > { %5910 = vmatpush3.bf16.msra.mxu0 %v6404_v39  ;;  %5922 = vmatpush3.bf16.msra.mxu1 %v7402_v40 }
 0x2e7   : > { %5911 = vmatprep.subr.bf16.mxu0 %v6634_v62  ;;  %5923 = vmatprep.subr.bf16.mxu1 %v6634_v62 }
 0x2e8   : > { %5917 = vmatprep.mubr.msk.bf16.mxu0 %vm6635_vm3, %v6634_v62  ;;  %5929 = vmatprep.mubr.msk.bf16.mxu1 %vm6635_vm3, %v6634_v62 }
 0x2ea   : > { %5912 = vmatpush3.bf16.msra.mxu0 %v6406_v41  ;;  %5924 = vmatpush3.bf16.msra.mxu1 %v7413_v42 }
 0x2eb   : > { %5913 = vmatprep.subr.bf16.mxu0 %v6634_v62  ;;  %5925 = vmatprep.subr.bf16.mxu1 %v6634_v62 }
 0x2ee   : > { %5914 = vmatpush3.bf16.msra.mxu0 %v6408_v43  ;;  %5926 = vmatpush3.bf16.msra.mxu1 %v7424_v44 }
 0x2ef   : > { %5915 = vmatprep.subr.bf16.mxu0 %v6634_v62  ;;  %5927 = vmatprep.subr.bf16.mxu1 %v6634_v62 }
 0x2f2   : > { %5916 = vmatpush3.bf16.msra.mxu0 %v6410_v45  ;;  %5928 = vmatpush3.bf16.msra.mxu1 %v7431_v46 }
 0x2f3   : > { %5933 = vmatprep.subr.bf16.mxu0 %v6634_v62  ;;  %5945 = vmatprep.subr.bf16.mxu1 %v6634_v62 }
 0x2f5   : > { %5918 = vmatmul.mubr.msk.bf16.vlgmr.msra.gmra.mxu0 %vm1971_vm4, %v7296_v15  ;;  %5930 = vmatmul.mubr.msk.bf16.vlgmr.msra.gmra.mxu1 %vm1971_vm4, %v7296_v15 }
 0x2f6   : > { %5934 = vmatpush3.bf16.msra.mxu0 %v6412_v47  ;;  %5946 = vmatpush3.bf16.msra.mxu1 %v7438_v48  ;;  %v5315_v47 = vld [vmem:[%s8187_s24 + $0x1] ss:$0 sm:$0xff] }
 0x2f7   : > { %5935 = vmatprep.subr.bf16.mxu0 %v6634_v62  ;;  %5947 = vmatprep.subr.bf16.mxu1 %v6634_v62 }
 0x2f8   : > { %5941 = vmatprep.mubr.msk.bf16.mxu0 %vm6635_vm3, %v6634_v62  ;;  %5953 = vmatprep.mubr.msk.bf16.mxu1 %vm6635_vm3, %v6634_v62 }
 0x2fa   : > { %5936 = vmatpush3.bf16.msra.mxu0 %v6414_v49  ;;  %5948 = vmatpush3.bf16.msra.mxu1 %v7449_v50 }
 0x2fb   : > { %5937 = vmatprep.subr.bf16.mxu0 %v6634_v62  ;;  %5949 = vmatprep.subr.bf16.mxu1 %v6634_v62 }
 0x2fe   : > { %5938 = vmatpush3.bf16.msra.mxu0 %v6416_v51  ;;  %5950 = vmatpush3.bf16.msra.mxu1 %v7460_v52  ;;  %v5340_v51 = vld [vmem:[%s6871_s0 + $0x2] ss:$0 sm:$0xff] }
 0x2ff   : > { %5939 = vmatprep.subr.bf16.mxu0 %v6634_v62  ;;  %5951 = vmatprep.subr.bf16.mxu1 %v6634_v62 }
 0x302   : > { %5940 = vmatpush3.bf16.msra.mxu0 %v6418_v53  ;;  %5952 = vmatpush3.bf16.msra.mxu1 %v7467_v54  ;;  %v5341_v53 = vld [vmem:[%s6871_s0 + $0x3] ss:$0 sm:$0xff] }
 0x303   : > { %5957 = vmatprep.subr.bf16.mxu0 %v6634_v62  ;;  %5975 = vmatprep.subr.bf16.mxu1 %v6634_v62 }
 0x305   : > { %5942 = vmatmul.mubr.msk.bf16.vlgmr.msra.gmra.mxu0 %vm1971_vm4, %v7296_v15  ;;  %5954 = vmatmul.mubr.msk.bf16.vlgmr.msra.gmra.mxu1 %vm1971_vm4, %v7296_v15 }
 0x306   : > { %5959 = vmatprep.mubr.msk.bf16.mxu0 %vm6635_vm3, %v6634_v62  ;;  %5977 = vmatprep.mubr.msk.bf16.mxu1 %vm6635_vm3, %v6634_v62 }
 0x375   : > { %v2009_v55 = vpop.f32.mrf.mxu0  ;;  %v2073_v56 = vpop.f32.mrf.mxu1 }
 0x376   : > { %v2010_v41 = vadd.f32 %v5314_v27, %v2009_v55  ;;  %v5362_v27 = vld [vmem:[%s8188_s12] ss:$0 sm:$0xff] }
 0x377   : > { %v5823_v57 = vpop.f32.mrf.mxu0  ;;  %v5835_v58 = vpop.f32.mrf.mxu1 }
 0x378   : > { %v2767_v45 = vpack.c.bf16 %v2010_v41, %v2010_v41  ;;  %v2074_v57 = vadd.f32 %v5315_v47, %v2073_v56 }
 0x379   : > { %v2012_v59 = vpop.f32.mrf.mxu0  ;;  %v2076_v60 = vpop.f32.mrf.mxu1 }
 0x37b   : > { %v5824_v61 = vpop.f32.mrf.mxu0  ;;  %v5836_v0 = vpop.f32.mrf.mxu1 }
 0x385   : > { %v2137_v4 = vpop.f32.mrf.mxu0  ;;  %v2201_v8 = vpop.f32.mrf.mxu1 }
 0x387   : > { %v5847_v10 = vpop.f32.mrf.mxu0  ;;  %v5859_v12 = vpop.f32.mrf.mxu1 }
 0x388   : > { %v2768_v10 = vpack.c.bf16 %v2074_v57, %v2074_v57 }
 0x389   : > { %v2140_v14 = vpop.f32.mrf.mxu0  ;;  %v2204_v16 = vpop.f32.mrf.mxu1 }
 0x38a   : > { %v5316_v16 = vld [vmem:[%s8187_s24 + $0x2] ss:$0 sm:$0xff] }
 0x38b   : > { %v5848_v3 = vpop.f32.mrf.mxu0  ;;  %v5860_v7 = vpop.f32.mrf.mxu1 }
 0x38c   : > { %v5317_v3 = vld [vmem:[%s8187_s24 + $0x3] ss:$0 sm:$0xff] }
 0x395   : > { %v2289_v11 = vpop.f32.mrf.mxu0  ;;  %v2353_v15 = vpop.f32.mrf.mxu1 }
 0x396   : > { %v2290_v17 = vadd.f32 %v5338_v9, %v2289_v11  ;;  %v2354_v35 = vadd.f32 %v5339_v19, %v2353_v15  ;;  %v2138_v19 = vadd.f32 %v5316_v16, %v2137_v4  ;;  %v6636_v4 = vmov 65535  }
 0x397   : > { %v5871_v21 = vpop.f32.mrf.mxu0  ;;  %v5883_v23 = vpop.f32.mrf.mxu1 }
 0x398   : > { %v2771_v25 = vpack.c.bf16 %v2290_v17, %v2290_v17  ;;  %v2772_v43 = vpack.c.bf16 %v2354_v35, %v2354_v35  ;;  %v2202_v21 = vadd.f32 %v5317_v3, %v2201_v8  ;;  %v2769_v23 = vpack.c.bf16 %v2138_v19, %v2138_v19 }
 0x399   : > { %v2292_v29 = vpop.f32.mrf.mxu0  ;;  %v2356_v31 = vpop.f32.mrf.mxu1  ;;  %v3023_v8 = vsel %vm3021_vm6, 4294967295, %v6636_v4 }
 0x39a   : > { %v2780_v33 = vsel %vm2775_vm5, %v2771_v25, 0  ;;  %v2826_v49 = vsel %vm2775_vm5, %v2772_v43, 0  ;;  %v2770_v25 = vpack.c.bf16 %v2202_v21, %v2202_v21  ;;  %v7508_v29 = vld [vmem:[%s8188_s12 + $0x1] ss:$0 sm:$0xff] }
 0x39b   : > { %v5872_v37 = vpop.f32.mrf.mxu0  ;;  %v5884_v39 = vpop.f32.mrf.mxu1  ;;  %5958 = vmatpush3.bf16.xpose.msra.mxu0 %v2780_v33 }
 0x39c   : > { %5963 = vmatprep.subr.bf16.mxu0 %v6634_v62  ;;  %v7515_v39 = vsel %vm3022_vm7, %v3023_v8, 0 }
 0x3a2   : > { %5960 = vmatmul.mubr.msk.bf16.vlgmr.msra.gmra.mxu0 %vm2775_vm5, %v2767_v45 }
 0x3a3   : > { %5964 = vmatpush3.bf16.xpose.msra.mxu0 %v2826_v49  ;;  %5965 = vmatprep.mubr.msk.bf16.mxu0 %vm6635_vm3, %v6634_v62 }
 0x3a4   : > { %5969 = vmatprep.subr.bf16.mxu0 %v6634_v62 }
 0x3a5   : > { %v2417_v55 = vpop.f32.mrf.mxu0  ;;  %v2481_v58 = vpop.f32.mrf.mxu1 }
 0x3a6   : > { %v2418_v59 = vadd.f32 %v5340_v51, %v2417_v55  ;;  %v2482_v60 = vadd.f32 %v5341_v53, %v2481_v58 }
 0x3a7   : > { %v5895_v61 = vpop.f32.mrf.mxu0  ;;  %v5907_v0 = vpop.f32.mrf.mxu1 }
 0x3a8   : > { %v2773_v12 = vpack.c.bf16 %v2418_v59, %v2418_v59  ;;  %v2774_v14 = vpack.c.bf16 %v2482_v60, %v2482_v60 }
 0x3a9   : > { %v2420_v7 = vpop.f32.mrf.mxu0  ;;  %v2484_v9 = vpop.f32.mrf.mxu1 }
 0x3aa   : > { %v2872_v11 = vsel %vm2775_vm5, %v2773_v12, 0  ;;  %v2918_v15 = vsel %vm2775_vm5, %v2774_v14, 0  ;;  %5966 = vmatmul.mubr.msk.bf16.vlgmr.msra.gmra.mxu0 %vm2775_vm5, %v2768_v10 }
 0x3ab   : > { %v5896_v56 = vpop.f32.mrf.mxu0  ;;  %v5908_v17 = vpop.f32.mrf.mxu1  ;;  %5970 = vmatpush3.bf16.xpose.msra.mxu0 %v2872_v11  ;;  %5976 = vmatpush3.bf16.xpose.msra.mxu1 %v2918_v15 }
 0x3ac   : > { %5971 = vmatprep.mubr.msk.bf16.mxu0 %vm6635_vm3, %v6634_v62  ;;  %5981 = vmatprep.subr.bf16.mxu0 %v6634_v62 }
 0x3ad   : > { %5987 = vmatprep.subr.bf16.mxu1 %v6634_v62 }
 0x3b2   : > { %5972 = vmatmul.mubr.msk.bf16.vlgmr.msra.gmra.mxu0 %vm2775_vm5, %v2769_v23  ;;  %5978 = vmatmul.mubr.msk.bf16.vlgmr.msra.gmra.mxu1 %vm2775_vm5, %v2770_v25 }
 0x3b3   : > { %5983 = vmatprep.mubr.msk.bf16.mxu0 %vm6635_vm3, %v6634_v62  ;;  %5989 = vmatprep.mubr.msk.bf16.mxu1 %vm6635_vm3, %v6634_v62 }
 0x3b5   : > { %v2569_v31 = vpop.f32.mrf.mxu0  ;;  %v2633_v33 = vpop.f32.mrf.mxu1 }
 0x3b6   : > { %v2570_v35 = vadd.f32 %v5362_v27, %v2569_v31  ;;  %v2634_v37 = vadd.f32 %v7508_v29, %v2633_v33 }
 0x3b7   : > { %v5919_v41 = vpop.f32.mrf.mxu0  ;;  %v5931_v43 = vpop.f32.mrf.mxu1 }
 0x3b8   : > { %v3013_v45 = vpack.c.bf16 %v2570_v35, %v2570_v35  ;;  %v3014_v47 = vpack.c.bf16 %v2634_v37, %v2634_v37 }
 0x3b9   : > { %v2572_v49 = vpop.f32.mrf.mxu0  ;;  %v2636_v51 = vpop.f32.mrf.mxu1 }
 0x3ba   : > { %v3026_v53 = vand.u32 %v7515_v39, %v3013_v45  ;;  %v3072_v57 = vand.u32 %v7515_v39, %v3014_v47 }
 0x3bb   : > { %v5920_v55 = vpop.f32.mrf.mxu0  ;;  %v5932_v58 = vpop.f32.mrf.mxu1 }
 0x3bc   : > { %5982 = vmatpush3.bf16.msra.mxu0 %v3026_v53  ;;  %5988 = vmatpush3.bf16.msra.mxu1 %v3072_v57 }
 0x3bd   : > { %5993 = vmatprep.subr.bf16.mxu0 %v6634_v62  ;;  %5999 = vmatprep.subr.bf16.mxu1 %v6634_v62 }
 0x3c5   : > { %v7521_v59 = vpop.f32.mrf.mxu0  ;;  %v7523_v60 = vpop.f32.mrf.mxu1 }
 0x3c7   : > { %v5943_v61 = vpop.f32.mrf.mxu0  ;;  %v5955_v0 = vpop.f32.mrf.mxu1 }
 0x3c9   : > { %v2700_v10 = vpop.f32.mrf.mxu0  ;;  %v2764_v12 = vpop.f32.mrf.mxu1 }
 0x3cb   : > { %v5944_v14 = vpop.f32.mrf.mxu0  ;;  %v5956_v16 = vpop.f32.mrf.mxu1 }
 0x462   : > { %v2816_v3 = vpop.f32.mrf.mxu0 }
 0x463   : > { %v2960_v7 = vmul.f32 0.25, %v2816_v3 }
 0x464   : > { %v5961_v9 = vpop.f32.mrf.mxu0 }
 0x465   : > { %v2965_v11 = vsel %vm2964_vm8, %v2960_v7, -inf }
 0x466   : > { %2966 = vmax.xlane.f32.xlu1 %v2965_v11  ;;  %v2819_v15 = vpop.f32.mrf.mxu0 }
 0x468   : > { %v5962_v56 = vpop.f32.mrf.mxu0 }
 0x46a   : > { %v2862_v17 = vpop.f32.mrf.mxu0 }
 0x46b   : > { %v2961_v19 = vmul.f32 0.25, %v2862_v17 }
 0x46c   : > { %v5967_v21 = vpop.f32.mrf.mxu0 }
 0x46d   : > { %v2968_v23 = vsel %vm2964_vm8, %v2961_v19, -inf }
 0x46e   : > { %2969 = vmax.xlane.f32.xlu1 %v2968_v23  ;;  %v2865_v25 = vpop.f32.mrf.mxu0 }
 0x470   : > { %v5968_v27 = vpop.f32.mrf.mxu0 }
 0x471   : > { %v7534_v27 = vld [vmem:[%s8188_s12 + $0x2] ss:$0 sm:$0xff] }
 0x472   : > { %v2908_v4 = vpop.f32.mrf.mxu0  ;;  %v2954_v8 = vpop.f32.mrf.mxu1 }
 0x473   : > { %v2962_v31 = vmul.f32 0.25, %v2908_v4  ;;  %v2963_v33 = vmul.f32 0.25, %v2954_v8  ;;  %v2698_v8 = vadd.f32 %v7534_v27, %v7521_v59 }
 0x474   : > { %v5973_v35 = vpop.f32.mrf.mxu0  ;;  %v5979_v37 = vpop.f32.mrf.mxu1 }
 0x475   : > { %v2974_v41 = vsel %vm2964_vm8, %v2963_v33, -inf  ;;  %v2971_v43 = vsel %vm2964_vm8, %v2962_v31, -inf  ;;  %v7539_v35 = vld [vmem:[%s8188_s12 + $0x3] ss:$0 sm:$0xff] }
 0x476   : > { %v2957_v45 = vpop.f32.mrf.mxu1  ;;  %2975 = vmax.xlane.f32.xlu1 %v2974_v41  ;;  %2972 = vmax.xlane.f32.xlu0 %v2971_v43  ;;  %v2911_v47 = vpop.f32.mrf.mxu0 }
 0x478   : > { %v5974_v49 = vpop.f32.mrf.mxu0  ;;  %v5980_v51 = vpop.f32.mrf.mxu1 }
 0x479   : > { %v2762_v49 = vadd.f32 %v7539_v35, %v7523_v60 }
 0x47b   : > { %v3016_v51 = vpack.c.bf16 %v2762_v49, %v2762_v49 }
 0x4ef   : > { %v2967_v53 = vpop.xlane.xlu1 %2966 }
 0x4f0   : > { %v2977_v57 = vsub.f32 %v2960_v7, %v2967_v53 }
 0x4f2   : > { %v2981_v55 = vmul.f32 1.442695, %v2977_v57 }
 0x4f4   : > { %6454 = vpow2.f32 %v2981_v55  ;;  %v3164_v55 = vand.u32 %v7515_v39, %v3016_v51 }
 0x4f7   : > { %v2970_v58 = vpop.xlane.xlu1 %2969 }
 0x4f8   : > { %v2978_v61 = vsub.f32 %v2961_v19, %v2970_v58 }
 0x4fa   : > { %v2983_v0 = vmul.f32 1.442695, %v2978_v61 }
 0x4fc   : > { %6456 = vpow2.f32 %v2983_v0 }
 0x4ff   : > { %v2976_v10 = vpop.xlane.xlu1 %2975  ;;  %v2973_v12 = vpop.xlane.xlu0 %2972 }
 0x500   : > { %v2980_v14 = vsub.f32 %v2963_v33, %v2976_v10  ;;  %v2979_v16 = vsub.f32 %v2962_v31, %v2973_v12  ;;  %v3015_v33 = vpack.c.bf16 %v2698_v8, %v2698_v8 }
 0x501   : > { %v6455_v3 = vpop.eup %6454 }
 0x502   : > { %v2987_v9 = vmul.f32 1.442695, %v2980_v14  ;;  %v2985_v11 = vmul.f32 1.442695, %v2979_v16  ;;  %v2989_v15 = vsel %vm2964_vm8, %v6455_v3, 0.0  ;;  %v3118_v47 = vand.u32 %v7515_v39, %v3015_v33  ;;  %v7560_v14 = vld [vmem:[%s6887_s8] sm:$0xff]  }
 0x503   : > { %2990 = vadd.xlane.f32.xlu0 %v2989_v15  ;;  %v7565_v16 = vld [vmem:[%s6887_s8 + $0x8] sm:$0xff]  }
 0x504   : > { %6458 = vpow2.f32 %v2987_v9  ;;  %v7570_v9 = vld [vmem:[%s6887_s8 + $0x10] sm:$0xff]  }
 0x505   : > { %6460 = vpow2.f32 %v2985_v11 }
 0x509   : > { %v6457_v7 = vpop.eup %6456 }
 0x50a   : > { %v2992_v56 = vsel %vm2964_vm8, %v6457_v7, 0.0 }
 0x50b   : > { %2993 = vadd.xlane.f32.xlu1 %v2992_v56 }
 0x511   : > { %v6459_v17 = vpop.eup %6458 }
 0x512   : > { %v6461_v19 = vpop.eup %6460  ;;  %v2998_v21 = vsel %vm2964_vm8, %v6459_v17, 0.0 }
 0x513   : > { %2999 = vadd.xlane.f32.xlu1 %v2998_v21  ;;  %v2995_v23 = vsel %vm2964_vm8, %v6461_v19, 0.0 }
 0x514   : > { %2996 = vadd.xlane.f32.xlu0 %v2995_v23 }
 0x58c   : > { %v2991_v25 = vpop.xlane.xlu0 %2990 }
 0x58d   : > { %6462 = vrcp.f32 %v2991_v25 }
 0x594   : > { %v2994_v4 = vpop.xlane.xlu1 %2993 }
 0x595   : > { %6464 = vrcp.f32 %v2994_v4 }
 0x59a   : > { %v6463_v31 = vpop.eup %6462 }
 0x59b   : > { %v3005_v37 = vmul.f32 %v6463_v31, %v6455_v3 }
 0x59c   : > { %v3000_v41 = vpop.xlane.xlu1 %2999 }
 0x59d   : > { %6466 = vrcp.f32 %v3000_v41  ;;  %v2997_v43 = vpop.xlane.xlu0 %2996  ;;  %v3009_v45 = vpack.c.bf16 %v3005_v37, %v3005_v37 }
 0x59e   : > { %6468 = vrcp.f32 %v2997_v43 }
 0x59f   : > { %5984 = vmatmul.mubr.msk.bf16.vlgmr.msra.gmra.mxu0 %vm3017_vm9, %v3009_v45 }
 0x5a0   : > { %5994 = vmatpush3.bf16.msra.mxu0 %v3118_v47  ;;  %5995 = vmatprep.mubr.msk.bf16.mxu0 %vm6635_vm3, %v6634_v62 }
 0x5a1   : > { %6005 = vmatprep.subr.bf16.mxu0 %v6634_v62 }
 0x5a2   : > { %v6465_v59 = vpop.eup %6464 }
 0x5a3   : > { %v3006_v53 = vmul.f32 %v6465_v59, %v6457_v7 }
 0x5a5   : > { %v3010_v57 = vpack.c.bf16 %v3006_v53, %v3006_v53 }
 0x5a7   : > { %5990 = vmatmul.mubr.msk.bf16.vlgmr.msra.gmra.mxu1 %vm3017_vm9, %v3010_v57 }
 0x5a8   : > { %6000 = vmatpush3.bf16.msra.mxu1 %v3164_v55  ;;  %6001 = vmatprep.mubr.msk.bf16.mxu1 %vm6635_vm3, %v6634_v62 }
 0x5a9   : > { %6011 = vmatprep.subr.bf16.mxu1 %v6634_v62 }
 0x5aa   : > { %v6467_v60 = vpop.eup %6466 }
 0x5ab   : > { %v6469_v58 = vpop.eup %6468  ;;  %v3008_v61 = vmul.f32 %v6467_v60, %v6459_v17 }
 0x5ac   : > { %v3007_v0 = vmul.f32 %v6469_v58, %v6461_v19  ;;  %v7577_v19 = vld [vmem:[%s6887_s8 + $0x18] sm:$0xff]  }
 0x5ad   : > { %v3012_v10 = vpack.c.bf16 %v3008_v61, %v3008_v61 }
 0x5ae   : > { %v3011_v12 = vpack.c.bf16 %v3007_v0, %v3007_v0 }
 0x5af   : > { %6002 = vmatmul.mubr.msk.bf16.vlgmr.msra.gmra.mxu1 %vm3017_vm9, %v3012_v10 }
 0x5b0   : > { %5996 = vmatmul.mubr.msk.bf16.vlgmr.msra.gmra.mxu0 %vm3017_vm9, %v3011_v12  ;;  %6013 = vmatprep.mubr.msk.bf16.mxu1 %vm6635_vm3, %v6634_v62 }
 0x5b1   : > { %6007 = vmatprep.mubr.msk.bf16.mxu0 %vm6635_vm3, %v6634_v62  ;;  %6006 = vmatpush3.bf16.msra.mxu0 %v7560_v14 }
 0x5b2   : > { %6017 = vmatprep.subr.bf16.mxu0 %v6634_v62  ;;  %6012 = vmatpush3.bf16.msra.mxu1 %v7565_v16 }
 0x5b3   : > { %6023 = vmatprep.subr.bf16.mxu1 %v6634_v62 }
 0x65f   : > { %v3062_v3 = vpop.f32.mrf.mxu0 }
 0x660   : > { %v3206_v11 = vpack.c.bf16 %v3062_v3, %v3062_v3 }
 0x661   : > { %v5985_v15 = vpop.f32.mrf.mxu0 }
 0x662   : > { %6008 = vmatmul.mubr.msk.bf16.vlgmr.msra.gmra.mxu0 %vm2775_vm5, %v3206_v11 }
 0x663   : > { %v3065_v7 = vpop.f32.mrf.mxu0  ;;  %6018 = vmatpush3.bf16.msra.mxu0 %v7570_v9  ;;  %6019 = vmatprep.mubr.msk.bf16.mxu0 %vm6635_vm3, %v6634_v62 }
 0x665   : > { %v5986_v56 = vpop.f32.mrf.mxu0 }
 0x667   : > { %v3108_v17 = vpop.f32.mrf.mxu1 }
 0x668   : > { %v3207_v21 = vpack.c.bf16 %v3108_v17, %v3108_v17 }
 0x669   : > { %v5991_v23 = vpop.f32.mrf.mxu1 }
 0x66a   : > { %6014 = vmatmul.mubr.msk.bf16.vlgmr.msra.gmra.mxu1 %vm2775_vm5, %v3207_v21  ;;  %v5402_v23 = vld [vmem:[%s6893_s29] ss:$0 sm:$0xff] }
 0x66b   : > { %v3111_v25 = vpop.f32.mrf.mxu1  ;;  %6024 = vmatpush3.bf16.msra.mxu1 %v7577_v19  ;;  %6025 = vmatprep.mubr.msk.bf16.mxu1 %vm6635_vm3, %v6634_v62 }
 0x66d   : > { %v5992_v4 = vpop.f32.mrf.mxu1 }
 0x66f   : > { %v3200_v8 = vpop.f32.mrf.mxu1 }
 0x670   : > { %v3154_v31 = vpop.f32.mrf.mxu0  ;;  %v3209_v33 = vpack.c.bf16 %v3200_v8, %v3200_v8 }
 0x671   : > { %v3208_v37 = vpack.c.bf16 %v3154_v31, %v3154_v31  ;;  %v6003_v41 = vpop.f32.mrf.mxu1 }
 0x672   : > { %v5997_v43 = vpop.f32.mrf.mxu0  ;;  %6026 = vmatmul.mubr.msk.bf16.vlgmr.msra.gmra.mxu1 %vm2775_vm5, %v3209_v33 }
 0x673   : > { %6020 = vmatmul.mubr.msk.bf16.vlgmr.msra.gmra.mxu0 %vm2775_vm5, %v3208_v37  ;;  %v3203_v45 = vpop.f32.mrf.mxu1  ;;  %v6500_v43 = vld [vmem:[#allocation2] sm:$0x1f] }
 0x674   : > { %v3157_v47 = vpop.f32.mrf.mxu0 }
 0x675   : > { %v6004_v49 = vpop.f32.mrf.mxu1  ;;  %v3702_v47 = vld [vmem:[#allocation2 + $0x8] sm:$0x1f] }
 0x676   : > { %v5998_v59 = vpop.f32.mrf.mxu0 }
 0x677   : > { %v3703_v59 = vsel %vm1893_vm2, %v3702_v47, 0.0 }
 0x722   : > { %v3253_v51 = vpop.f32.mrf.mxu0 }
 0x723   : > { %v3406_v12 = vsel %vm1893_vm2, %v3253_v51, 0.0 }
 0x724   : > { %v6009_v53 = vpop.f32.mrf.mxu0 }
 0x726   : > { %v3256_v57 = vpop.f32.mrf.mxu0 }
 0x728   : > { %v6010_v55 = vpop.f32.mrf.mxu0 }
 0x72a   : > { %v3302_v60 = vpop.f32.mrf.mxu1 }
 0x72b   : > { %v3407_v0 = vsel %vm1893_vm2, %v3302_v60, 0.0 }
 0x72c   : > { %v6015_v58 = vpop.f32.mrf.mxu1  ;;  %v3408_v11 = vadd.f32 %v3407_v0, %v3406_v12 }
 0x72e   : > { %v3305_v61 = vpop.f32.mrf.mxu1 }
 0x730   : > { %v6016_v10 = vpop.f32.mrf.mxu1 }
 0x732   : > { %v3400_v3 = vpop.f32.mrf.mxu1 }
 0x733   : > { %v3351_v15 = vpop.f32.mrf.mxu0  ;;  %v3411_v25 = vsel %vm1893_vm2, %v3400_v3, 0.0  ;;  %v7599_v3 = vld [vmem:[%s6908_s7 + $0x34] ss:$8 sps:$4 sm:$0xff]  }
 0x734   : > { %v3409_v7 = vsel %vm1893_vm2, %v3351_v15, 0.0  ;;  %v6027_v56 = vpop.f32.mrf.mxu1  ;;  %3511 = vmatprep.subr.bf16.mxu0 %v7599_v3  ;;  %v7607_v15 = vld [vmem:[%s6908_s7 + $0x24] ss:$8 sps:$4 sm:$0xff]  }
 0x735   : > { %v3410_v17 = vadd.f32 %v3409_v7, %v3408_v11  ;;  %v6021_v21 = vpop.f32.mrf.mxu0  ;;  %v7602_v11 = vld [vmem:[%s6908_s7 + $0x30] ss:$8 sps:$4 sm:$0xff]   ;;  %v7610_v7 = vld [vmem:[%s6908_s7 + $0x20] ss:$8 sps:$4 sm:$0xff]   ;;  %v7615_v56 = vld [vmem:[%s6908_s7 + $0x14] ss:$8 sps:$4 sm:$0xff]  }
 0x736   : > { %v3403_v4 = vpop.f32.mrf.mxu1  ;;  %3512 = vmatpush1.bf16.msra.mxu0 %v7602_v11  ;;  %v7623_v21 = vld [vmem:[%s6908_s7 + $0x4] ss:$8 sps:$4 sm:$0xff]  }
 0x737   : > { %v3412_v8 = vadd.f32 %v3411_v25, %v3410_v17  ;;  %v3354_v31 = vpop.f32.mrf.mxu0  ;;  %3513 = vmatprep.subr.bf16.mxu0 %v7607_v15  ;;  %v7618_v17 = vld [vmem:[%s6908_s7 + $0x10] ss:$8 sps:$4 sm:$0xff]   ;;  %v6637_v25 = vmov 0  }
 0x738   : > { %v6028_v33 = vpop.f32.mrf.mxu1  ;;  %3535 = vmatprep.mubr.bf16.mxu0 %v6637_v25 }
 0x739   : > { %v3419_v37 = vadd.f32 %v5402_v23, %v3412_v8  ;;  %v6022_v41 = vpop.f32.mrf.mxu0  ;;  %v7626_v23 = vld [vmem:[%s6908_s7] ss:$8 sps:$4 sm:$0xff]  }
 0x73a   : > { %3514 = vmatpush1.bf16.msra.mxu0 %v7610_v7 }
 0x73b   : > { %v7590_v45 = vadd.f32 %v6500_v43, %v3419_v37  ;;  %3515 = vmatprep.subr.bf16.mxu0 %v7615_v56  ;;  %v7633_v43 = vld [vmem:[%s6918_s20 + $0x78] sm:$0xff]  }
 0x73c   : > { %5685 = vmatprep.subr.bf16.mxu1 %v7633_v43 }
 0x73d   : > { %v3421_v49 = vsel %vm1893_vm2, %v7590_v45, 0.0 }
 0x73e   : > { %3422 = vadd.xlane.f32.xlu0 %v3421_v49  ;;  %3516 = vmatpush1.bf16.msra.mxu0 %v7618_v17  ;;  %v7639_v49 = vld [vmem:[%s6918_s20 + $0x70] sm:$0xff]  }
 0x73f   : > { %3517 = vmatprep.subr.bf16.mxu0 %v7623_v21 }
 0x742   : > { %3704 = vadd.xlane.f32.xlu0 %v3703_v59  ;;  %3518 = vmatpush1.bf16.msra.mxu0 %v7626_v23 }
 0x743   : > { %6029 = vmatprep.subr.bf16.mxu0 %v6634_v62 }
 0x7c7   : > { %v3423_v51 = vpop.xlane.xlu0 %3422 }
 0x7c8   : > { %v3424_v53 = vmul.f32 0.015625, %v3423_v51  ;;  %v7649_v51 = vld [vmem:[%s8189_s23] ss:$0 sm:$0xff] }
 0x7ca   : > { %v3425_v57 = vsub.f32 %v7590_v45, %v3424_v53 }
 0x7cb   : > { %v3705_v55 = vpop.xlane.xlu0 %3704 }
 0x7cc   : > { %v3426_v60 = vmul.f32 %v3425_v57, %v3425_v57  ;;  %v3706_v58 = vmul.f32 0.015625, %v3705_v55  ;;  %v7656_v55 = vld [vmem:[%s8191_s21] ss:$0 sm:$0xff] }
 0x7ce   : > { %v3427_v61 = vsel %vm1893_vm2, %v3426_v60, 0.0  ;;  %v3707_v0 = vsub.f32 %v3702_v47, %v3706_v58  ;;  %v7636_v47 = vld [vmem:[%s6918_s20 + $0x38] sm:$0xff]  }
 0x7cf   : > { %3428 = vadd.xlane.f32.xlu1 %v3427_v61  ;;  %5686 = vmatpush3.bf16.msra.mxu1 %v7636_v47 }
 0x7d0   : > { %v3708_v10 = vmul.f32 %v3707_v0, %v3707_v0  ;;  %5687 = vmatprep.subr.bf16.mxu1 %v7639_v49 }
 0x7d2   : > { %v3709_v12 = vsel %vm1893_vm2, %v3708_v10, 0.0 }
 0x7d3   : > { %3710 = vadd.xlane.f32.xlu1 %v3709_v12 }
 0x858   : > { %v3429_v4 = vpop.xlane.xlu1 %3428 }
 0x859   : > { %v3430_v8 = vmul.f32 0.015625, %v3429_v4  ;;  %v6501_v4 = vld [vmem:[%s6855_s19 + $0x18] sm:$0xff]  }
 0x85b   : > { %v3431_v31 = vadd.f32 1e-06, %v3430_v8 }
 0x85c   : > { %v3711_v33 = vpop.xlane.xlu1 %3710 }
 0x85d   : > { %6470 = vrsqrt.f32 %v3431_v31  ;;  %v3712_v37 = vmul.f32 0.015625, %v3711_v33 }
 0x85f   : > { %v3713_v41 = vadd.f32 1e-06, %v3712_v37 }
 0x861   : > { %6472 = vrsqrt.f32 %v3713_v41 }
 0x86a   : > { %v6471_v59 = vpop.eup %6470 }
 0x86b   : > { %v3433_v53 = vmul.f32 %v6471_v59, %v3425_v57 }
 0x86d   : > { %v3440_v60 = vmul.f32 %v7649_v51, %v3433_v53 }
 0x86e   : > { %v6473_v61 = vpop.eup %6472 }
 0x86f   : > { %v3447_v58 = vadd.f32 %v7656_v55, %v3440_v60  ;;  %v3715_v12 = vmul.f32 %v6473_v61, %v3707_v0 }
 0x871   : > { %v3448_v10 = vpack.c.bf16 %v3447_v58, %v3447_v58  ;;  %v3716_v57 = vmul.f32 %v7281_v1, %v3715_v12  ;;  %v6504_v1 = vld [vmem:[%s6855_s19 + $0x28] sm:$0xff]  }
 0x873   : > { %5413 = vmatmul.mubr.msk.bf16.vlgmr.msra.gmra.mxu0 %vm1971_vm4, %v3448_v10  ;;  %v3717_v0 = vadd.f32 %v7288_v5, %v3716_v57  ;;  %v7712_v5 = vld [vmem:[%s6918_s20 + $0x30] sm:$0xff]  }
 0x874   : > { %6030 = vmatpush3.bf16.msra.mxu0 %v6501_v4  ;;  %6037 = vmatprep.mubr.msk.bf16.mxu0 %vm6635_vm3, %v6634_v62 }
 0x875   : > { %6031 = vmatprep.subr.bf16.mxu0 %v6634_v62  ;;  %v7671_v8 = vpack.c.bf16 %v3717_v0, %v3717_v0  ;;  %5688 = vmatpush3.bf16.msra.mxu1 %v7712_v5 }
 0x878   : > { %6032 = vmatpush3.bf16.msra.mxu0 %v7252_v63  ;;  %v6502_v63 = vld [vmem:[%s6855_s19 + $0x38] sm:$0xff]  }
 0x879   : > { %6033 = vmatprep.subr.bf16.mxu0 %v6634_v62 }
 0x87c   : > { %6034 = vmatpush3.bf16.msra.mxu0 %v7259_v2  ;;  %v6503_v2 = vld [vmem:[%s6855_s19 + $0x30] sm:$0xff]  }
 0x87d   : > { %6035 = vmatprep.subr.bf16.mxu0 %v6634_v62 }
 0x880   : > { %6036 = vmatpush3.bf16.msra.mxu0 %v7266_v6  ;;  %v6505_v6 = vld [vmem:[%s6855_s19 + $0x20] sm:$0xff]  }
 0x881   : > { %6041 = vmatprep.subr.bf16.mxu0 %v6634_v62 }
 0x883   : > { %6038 = vmatmul.mubr.msk.bf16.vlgmr.msra.gmra.mxu0 %vm1971_vm4, %v7671_v8 }
 0x884   : > { %6042 = vmatpush3.bf16.msra.mxu0 %v6502_v63  ;;  %6049 = vmatprep.mubr.msk.bf16.mxu0 %vm6635_vm3, %v6634_v62 }
 0x885   : > { %6043 = vmatprep.subr.bf16.mxu0 %v6634_v62 }
 0x888   : > { %6044 = vmatpush3.bf16.msra.mxu0 %v6503_v2 }
 0x889   : > { %6045 = vmatprep.subr.bf16.mxu0 %v6634_v62 }
 0x88c   : > { %6046 = vmatpush3.bf16.msra.mxu0 %v6504_v1 }
 0x88d   : > { %6047 = vmatprep.subr.bf16.mxu0 %v6634_v62 }
 0x890   : > { %6048 = vmatpush3.bf16.msra.mxu0 %v6505_v6 }
 0x891   : > { %6065 = vmatprep.subr.bf16.mxu0 %v6634_v62 }
 0x893   : > { %6050 = vmatmul.mubr.msk.bf16.vlgmr.msra.gmra.mxu0 %vm1971_vm4, %v7671_v8 }
 0x894   : > { %6066 = vmatpush3.bf16.msra.mxu0 %v7294_v13  ;;  %6073 = vmatprep.mubr.msk.bf16.mxu0 %vm6635_vm3, %v6634_v62  ;;  %v7722_v13 = vld [vmem:[%s6918_s20 + $0x68] sm:$0xff]  }
 0x895   : > { %6067 = vmatprep.subr.bf16.mxu0 %v6634_v62  ;;  %5689 = vmatprep.subr.bf16.mxu1 %v7722_v13 }
 0x898   : > { %6068 = vmatpush3.bf16.msra.mxu0 %v7305_v18  ;;  %v7725_v18 = vld [vmem:[%s6918_s20 + $0x28] sm:$0xff]  }
 0x899   : > { %6069 = vmatprep.subr.bf16.mxu0 %v6634_v62  ;;  %5690 = vmatpush3.bf16.msra.mxu1 %v7725_v18 }
 0x89c   : > { %6070 = vmatpush3.bf16.msra.mxu0 %v7316_v20  ;;  %v7732_v20 = vld [vmem:[%s6918_s20 + $0x60] sm:$0xff]  }
 0x89d   : > { %6071 = vmatprep.subr.bf16.mxu0 %v6634_v62  ;;  %5691 = vmatprep.subr.bf16.mxu1 %v7732_v20 }
 0x8a0   : > { %6072 = vmatpush3.bf16.msra.mxu0 %v7323_v22  ;;  %v7735_v22 = vld [vmem:[%s6918_s20 + $0x20] sm:$0xff]  }
 0x8a1   : > { %6089 = vmatprep.subr.bf16.mxu0 %v6634_v62  ;;  %5692 = vmatpush3.bf16.msra.mxu1 %v7735_v22 }
 0x8a3   : > { %6074 = vmatmul.mubr.msk.bf16.vlgmr.msra.gmra.mxu0 %vm1971_vm4, %v7671_v8 }
 0x8a4   : > { %6090 = vmatpush3.bf16.msra.mxu0 %v7330_v24  ;;  %6097 = vmatprep.mubr.msk.bf16.mxu0 %vm6635_vm3, %v6634_v62  ;;  %v7742_v24 = vld [vmem:[%s6918_s20 + $0x58] sm:$0xff]  }
 0x8a5   : > { %6091 = vmatprep.subr.bf16.mxu0 %v6634_v62  ;;  %5693 = vmatprep.subr.bf16.mxu1 %v7742_v24 }
 0x8a8   : > { %6092 = vmatpush3.bf16.msra.mxu0 %v7341_v26  ;;  %v7745_v26 = vld [vmem:[%s6918_s20 + $0x18] sm:$0xff]  }
 0x8a9   : > { %6093 = vmatprep.subr.bf16.mxu0 %v6634_v62  ;;  %5694 = vmatpush3.bf16.msra.mxu1 %v7745_v26 }
 0x8ac   : > { %6094 = vmatpush3.bf16.msra.mxu0 %v7352_v28  ;;  %v7752_v28 = vld [vmem:[%s6918_s20 + $0x50] sm:$0xff]  }
 0x8ad   : > { %6095 = vmatprep.subr.bf16.mxu0 %v6634_v62  ;;  %5695 = vmatprep.subr.bf16.mxu1 %v7752_v28 }
 0x8b0   : > { %6096 = vmatpush3.bf16.msra.mxu0 %v7359_v30  ;;  %v7755_v30 = vld [vmem:[%s6918_s20 + $0x10] sm:$0xff]  }
 0x8b1   : > { %6113 = vmatprep.subr.bf16.mxu0 %v6634_v62  ;;  %5696 = vmatpush3.bf16.msra.mxu1 %v7755_v30 }
 0x8b3   : > { %6098 = vmatmul.mubr.msk.bf16.vlgmr.msra.gmra.mxu0 %vm1971_vm4, %v7671_v8 }
 0x8b4   : > { %6114 = vmatpush3.bf16.msra.mxu0 %v7366_v32  ;;  %6121 = vmatprep.mubr.msk.bf16.mxu0 %vm6635_vm3, %v6634_v62  ;;  %v7766_v32 = vld [vmem:[%s6918_s20 + $0x48] sm:$0xff]  }
 0x8b5   : > { %6115 = vmatprep.subr.bf16.mxu0 %v6634_v62  ;;  %5697 = vmatprep.subr.bf16.mxu1 %v7766_v32 }
 0x8b8   : > { %6116 = vmatpush3.bf16.msra.mxu0 %v7377_v34  ;;  %v7769_v34 = vld [vmem:[%s6918_s20 + $0x8] sm:$0xff]  }
 0x8b9   : > { %6117 = vmatprep.subr.bf16.mxu0 %v6634_v62  ;;  %5698 = vmatpush3.bf16.msra.mxu1 %v7769_v34 }
 0x8bc   : > { %6118 = vmatpush3.bf16.msra.mxu0 %v7388_v36  ;;  %v7776_v36 = vld [vmem:[%s6918_s20 + $0x40] sm:$0xff]  }
 0x8bd   : > { %6119 = vmatprep.subr.bf16.mxu0 %v6634_v62  ;;  %5699 = vmatprep.subr.bf16.mxu1 %v7776_v36 }
 0x8c0   : > { %6120 = vmatpush3.bf16.msra.mxu0 %v7395_v38  ;;  %v7779_v38 = vld [vmem:[%s6918_s20] sm:$0xff]  }
 0x8c1   : > { %6137 = vmatprep.subr.bf16.mxu0 %v6634_v62  ;;  %5700 = vmatpush3.bf16.msra.mxu1 %v7779_v38 }
 0x8c2   : > { %6053 = vmatprep.subr.bf16.mxu1 %v6634_v62 }
 0x8c3   : > { %6122 = vmatmul.mubr.msk.bf16.vlgmr.msra.gmra.mxu0 %vm1971_vm4, %v7671_v8 }
 0x8c4   : > { %6138 = vmatpush3.bf16.msra.mxu0 %v7402_v40  ;;  %6145 = vmatprep.mubr.msk.bf16.mxu0 %vm6635_vm3, %v6634_v62  ;;  %v3450_v40 = vlaneseq }
 0x8c5   : > { %6139 = vmatprep.subr.bf16.mxu0 %v6634_v62 }
 0x8c8   : > { %6140 = vmatpush3.bf16.msra.mxu0 %v7413_v42  ;;  %v3451_v42 = vshrl.u32 %v3450_v40, 7 }
 0x8c9   : > { %6141 = vmatprep.subr.bf16.mxu0 %v6634_v62 }
 0x8cc   : > { %6142 = vmatpush3.bf16.msra.mxu0 %v7424_v44  ;;  %v3452_v44 = vsub.s32 0, %v3451_v42 }
 0x8cd   : > { %6143 = vmatprep.subr.bf16.mxu0 %v6634_v62 }
 0x8d0   : > { %6144 = vmatpush3.bf16.msra.mxu0 %v7431_v46  ;;  %v1858_v46 = vld [vmem:[%s6913_s9] sm:$0x3] }
 0x8d1   : > { %6161 = vmatprep.subr.bf16.mxu0 %v6634_v62 }
 0x8d3   : > { %6146 = vmatmul.mubr.msk.bf16.vlgmr.msra.gmra.mxu0 %vm1971_vm4, %v7671_v8 }
 0x8d4   : > { %6162 = vmatpush3.bf16.msra.mxu0 %v7438_v48  ;;  %6169 = vmatprep.mubr.msk.bf16.mxu0 %vm6635_vm3, %v6634_v62  ;;  %v3456_v48 = vsub.s32 1, %v3451_v42 }
 0x8d5   : > { %6163 = vmatprep.subr.bf16.mxu0 %v6634_v62 }
 0x8d8   : > { %6164 = vmatpush3.bf16.msra.mxu0 %v7449_v50  ;;  %v7805_v50 = vrot.slane %v1858_v46, %v3452_v44 }
 0x8d9   : > { %6165 = vmatprep.subr.bf16.mxu0 %v6634_v62 }
 0x8dc   : > { %6166 = vmatpush3.bf16.msra.mxu0 %v7460_v52  ;;  %v7807_v52 = vrot.slane %v1858_v46, %v3456_v48  ;;  %v6506_v46 = vld [vmem:[%s6855_s19 + $0x58] sm:$0xff]  }
 0x8dd   : > { %6167 = vmatprep.subr.bf16.mxu0 %v6634_v62 }
 0x8e0   : > { %6168 = vmatpush3.bf16.msra.mxu0 %v7467_v54 }
 0x8e1   : > { %6185 = vmatprep.subr.bf16.mxu0 %v6634_v62 }
 0x8e3   : > { %6170 = vmatmul.mubr.msk.bf16.vlgmr.msra.gmra.mxu0 %vm1971_vm4, %v7671_v8 }
 0x8e4   : > { %6187 = vmatprep.mubr.msk.bf16.mxu0 %vm6635_vm3, %v6634_v62 }
 0x933   : > { %v3537_v31 = vpop.f32.mrf.mxu0 }
 0x934   : > { %v3538_v54 = vadd.f32 %v3537_v31, %v7805_v50  ;;  %v6507_v31 = vld [vmem:[%s6855_s19 + $0x50] sm:$0xff]  }
 0x935   : > { %v3539_v33 = vpop.f32.mrf.mxu0 }
 0x936   : > { %v3547_v37 = vmul.f32 0.70710677, %v3538_v54  ;;  %v3540_v41 = vadd.f32 %v3539_v33, %v7807_v52  ;;  %v3544_v57 = vmul.f32 0.5, %v3538_v54 }
 0x937   : > { %v3541_v59 = vpop.f32.mrf.mxu0 }
 0x938   : > { %6474 = verf.f32 %v3547_v37  ;;  %v3548_v53 = vmul.f32 0.70710677, %v3540_v41  ;;  %v3545_v63 = vmul.f32 0.5, %v3540_v41  ;;  %v6508_v37 = vld [vmem:[%s6855_s19 + $0x48] sm:$0xff]   ;;  %v6509_v59 = vld [vmem:[%s6855_s19 + $0x40] sm:$0xff]  }
 0x939   : > { %v3542_v60 = vpop.f32.mrf.mxu0 }
 0x93a   : > { %6476 = verf.f32 %v3548_v53  ;;  %v6510_v53 = vld [vmem:[%s6866_s30 + $0x18] sm:$0xff]  }
 0x943   : > { %v7811_v58 = vpop.f32.mrf.mxu0 }
 0x945   : > { %v6475_v61 = vpop.eup %6474  ;;  %v6039_v10 = vpop.f32.mrf.mxu0 }
 0x946   : > { %v3551_v12 = vadd.f32 1.0, %v6475_v61  ;;  %v6511_v61 = vld [vmem:[%s6866_s30 + $0x10] sm:$0xff]  }
 0x947   : > { %v6477_v4 = vpop.eup %6476  ;;  %v3759_v0 = vpop.f32.mrf.mxu0 }
 0x948   : > { %v3552_v2 = vadd.f32 1.0, %v6477_v4  ;;  %v3553_v1 = vmul.f32 %v3551_v12, %v3544_v57  ;;  %v6512_v4 = vld [vmem:[%s6866_s30 + $0x8] sm:$0xff]   ;;  %v6513_v0 = vld [vmem:[%s6866_s30] sm:$0xff]  }
 0x949   : > { %v6040_v6 = vpop.f32.mrf.mxu0 }
 0x94a   : > { %v3554_v40 = vmul.f32 %v3552_v2, %v3545_v63  ;;  %v3555_v44 = vpack.c.bf16 %v3553_v1, %v3553_v1  ;;  %v6514_v63 = vld [vmem:[%s6866_s30 + $0x58] sm:$0xff]   ;;  %v6515_v1 = vld [vmem:[%s6866_s30 + $0x50] sm:$0xff]  }
 0x94c   : > { %v3556_v42 = vpack.c.bf16 %v3554_v40, %v3554_v40 }
 0x94e   : > { %3691 = vmatprep.mubr.bf16.mxu1 %v3556_v42  ;;  %v6516_v42 = vld [vmem:[%s6866_s30 + $0x48] sm:$0xff]  }
 0x94f   : > { %3692 = vmatmul.mubr.bf16.vlgmr.msra.gmra.mxu1 %v3555_v44 }
 0x950   : > { %6054 = vmatpush3.bf16.msra.mxu1 %v6506_v46  ;;  %6061 = vmatprep.mubr.msk.bf16.mxu1 %vm6635_vm3, %v6634_v62  ;;  %v6517_v46 = vld [vmem:[%s6866_s30 + $0x40] sm:$0xff]  }
 0x951   : > { %6055 = vmatprep.subr.bf16.mxu1 %v6634_v62 }
 0x953   : > { %v7817_v48 = vpop.f32.mrf.mxu0 }
 0x954   : > { %6056 = vmatpush3.bf16.msra.mxu1 %v6507_v31  ;;  %v6518_v31 = vld [vmem:[%s6876_s1 + $0x18] sm:$0xff]  }
 0x955   : > { %6057 = vmatprep.subr.bf16.mxu1 %v6634_v62  ;;  %v6051_v54 = vpop.f32.mrf.mxu0 }
 0x957   : > { %v3799_v33 = vpop.f32.mrf.mxu0 }
 0x958   : > { %6058 = vmatpush3.bf16.msra.mxu1 %v6508_v37  ;;  %v6519_v33 = vld [vmem:[%s6876_s1 + $0x10] sm:$0xff]  }
 0x959   : > { %6059 = vmatprep.subr.bf16.mxu1 %v6634_v62  ;;  %v6052_v41 = vpop.f32.mrf.mxu0 }
 0x95c   : > { %6060 = vmatpush3.bf16.msra.mxu1 %v6509_v59  ;;  %v6520_v59 = vld [vmem:[%s6876_s1 + $0x8] sm:$0xff]  }
 0x95d   : > { %6077 = vmatprep.subr.bf16.mxu1 %v6634_v62 }
 0x95f   : > { %6062 = vmatmul.mubr.msk.bf16.vlgmr.msra.gmra.mxu1 %vm1971_vm4, %v7671_v8 }
 0x960   : > { %6078 = vmatpush3.bf16.msra.mxu1 %v6510_v53  ;;  %6085 = vmatprep.mubr.msk.bf16.mxu1 %vm6635_vm3, %v6634_v62 }
 0x961   : > { %6079 = vmatprep.subr.bf16.mxu1 %v6634_v62 }
 0x963   : > { %v7831_v60 = vpop.f32.mrf.mxu0 }
 0x964   : > { %6080 = vmatpush3.bf16.msra.mxu1 %v6511_v61  ;;  %v6521_v61 = vld [vmem:[%s6876_s1] sm:$0xff]  }
 0x965   : > { %v6075_v10 = vpop.f32.mrf.mxu0  ;;  %6081 = vmatprep.subr.bf16.mxu1 %v6634_v62 }
 0x966   : > { %v6522_v10 = vld [vmem:[%s6876_s1 + $0x58] sm:$0xff]  }
 0x967   : > { %v3879_v12 = vpop.f32.mrf.mxu0 }
 0x968   : > { %6082 = vmatpush3.bf16.msra.mxu1 %v6512_v4  ;;  %v6523_v4 = vld [vmem:[%s6876_s1 + $0x50] sm:$0xff]  }
 0x969   : > { %v6076_v57 = vpop.f32.mrf.mxu0  ;;  %6083 = vmatprep.subr.bf16.mxu1 %v6634_v62 }
 0x96c   : > { %6084 = vmatpush3.bf16.msra.mxu1 %v6513_v0 }
 0x96d   : > { %6101 = vmatprep.subr.bf16.mxu1 %v6634_v62 }
 0x96f   : > { %6086 = vmatmul.mubr.msk.bf16.vlgmr.msra.gmra.mxu1 %vm1971_vm4, %v7671_v8 }
 0x970   : > { %6102 = vmatpush3.bf16.msra.mxu1 %v6514_v63  ;;  %6109 = vmatprep.mubr.msk.bf16.mxu1 %vm6635_vm3, %v6634_v62  ;;  %v6524_v63 = vld [vmem:[%s6876_s1 + $0x48] sm:$0xff]  }
 0x971   : > { %6103 = vmatprep.subr.bf16.mxu1 %v6634_v62 }
 0x973   : > { %v7845_v2 = vpop.f32.mrf.mxu0 }
 0x974   : > { %6104 = vmatpush3.bf16.msra.mxu1 %v6515_v1 }
 0x975   : > { %v6099_v6 = vpop.f32.mrf.mxu0  ;;  %6105 = vmatprep.subr.bf16.mxu1 %v6634_v62 }
 0x976   : > { %v6525_v6 = vld [vmem:[%s6876_s1 + $0x40] sm:$0xff]  }
 0x977   : > { %v3959_v40 = vpop.f32.mrf.mxu0 }
 0x978   : > { %6106 = vmatpush3.bf16.msra.mxu1 %v6516_v42 }
 0x979   : > { %v6100_v44 = vpop.f32.mrf.mxu0  ;;  %6107 = vmatprep.subr.bf16.mxu1 %v6634_v62 }
 0x97c   : > { %6108 = vmatpush3.bf16.msra.mxu1 %v6517_v46 }
 0x97d   : > { %6125 = vmatprep.subr.bf16.mxu1 %v6634_v62 }
 0x97f   : > { %6110 = vmatmul.mubr.msk.bf16.vlgmr.msra.gmra.mxu1 %vm1971_vm4, %v7671_v8 }
 0x980   : > { %6126 = vmatpush3.bf16.msra.mxu1 %v6518_v31  ;;  %6133 = vmatprep.mubr.msk.bf16.mxu1 %vm6635_vm3, %v6634_v62 }
 0x981   : > { %6127 = vmatprep.subr.bf16.mxu1 %v6634_v62 }
 0x983   : > { %v7859_v54 = vpop.f32.mrf.mxu0 }
 0x984   : > { %6128 = vmatpush3.bf16.msra.mxu1 %v6519_v33  ;;  %v7892_v33 = vld [vmem:[%s997_s28] ss:$0 sm:$0xff] }
 0x985   : > { %v6123_v37 = vpop.f32.mrf.mxu0  ;;  %6129 = vmatprep.subr.bf16.mxu1 %v6634_v62 }
 0x987   : > { %v4039_v41 = vpop.f32.mrf.mxu0 }
 0x988   : > { %6130 = vmatpush3.bf16.msra.mxu1 %v6520_v59 }
 0x989   : > { %v6124_v53 = vpop.f32.mrf.mxu0  ;;  %6131 = vmatprep.subr.bf16.mxu1 %v6634_v62 }
 0x98c   : > { %6132 = vmatpush3.bf16.msra.mxu1 %v6521_v61 }
 0x98d   : > { %6149 = vmatprep.subr.bf16.mxu1 %v6634_v62 }
 0x98f   : > { %6134 = vmatmul.mubr.msk.bf16.vlgmr.msra.gmra.mxu1 %vm1971_vm4, %v7671_v8 }
 0x990   : > { %6150 = vmatpush3.bf16.msra.mxu1 %v6522_v10  ;;  %6157 = vmatprep.mubr.msk.bf16.mxu1 %vm6635_vm3, %v6634_v62 }
 0x991   : > { %6151 = vmatprep.subr.bf16.mxu1 %v6634_v62 }
 0x993   : > { %v7873_v12 = vpop.f32.mrf.mxu0 }
 0x994   : > { %6152 = vmatpush3.bf16.msra.mxu1 %v6523_v4 }
 0x995   : > { %v6147_v57 = vpop.f32.mrf.mxu0  ;;  %6153 = vmatprep.subr.bf16.mxu1 %v6634_v62 }
 0x997   : > { %v4119_v0 = vpop.f32.mrf.mxu0 }
 0x998   : > { %6154 = vmatpush3.bf16.msra.mxu1 %v6524_v63 }
 0x999   : > { %v6148_v1 = vpop.f32.mrf.mxu0  ;;  %6155 = vmatprep.subr.bf16.mxu1 %v6634_v62 }
 0x99a   : > { %v6526_v1 = vld [vmem:[%s6871_s0] ss:$0 sm:$0xff] }
 0x99c   : > { %6156 = vmatpush3.bf16.msra.mxu1 %v6525_v6 }
 0x99d   : > { %6173 = vmatprep.subr.bf16.mxu1 %v6634_v62 }
 0x99f   : > { %6158 = vmatmul.mubr.msk.bf16.vlgmr.msra.gmra.mxu1 %vm1971_vm4, %v7671_v8 }
 0x9a0   : > { %6175 = vmatprep.mubr.msk.bf16.mxu1 %vm6635_vm3, %v6634_v62 }
 0x9a3   : > { %v7885_v40 = vpop.f32.mrf.mxu0 }
 0x9a5   : > { %v6171_v42 = vpop.f32.mrf.mxu0 }
 0x9a7   : > { %v4199_v44 = vpop.f32.mrf.mxu0 }
 0x9a9   : > { %v6172_v46 = vpop.f32.mrf.mxu0 }
 0xa0f   : > { %v5701_v31 = vpop.f32.mrf.mxu1 }
 0xa11   : > { %v5702_v37 = vpop.f32.mrf.mxu1 }
 0xa12   : > { %v5703_v41 = vadd.f32 %v5702_v37, %v5701_v31  ;;  %v6527_v31 = vld [vmem:[%s6871_s0 + $0x1] ss:$0 sm:$0xff] }
 0xa13   : > { %v5704_v8 = vpop.f32.mrf.mxu1  ;;  %v3957_v37 = vadd.f32 %v6527_v31, %v7845_v2  ;;  %v6530_v2 = vld [vmem:[%s8187_s24 + $0x1] ss:$0 sm:$0xff]  ;;  %v4117_v31 = vadd.f32 %v7508_v29, %v7873_v12 }
 0xa14   : > { %v3694_v59 = vadd.f32 %v5703_v41, %v7892_v33  ;;  %v6528_v8 = vld [vmem:[%s8187_s24] ss:$0 sm:$0xff] }
 0xa15   : > { %v5705_v53 = vpop.f32.mrf.mxu1  ;;  %v4447_v29 = vpack.c.bf16 %v4117_v31, %v4117_v31 }
 0xa16   : > { %v3699_v61 = vadd.f32 %v3694_v59, %v7590_v45  ;;  %v3757_v59 = vadd.f32 %v6528_v8, %v7811_v58  ;;  %v4207_v53 = vpack.c.bf16 %v3957_v37, %v3957_v37  ;;  %v6532_v8 = vld [vmem:[%s8187_s24 + $0x3] ss:$0 sm:$0xff] }
 0xa18   : > { %3700 = vst.msk [vmem:[#allocation2] sm:$0x1f] %vm1893_vm2, %v3699_v61  ;;  %v4202_v61 = vpack.c.bf16 %v3757_v59, %v3757_v59  ;;  %v3877_v59 = vadd.f32 %v6532_v8, %v7831_v60 }
 0xa1a   : > { %v4205_v12 = vpack.c.bf16 %v3877_v59, %v3877_v59 }
 0xa1f   : > { %v3836_v10 = vpop.f32.mrf.mxu1 }
 0xa21   : > { %v6063_v4 = vpop.f32.mrf.mxu1 }
 0xa22   : > { %v4260_v4 = vsel %vm2775_vm5, %v4207_v53, 0  ;;  %v6533_v53 = vld [vmem:[%s8187_s24 + $0x2] ss:$0 sm:$0xff] }
 0xa23   : > { %v3839_v57 = vpop.f32.mrf.mxu1 }
 0xa24   : > { %v6529_v57 = vld [vmem:[%s6871_s0 + $0x3] ss:$0 sm:$0xff] }
 0xa25   : > { %v6064_v0 = vpop.f32.mrf.mxu1 }
 0xa26   : > { %v4037_v0 = vadd.f32 %v6529_v57, %v7859_v54  ;;  %v4500_v57 = vand.u32 %v4447_v29, %v7515_v39 }
 0xa2f   : > { %v3916_v63 = vpop.f32.mrf.mxu1 }
 0xa30   : > { %v3917_v6 = vadd.f32 %v6526_v1, %v3916_v63  ;;  %v3797_v63 = vadd.f32 %v6530_v2, %v7817_v48  ;;  %v4209_v1 = vpack.c.bf16 %v4037_v0, %v4037_v0 }
 0xa31   : > { %v6087_v42 = vpop.f32.mrf.mxu1 }
 0xa32   : > { %v4206_v44 = vpack.c.bf16 %v3917_v6, %v3917_v6  ;;  %v6531_v6 = vld [vmem:[%s6871_s0 + $0x2] ss:$0 sm:$0xff] }
 0xa33   : > { %v3919_v46 = vpop.f32.mrf.mxu1 }
 0xa34   : > { %v4214_v45 = vsel %vm2775_vm5, %v4206_v44, 0  ;;  %v4203_v46 = vpack.c.bf16 %v3797_v63, %v3797_v63 }
 0xa35   : > { %v6088_v41 = vpop.f32.mrf.mxu1  ;;  %6174 = vmatpush3.bf16.xpose.msra.mxu1 %v4214_v45  ;;  %v4352_v45 = vsel %vm2775_vm5, %v4209_v1, 0 }
 0xa36   : > { %6179 = vmatprep.subr.bf16.mxu1 %v6634_v62 }
 0xa3c   : > { %6176 = vmatmul.mubr.msk.bf16.vlgmr.msra.gmra.mxu1 %vm2775_vm5, %v4202_v61  ;;  %v3837_v61 = vadd.f32 %v6533_v53, %v3836_v10  ;;  %v6534_v10 = vld [vmem:[%s8188_s12] ss:$0 sm:$0xff] }
 0xa3d   : > { %6180 = vmatpush3.bf16.xpose.msra.mxu1 %v4260_v4  ;;  %6181 = vmatprep.mubr.msk.bf16.mxu1 %vm6635_vm3, %v6634_v62 }
 0xa3e   : > { %6191 = vmatprep.subr.bf16.mxu1 %v6634_v62  ;;  %v4204_v4 = vpack.c.bf16 %v3837_v61, %v3837_v61 }
 0xa3f   : > { %v3996_v58 = vpop.f32.mrf.mxu1 }
 0xa40   : > { %v3997_v42 = vadd.f32 %v6531_v6, %v3996_v58 }
 0xa41   : > { %v6111_v44 = vpop.f32.mrf.mxu1 }
 0xa42   : > { %v4208_v54 = vpack.c.bf16 %v3997_v42, %v3997_v42 }
 0xa43   : > { %v3999_v37 = vpop.f32.mrf.mxu1 }
 0xa44   : > { %v4306_v41 = vsel %vm2775_vm5, %v4208_v54, 0  ;;  %6182 = vmatmul.mubr.msk.bf16.vlgmr.msra.gmra.mxu1 %vm2775_vm5, %v4203_v46 }
 0xa45   : > { %v6112_v48 = vpop.f32.mrf.mxu1  ;;  %6186 = vmatpush3.bf16.xpose.msra.mxu0 %v4306_v41  ;;  %6192 = vmatpush3.bf16.xpose.msra.mxu1 %v4352_v45 }
 0xa46   : > { %6193 = vmatprep.mubr.msk.bf16.mxu1 %vm6635_vm3, %v6634_v62  ;;  %6203 = vmatprep.subr.bf16.mxu1 %v6634_v62 }
 0xa47   : > { %6197 = vmatprep.subr.bf16.mxu0 %v6634_v62 }
 0xa4c   : > { %6188 = vmatmul.mubr.msk.bf16.vlgmr.msra.gmra.mxu0 %vm2775_vm5, %v4204_v4  ;;  %6194 = vmatmul.mubr.msk.bf16.vlgmr.msra.gmra.mxu1 %vm2775_vm5, %v4205_v12 }
 0xa4d   : > { %6204 = vmatpush3.bf16.msra.mxu1 %v4500_v57  ;;  %6199 = vmatprep.mubr.msk.bf16.mxu0 %vm6635_vm3, %v6634_v62 }
 0xa4e   : > { %6205 = vmatprep.mubr.msk.bf16.mxu1 %vm6635_vm3, %v6634_v62  ;;  %6215 = vmatprep.subr.bf16.mxu1 %v6634_v62 }
 0xa4f   : > { %v4076_v60 = vpop.f32.mrf.mxu1 }
 0xa50   : > { %v4077_v0 = vadd.f32 %v6534_v10, %v4076_v60 }
 0xa51   : > { %v6135_v2 = vpop.f32.mrf.mxu1 }
 0xa52   : > { %v4446_v63 = vpack.c.bf16 %v4077_v0, %v4077_v0 }
 0xa53   : > { %v4079_v58 = vpop.f32.mrf.mxu1 }
 0xa54   : > { %v4454_v1 = vand.u32 %v4446_v63, %v7515_v39 }
 0xa55   : > { %v6136_v6 = vpop.f32.mrf.mxu1 }
 0xa56   : > { %6198 = vmatpush3.bf16.msra.mxu0 %v4454_v1 }
 0xa57   : > { %6209 = vmatprep.subr.bf16.mxu0 %v6634_v62 }
 0xa5f   : > { %v7937_v42 = vpop.f32.mrf.mxu1 }
 0xa61   : > { %v6159_v44 = vpop.f32.mrf.mxu1 }
 0xa63   : > { %v4159_v46 = vpop.f32.mrf.mxu1 }
 0xa65   : > { %v6160_v54 = vpop.f32.mrf.mxu1 }
 0xafc   : > { %v4250_v31 = vpop.f32.mrf.mxu1 }
 0xafd   : > { %v4394_v37 = vmul.f32 0.25, %v4250_v31 }
 0xafe   : > { %v6177_v45 = vpop.f32.mrf.mxu1 }
 0xaff   : > { %v4398_v41 = vsel %vm2964_vm8, %v4394_v37, -inf }
 0xb00   : > { %4399 = vmax.xlane.f32.xlu0 %v4398_v41  ;;  %v4253_v48 = vpop.f32.mrf.mxu1 }
 0xb02   : > { %v6178_v8 = vpop.f32.mrf.mxu1 }
 0xb04   : > { %v4296_v59 = vpop.f32.mrf.mxu1 }
 0xb05   : > { %v4395_v53 = vmul.f32 0.25, %v4296_v59 }
 0xb06   : > { %v6183_v61 = vpop.f32.mrf.mxu1 }
 0xb07   : > { %v4401_v29 = vsel %vm2964_vm8, %v4395_v53, -inf }
 0xb08   : > { %4402 = vmax.xlane.f32.xlu1 %v4401_v29  ;;  %v4299_v12 = vpop.f32.mrf.mxu1 }
 0xb0a   : > { %v6184_v4 = vpop.f32.mrf.mxu1 }
 0xb0c   : > { %v4342_v57 = vpop.f32.mrf.mxu0  ;;  %v4388_v60 = vpop.f32.mrf.mxu1 }
 0xb0d   : > { %v4396_v10 = vmul.f32 0.25, %v4342_v57  ;;  %v4397_v0 = vmul.f32 0.25, %v4388_v60 }
 0xb0e   : > { %v6189_v2 = vpop.f32.mrf.mxu0  ;;  %v6195_v63 = vpop.f32.mrf.mxu1 }
 0xb0f   : > { %v4404_v58 = vsel %vm2964_vm8, %v4396_v10, -inf  ;;  %v4407_v1 = vsel %vm2964_vm8, %v4397_v0, -inf }
 0xb10   : > { %v4345_v6 = vpop.f32.mrf.mxu0  ;;  %4405 = vmax.xlane.f32.xlu0 %v4404_v58  ;;  %4408 = vmax.xlane.f32.xlu1 %v4407_v1  ;;  %v4391_v44 = vpop.f32.mrf.mxu1 }
 0xb12   : > { %v6190_v46 = vpop.f32.mrf.mxu0  ;;  %v6196_v54 = vpop.f32.mrf.mxu1 }
 0xb13   : > { %v4157_v46 = vadd.f32 %v7534_v27, %v7937_v42 }
 0xb89   : > { %v4400_v31 = vpop.xlane.xlu0 %4399 }
 0xb8a   : > { %v4410_v45 = vsub.f32 %v4394_v37, %v4400_v31  ;;  %v4448_v31 = vpack.c.bf16 %v4157_v46, %v4157_v46 }
 0xb8c   : > { %v4414_v41 = vmul.f32 1.442695, %v4410_v45 }
 0xb8e   : > { %6478 = vpow2.f32 %v4414_v41 }
 0xb91   : > { %v4403_v48 = vpop.xlane.xlu1 %4402 }
 0xb92   : > { %v4411_v8 = vsub.f32 %v4395_v53, %v4403_v48 }
 0xb94   : > { %v4416_v59 = vmul.f32 1.442695, %v4411_v8 }
 0xb96   : > { %6480 = vpow2.f32 %v4416_v59  ;;  %v4197_v59 = vadd.f32 %v7539_v35, %v7885_v40 }
 0xb98   : > { %v4449_v42 = vpack.c.bf16 %v4197_v59, %v4197_v59 }
 0xb99   : > { %v4406_v61 = vpop.xlane.xlu0 %4405  ;;  %v4409_v29 = vpop.xlane.xlu1 %4408 }
 0xb9a   : > { %v4412_v12 = vsub.f32 %v4396_v10, %v4406_v61  ;;  %v4413_v4 = vsub.f32 %v4397_v0, %v4409_v29  ;;  %v4546_v61 = vand.u32 %v4448_v31, %v7515_v39 }
 0xb9b   : > { %v6479_v57 = vpop.eup %6478 }
 0xb9c   : > { %v4418_v60 = vmul.f32 1.442695, %v4412_v12  ;;  %v4420_v2 = vmul.f32 1.442695, %v4413_v4  ;;  %v4422_v63 = vsel %vm2964_vm8, %v6479_v57, 0.0  ;;  %v4592_v4 = vand.u32 %v4449_v42, %v7515_v39 }
 0xb9d   : > { %4423 = vadd.xlane.f32.xlu0 %v4422_v63 }
 0xb9e   : > { %6482 = vpow2.f32 %v4418_v60 }
 0xb9f   : > { %6484 = vpow2.f32 %v4420_v2 }
 0xba3   : > { %v6481_v58 = vpop.eup %6480 }
 0xba4   : > { %v4425_v37 = vsel %vm2964_vm8, %v6481_v58, 0.0 }
 0xba5   : > { %4426 = vadd.xlane.f32.xlu1 %v4425_v37 }
 0xbab   : > { %v6483_v1 = vpop.eup %6482 }
 0xbac   : > { %v6485_v53 = vpop.eup %6484  ;;  %v4428_v6 = vsel %vm2964_vm8, %v6483_v1, 0.0 }
 0xbad   : > { %4429 = vadd.xlane.f32.xlu0 %v4428_v6  ;;  %v4431_v10 = vsel %vm2964_vm8, %v6485_v53, 0.0 }
 0xbae   : > { %4432 = vadd.xlane.f32.xlu1 %v4431_v10 }
 0xc26   : > { %v4424_v0 = vpop.xlane.xlu0 %4423 }
 0xc27   : > { %6486 = vrcp.f32 %v4424_v0 }
 0xc2e   : > { %v4427_v44 = vpop.xlane.xlu1 %4426 }
 0xc2f   : > { %6488 = vrcp.f32 %v4427_v44 }
 0xc34   : > { %v6487_v54 = vpop.eup %6486 }
 0xc35   : > { %v4438_v45 = vmul.f32 %v6487_v54, %v6479_v57 }
 0xc36   : > { %v4430_v41 = vpop.xlane.xlu0 %4429 }
 0xc37   : > { %6490 = vrcp.f32 %v4430_v41  ;;  %v4433_v48 = vpop.xlane.xlu1 %4432  ;;  %v4442_v8 = vpack.c.bf16 %v4438_v45, %v4438_v45 }
 0xc38   : > { %6492 = vrcp.f32 %v4433_v48 }
 0xc39   : > { %6200 = vmatmul.mubr.msk.bf16.vlgmr.msra.gmra.mxu0 %vm3017_vm9, %v4442_v8  ;;  %v6536_v8 = vld [vmem:[#allocation2 + $0x8] sm:$0x1f] }
 0xc3a   : > { %6210 = vmatpush3.bf16.msra.mxu0 %v4546_v61  ;;  %6211 = vmatprep.mubr.msk.bf16.mxu0 %vm6635_vm3, %v6634_v62 }
 0xc3b   : > { %6221 = vmatprep.subr.bf16.mxu0 %v6634_v62 }
 0xc3c   : > { %v6489_v27 = vpop.eup %6488 }
 0xc3d   : > { %v4439_v29 = vmul.f32 %v6489_v27, %v6481_v58 }
 0xc3f   : > { %v4443_v12 = vpack.c.bf16 %v4439_v29, %v4439_v29 }
 0xc41   : > { %6206 = vmatmul.mubr.msk.bf16.vlgmr.msra.gmra.mxu1 %vm3017_vm9, %v4443_v12 }
 0xc42   : > { %6216 = vmatpush3.bf16.msra.mxu1 %v4592_v4  ;;  %6217 = vmatprep.mubr.msk.bf16.mxu1 %vm6635_vm3, %v6634_v62 }
 0xc43   : > { %6227 = vmatprep.subr.bf16.mxu1 %v6634_v62 }
 0xc44   : > { %v6491_v35 = vpop.eup %6490 }
 0xc45   : > { %v6493_v40 = vpop.eup %6492  ;;  %v4440_v57 = vmul.f32 %v6491_v35, %v6483_v1 }
 0xc46   : > { %v4441_v60 = vmul.f32 %v6493_v40, %v6485_v53 }
 0xc47   : > { %v4444_v2 = vpack.c.bf16 %v4440_v57, %v4440_v57 }
 0xc48   : > { %v4445_v63 = vpack.c.bf16 %v4441_v60, %v4441_v60 }
 0xc49   : > { %6212 = vmatmul.mubr.msk.bf16.vlgmr.msra.gmra.mxu0 %vm3017_vm9, %v4444_v2 }
 0xc4a   : > { %6218 = vmatmul.mubr.msk.bf16.vlgmr.msra.gmra.mxu1 %vm3017_vm9, %v4445_v63  ;;  %6222 = vmatpush3.bf16.msra.mxu0 %v7560_v14 }
 0xc4b   : > { %6223 = vmatprep.mubr.msk.bf16.mxu0 %vm6635_vm3, %v6634_v62  ;;  %6228 = vmatpush3.bf16.msra.mxu1 %v7565_v16 }
 0xc4c   : > { %6229 = vmatprep.mubr.msk.bf16.mxu1 %vm6635_vm3, %v6634_v62  ;;  %6233 = vmatprep.subr.bf16.mxu0 %v6634_v62 }
 0xc4d   : > { %6239 = vmatprep.subr.bf16.mxu1 %v6634_v62 }
 0xcf9   : > { %v4490_v39 = vpop.f32.mrf.mxu0 }
 0xcfa   : > { %v4634_v58 = vpack.c.bf16 %v4490_v39, %v4490_v39 }
 0xcfb   : > { %v6201_v37 = vpop.f32.mrf.mxu0 }
 0xcfc   : > { %6224 = vmatmul.mubr.msk.bf16.vlgmr.msra.gmra.mxu0 %vm2775_vm5, %v4634_v58 }
 0xcfd   : > { %v4493_v1 = vpop.f32.mrf.mxu0  ;;  %6234 = vmatpush3.bf16.msra.mxu0 %v7570_v9  ;;  %6235 = vmatprep.mubr.msk.bf16.mxu0 %vm6635_vm3, %v6634_v62 }
 0xcfe   : > { %4846 = vmatprep.subr.bf16.mxu0 %v7599_v3 }
 0xcff   : > { %v6202_v14 = vpop.f32.mrf.mxu0 }
 0xd01   : > { %v4536_v16 = vpop.f32.mrf.mxu1 }
 0xd02   : > { %v4635_v53 = vpack.c.bf16 %v4536_v16, %v4536_v16 }
 0xd03   : > { %v6207_v6 = vpop.f32.mrf.mxu1 }
 0xd04   : > { %6230 = vmatmul.mubr.msk.bf16.vlgmr.msra.gmra.mxu1 %vm2775_vm5, %v4635_v53 }
 0xd05   : > { %v4539_v10 = vpop.f32.mrf.mxu1  ;;  %6240 = vmatpush3.bf16.msra.mxu1 %v7577_v19  ;;  %6241 = vmatprep.mubr.msk.bf16.mxu1 %vm6635_vm3, %v6634_v62 }
 0xd06   : > { %5791 = vmatprep.subr.bf16.mxu1 %v7633_v43 }
 0xd07   : > { %v6208_v9 = vpop.f32.mrf.mxu1 }
 0xd09   : > { %v4582_v0 = vpop.f32.mrf.mxu0 }
 0xd0a   : > { %v4636_v44 = vpack.c.bf16 %v4582_v0, %v4582_v0  ;;  %v4628_v46 = vpop.f32.mrf.mxu1 }
 0xd0b   : > { %v4637_v54 = vpack.c.bf16 %v4628_v46, %v4628_v46  ;;  %v6213_v3 = vpop.f32.mrf.mxu0 }
 0xd0c   : > { %v6219_v31 = vpop.f32.mrf.mxu1  ;;  %6236 = vmatmul.mubr.msk.bf16.vlgmr.msra.gmra.mxu0 %vm2775_vm5, %v4636_v44 }
 0xd0d   : > { %6242 = vmatmul.mubr.msk.bf16.vlgmr.msra.gmra.mxu1 %vm2775_vm5, %v4637_v54  ;;  %v4585_v45 = vpop.f32.mrf.mxu0  ;;  %4847 = vmatpush1.bf16.msra.mxu0 %v7602_v11 }
 0xd0e   : > { %v4631_v19 = vpop.f32.mrf.mxu1  ;;  %4848 = vmatprep.subr.bf16.mxu0 %v7607_v15  ;;  %4870 = vmatprep.mubr.bf16.mxu0 %v6637_v25 }
 0xd0f   : > { %v6214_v62 = vpop.f32.mrf.mxu0  ;;  %5792 = vmatpush3.bf16.msra.mxu1 %v7636_v47 }
 0xd10   : > { %v6220_v43 = vpop.f32.mrf.mxu1  ;;  %5793 = vmatprep.subr.bf16.mxu1 %v7639_v49 }
 0xd11   : > { %4849 = vmatpush1.bf16.msra.mxu0 %v7610_v7 }
 0xd12   : > { %4850 = vmatprep.subr.bf16.mxu0 %v7615_v56 }
 0xd13   : > { %5794 = vmatpush3.bf16.msra.mxu1 %v7712_v5 }
 0xd14   : > { %5795 = vmatprep.subr.bf16.mxu1 %v7722_v13 }
 0xd15   : > { %4851 = vmatpush1.bf16.msra.mxu0 %v7618_v17 }
 0xd16   : > { %4852 = vmatprep.subr.bf16.mxu0 %v7623_v21 }
 0xd17   : > { %5796 = vmatpush3.bf16.msra.mxu1 %v7725_v18 }
 0xd18   : > { %5797 = vmatprep.subr.bf16.mxu1 %v7732_v20 }
 0xd19   : > { %4853 = vmatpush1.bf16.msra.mxu0 %v7626_v23 }
 0xd1b   : > { %5798 = vmatpush3.bf16.msra.mxu1 %v7735_v22 }
 0xd1c   : > { %5799 = vmatprep.subr.bf16.mxu1 %v7742_v24 }
 0xd1f   : > { %5800 = vmatpush3.bf16.msra.mxu1 %v7745_v26 }
 0xd20   : > { %5801 = vmatprep.subr.bf16.mxu1 %v7752_v28 }
 0xd23   : > { %5802 = vmatpush3.bf16.msra.mxu1 %v7755_v30 }
 0xd24   : > { %5803 = vmatprep.subr.bf16.mxu1 %v7766_v32 }
 0xd27   : > { %5804 = vmatpush3.bf16.msra.mxu1 %v7769_v34 }
 0xd28   : > { %5805 = vmatprep.subr.bf16.mxu1 %v7776_v36  ;;  %v6535_v36 = vld [vmem:[%s6893_s29] ss:$0 sm:$0xff]  ;;  %s8194_s29 = sld [smem:[#allocation39_spill]] (!%p5456_p1) }
 0xd2b   : > { %5806 = vmatpush3.bf16.msra.mxu1 %v7779_v38 }
 0xdbc   : > { %v4675_v11 = vpop.f32.mrf.mxu0 }
 0xdbd   : > { %v4810_v49 = vsel %vm1893_vm2, %v4675_v11, 0.0 }
 0xdbe   : > { %v6225_v15 = vpop.f32.mrf.mxu0 }
 0xdc0   : > { %v4678_v7 = vpop.f32.mrf.mxu0 }
 0xdc2   : > { %v6226_v56 = vpop.f32.mrf.mxu0 }
 0xdc4   : > { %v4718_v17 = vpop.f32.mrf.mxu1 }
 0xdc5   : > { %v4811_v25 = vsel %vm1893_vm2, %v4718_v17, 0.0 }
 0xdc6   : > { %v6231_v21 = vpop.f32.mrf.mxu1  ;;  %v4812_v5 = vadd.f32 %v4811_v25, %v4810_v49 }
 0xdc8   : > { %v4721_v23 = vpop.f32.mrf.mxu1 }
 0xdca   : > { %v6232_v47 = vpop.f32.mrf.mxu1 }
 0xdcc   : > { %v4761_v13 = vpop.f32.mrf.mxu0 }
 0xdcd   : > { %v4813_v18 = vsel %vm1893_vm2, %v4761_v13, 0.0  ;;  %v4804_v20 = vpop.f32.mrf.mxu1 }
 0xdce   : > { %v4814_v22 = vadd.f32 %v4813_v18, %v4812_v5  ;;  %v6237_v24 = vpop.f32.mrf.mxu0  ;;  %v4815_v26 = vsel %vm1893_vm2, %v4804_v20, 0.0 }
 0xdcf   : > { %v6243_v28 = vpop.f32.mrf.mxu1 }
 0xdd0   : > { %v4816_v30 = vadd.f32 %v4815_v26, %v4814_v22  ;;  %v4764_v32 = vpop.f32.mrf.mxu0 }
 0xdd1   : > { %v4807_v34 = vpop.f32.mrf.mxu1 }
 0xdd2   : > { %v4817_v38 = vadd.f32 %v6535_v36, %v4816_v30  ;;  %v6238_v41 = vpop.f32.mrf.mxu0 }
 0xdd3   : > { %v6244_v48 = vpop.f32.mrf.mxu1 }
 0xdd4   : > { %v4818_v59 = vadd.f32 %v6536_v8, %v4817_v38 }
 0xdd6   : > { %v4819_v61 = vsel %vm1893_vm2, %v4818_v59, 0.0 }
 0xdd7   : > { %4820 = vadd.xlane.f32.xlu0 %v4819_v61 }
 0xe60   : > { %v4821_v27 = vpop.xlane.xlu0 %4820 }
 0xe61   : > { %v4822_v42 = vmul.f32 0.015625, %v4821_v27 }
 0xe63   : > { %v4823_v29 = vsub.f32 %v4818_v59, %v4822_v42 }
 0xe65   : > { %v4824_v12 = vmul.f32 %v4823_v29, %v4823_v29 }
 0xe67   : > { %v4825_v4 = vsel %vm1893_vm2, %v4824_v12, 0.0 }
 0xe68   : > { %4826 = vadd.xlane.f32.xlu1 %v4825_v4 }
 0xef1   : > { %v4827_v35 = vpop.xlane.xlu1 %4826 }
 0xef2   : > { %v4828_v40 = vmul.f32 0.015625, %v4827_v35 }
 0xef4   : > { %v4829_v57 = vadd.f32 1e-06, %v4828_v40 }
 0xef6   : > { %6494 = vrsqrt.f32 %v4829_v57 }
 0xf03   : > { %v6495_v60 = vpop.eup %6494 }
 0xf04   : > { %v4831_v2 = vmul.f32 %v6495_v60, %v4823_v29 }
 0xf06   : > { %v4832_v63 = vmul.f32 %v7649_v51, %v4831_v2 }
 0xf08   : > { %v4833_v39 = vadd.f32 %v7656_v55, %v4832_v63 }
 0xf0a   : > { %v4834_v58 = vpack.c.bf16 %v4833_v39, %v4833_v39 }
 0xf0c   : > { %5455 = vmatmul.mubr.msk.bf16.vlgmr.msra.gmra.mxu0 %vm1971_vm4, %v4834_v58 }
 0xfcc   : > { %v4872_v37 = vpop.f32.mrf.mxu0 }
 0xfcd   : > { %v4873_v1 = vadd.f32 %v4872_v37, %v7805_v50 }
 0xfce   : > { %v4874_v14 = vpop.f32.mrf.mxu0 }
 0xfcf   : > { %v4881_v16 = vmul.f32 0.70710677, %v4873_v1  ;;  %v4875_v53 = vadd.f32 %v4874_v14, %v7807_v52  ;;  %v4879_v46 = vmul.f32 0.5, %v4873_v1 }
 0xfd0   : > { %v4876_v6 = vpop.f32.mrf.mxu0 }
 0xfd1   : > { %6496 = verf.f32 %v4881_v16  ;;  %v4882_v10 = vmul.f32 0.70710677, %v4875_v53  ;;  %v4880_v55 = vmul.f32 0.5, %v4875_v53 }
 0xfd2   : > { %v4877_v9 = vpop.f32.mrf.mxu0 }
 0xfd3   : > { %6498 = verf.f32 %v4882_v10 }
 0xfde   : > { %v6497_v0 = vpop.eup %6496 }
 0xfdf   : > { %v4885_v44 = vadd.f32 1.0, %v6497_v0 }
 0xfe0   : > { %v6499_v51 = vpop.eup %6498 }
 0xfe1   : > { %v4886_v54 = vadd.f32 1.0, %v6499_v51  ;;  %v4887_v3 = vmul.f32 %v4885_v44, %v4879_v46 }
 0xfe3   : > { %v4888_v31 = vmul.f32 %v4886_v54, %v4880_v55  ;;  %v4889_v19 = vpack.c.bf16 %v4887_v3, %v4887_v3 }
 0xfe5   : > { %v4890_v45 = vpack.c.bf16 %v4888_v31, %v4888_v31 }
 0xfe7   : > { %4923 = vmatprep.mubr.bf16.mxu1 %v4890_v45 }
 0xfe8   : > { %4924 = vmatmul.mubr.bf16.vlgmr.msra.gmra.mxu1 %v4889_v19 }
0x10a8   : > { %v5807_v50 = vpop.f32.mrf.mxu1 }
0x10aa   : > { %v5808_v62 = vpop.f32.mrf.mxu1 }
0x10ab   : > { %v5809_v52 = vadd.f32 %v5808_v62, %v5807_v50 }
0x10ac   : > { %v5810_v43 = vpop.f32.mrf.mxu1 }
0x10ad   : > { %v4926_v11 = vadd.f32 %v5809_v52, %v7892_v33  ;;  %4936 = sbr.rel (%p5456_p1) target bundleno = 4593 (0x11f1), region = 120 }
0x10ae   : > { %v5811_v15 = vpop.f32.mrf.mxu1 }
0x10af   : > { %v4931_v7 = vadd.f32 %v4926_v11, %v4818_v59 }
0x10b1   : > { %4932 = vst.msk [vmem:[#allocation2 + $0x8] sm:$0x1f] %vm1893_vm2, %v4931_v7 }
0x10b2   : > { %v4937_v56 = vld [vmem:[#allocation2] sm:$0x1]  ;;  %vm4942_vm10 = vcmask 1040384   ;;  %vm4946_vm11 = vcmask 517120  }
0x10b3   : > { %v5457_v26 = vld [vmem:[%s8194_s29] ss:$0 sm:$0xff] }
0x10b4   : > { %v5458_v30 = vld [vmem:[%s8195_s16] ss:$0 sm:$0xff] }
0x10b8   : > { %v4938_v17 = vld [vmem:[#allocation2 + $0x8] sm:$0x1] }
0x10b9   : > { %v4940_v21 = vrot.slane %v4938_v17, 7 }
0x10bb   : > { %v4943_v23 = vsel %vm4942_vm10, %v4937_v56, %v4940_v21 }
0x10bc   : > { %v4947_v25 = vsel %vm4946_vm11, %v4943_v23, 0.0 }
0x10bd   : > { %4948 = vadd.xlane.f32.xlu0 %v4947_v25 }
0x1146   : > { %v4949_v47 = vpop.xlane.xlu0 %4948 }
0x1147   : > { %v4950_v49 = vmul.f32 0.015625, %v4949_v47 }
0x1149   : > { %v4951_v33 = vsub.f32 %v4943_v23, %v4950_v49 }
0x114b   : > { %v4952_v5 = vmul.f32 %v4951_v33, %v4951_v33 }
0x114d   : > { %v4953_v13 = vsel %vm4946_vm11, %v4952_v5, 0.0 }
0x114e   : > { %4954 = vadd.xlane.f32.xlu0 %v4953_v13 }
0x11d7   : > { %v4955_v18 = vpop.xlane.xlu0 %4954 }
0x11d8   : > { %v4956_v20 = vmul.f32 0.015625, %v4955_v18 }
0x11da   : > { %v4957_v22 = vadd.f32 1e-06, %v4956_v20 }
0x11dc   : > { %6537 = vrsqrt.f32 %v4957_v22 }
0x11e9   : > { %v6538_v24 = vpop.eup %6537 }
0x11ea   : > { %v4959_v28 = vmul.f32 %v6538_v24, %v4951_v33 }
0x11ec   : > { %v4966_v32 = vmul.f32 %v5457_v26, %v4959_v28 }
0x11ee   : > { %v4973_v34 = vadd.f32 %v5458_v30, %v4966_v32 }
0x11f0   : > { %4974 = vst.msk [vmem:[%s926_s14] sm:$0x3] %vm4946_vm11, %v4973_v34 }
0x11f1 PF: > { %s8196_s25 = sld [smem:[#allocation10_spill]]  ;;  %s4989_s23 = sshll.u32 %s926_s14, 4  ;;  %s4990_s23 = int_to_ptr.vmem [resolvable:$true] %s4989_s23 }
0x11f2   : > { %s8197_s5 = sld [smem:[#allocation7_spill]]  ;;  %s6539_s22 = scalar_lea.vmem %s4990_s23, 32 }
0x11f3   : > { %s8199_s8 = sld [smem:[#allocation41_spill]]  ;;  %p6540_p2 = scmp.ne.s32.totalorder %s4990_s23, %s6539_s22 }
0x11f4   : > { %s6638_s21 = smov [#allocation3]  }
0x11f5   : > { %p6541_p4 = pnand %p6540_p2, %p6808_p3  ;;  %s6543_s19 = sshll.u32 %s6638_s21, 4  ;;  %s6544_s19 = int_to_ptr.vmem [resolvable:$false] %s6543_s19 }
0x11f6   : > { %s6545_s30 = scalar_lea.vmem %s6544_s19, 64  ;;  %p6546_p6 = scmp.lt.s32.totalorder %s4990_s23, %s6544_s19 }
0x11f7   : > { %s5460_s11 = sshll.u32 %s8196_s25, 5  ;;  %p6542_p5 = pneg %p6541_p4 }
0x11f8   : > { %s8200_s26 = sand.u32 1, %s8197_s5   ;;  %p6547_p7 = scmp.lt.s32.totalorder %s6545_s30, %s6539_s22 }
0x11f9   : > { %s4987_s7 = scalar_lea.hbm %s8199_s8, %s5460_s11  ;;  %s4976_s2 = scalar_lea.sflag [#allocation4], %s8200_s26 }
0x11fa   : > { %p6548_p8 = por %p6547_p7, %p6546_p6 }
0x11fc   : > { %p6549_p10 = pnand %p6548_p8, %p6542_p5 }
0x11fe   : > { %6552 = shalt.err (!%p6549_p10)
}
0x11ff   : > { %s6553_s9 = scalar_lea.hbm %s4987_s7, 32  ;;  %s6557_s3 = scalar_lea.hbm %s8199_s8, 64 }
0x1200   : > { %p6554_p11 = scmp.ne.s32.totalorder %s4987_s7, %s6553_s9  ;;  %p6558_p0 = scmp.lt.s32.totalorder %s4987_s7, %s8199_s8 }
0x1201   : > { %p6559_p1 = scmp.lt.s32.totalorder %s6557_s3, %s6553_s9 }
0x1202   : > { %p6555_p12 = pnand %p6554_p11, %p6808_p3 }
0x1203   : > { %p6560_p2 = por %p6559_p1, %p6558_p0 }
0x1204   : > { %p6556_p13 = pneg %p6555_p12 }
0x1206   : > { %p6561_p4 = pnand %p6560_p2, %p6556_p13 }
0x1208   : > { %6564 = shalt.err (!%p6561_p4)
}
0x1209   : > { %6246 = dma.vmem_to_hbm [thread:$0]  (%p6808_p3), %s4990_s23, 32, %s4987_s7, %s4976_s2  }
0x120a PF: > { %s8201_s29 = sld [smem:[#allocation13_spill]] }
0x120b   : > { %s8202_s28 = sld [smem:[#allocation6_spill]] }
0x1210   : > { %p6252_p5 = scmp.ge.s32.totalorder %s8201_s29, 2 }
0x1211   : > { %s5001_s16 = sand.u32 1, %s8202_s28  }
0x1212   : > { %p6249_p6 = pnand %p6252_p5, %p6818_p9  ;;  %s5002_s25 = scalar_lea.sflag [#allocation4], %s5001_s16 }
0x1214   : > { %p6250_p7 = pneg %p6249_p6 }
0x1216   : > { %6598 = dma.done.wait (%p6250_p7), %s5002_s25, 32  }
0x1217   : > { %6600 = vsyncadd (%p6250_p7), %s5002_s25, 4294967264  ;;  %s36_s2 = sadd.s32 1, %s8201_s29   ;;  %s8204_s4 = sld [smem:[#allocation7_spill]] }
0x1218   : > { %p33_p8 = scmp.ge.s32.totalorder %s36_s2, 6   ;;  %s8205_s30 = sld [smem:[#allocation8_spill]] }
0x1219   : > { %s8206_s24 = sld [smem:[#allocation18_spill]] }
0x121a   : > { %s8207_s25 = sld [smem:[#allocation11_spill]]  ;;  %35 = sbr.rel (!%p33_p8) target bundleno = 27 (0x1b), region = 206 }
0x121b   : > { %s8208_s5 = sld [smem:[#allocation12_spill]] }
0x121c   : > { %s8209_s1 = sld [smem:[#allocation14_spill]] }
0x121d   : > { %s8210_s26 = sld [smem:[#allocation16_spill]] }
0x121f   :  { %5007 = vsyncpa [#allocation4], 1 }
0x1220   :  { %5009 = vsyncpa [#allocation4 + $0x1], 1 }

</bundles_post_ra>
